<compile_context>
chip_gen: v5e
topology: v5e:2x2
jax: 0.10.0
libtpu: 0.0.40
codegen_flags: <defaults>
</compile_context>

<pallas_src>
import numpy as np

import jax
import jax.numpy as jnp
from jax.experimental import pallas as pl
from jax.experimental.pallas import tpu as pltpu

# scaled-down AlexNet channel widths (same layer structure / kernel sizes /
# strides / paddings as AlexNet, reduced channels, 64x64 input -> 1x1 final map)
C1, C2, C3, C4, C5 = 16, 24, 48, 32, 32
FC = 64
IMG = 64
FC_IN = C5 * 1 * 1

S2D = 4                       # space-to-depth block for folding conv1's stride 4
H0 = (IMG + 2 * 2) // S2D     # 17  (spatial size after pad-2 + space-to-depth)
CIN0 = S2D * S2D * 3          # 48  (channels after space-to-depth)


# ----------------------------------------------------------------------------
# In-kernel helpers (traced inside the Pallas kernel)
# ----------------------------------------------------------------------------
def _vpad(a, p):
    """Zero-pad a (H, W*C) activation by p rows on top and bottom."""
    z = jnp.zeros((p, a.shape[1]), a.dtype)
    return jnp.concatenate([z, a, z], axis=0)


def _conv_rows(xp, w_ref, b_ref, oh):
    """Stride-1 conv + bias + ReLU on (H, W*Cin)-layout activations.

    xp: (oh + kh - 1, Win*Cin) f32 (already vertically padded)
    w_ref: (kh, Win*Cin, ow*Cout) bf16 row-expanded weights
    b_ref: (1, ow*Cout) f32
    returns (oh, ow*Cout) f32
    """
    kh = w_ref.shape[0]
    acc = jnp.dot(xp[0:oh].astype(jnp.bfloat16), w_ref[0],
                  preferred_element_type=jnp.float32)
    for i in range(1, kh):
        acc = acc + jnp.dot(xp[i:i + oh].astype(jnp.bfloat16), w_ref[i],
                            preferred_element_type=jnp.float32)
    return jnp.maximum(acc + b_ref[...], 0.0)


def _pool3x3s2(a, h, c, sv_ref, sh_ref):
    """3x3 / stride-2 max pool on a (h, h*c) activation -> (oh, oh*c)."""
    wc = h * c
    # stride-1 window max (vertical then horizontal), pure slice + vmax
    vmax = jnp.maximum(jnp.maximum(a[0:h - 2], a[1:h - 1]), a[2:h])
    hmax = jnp.maximum(jnp.maximum(vmax[:, 0:wc - 2 * c], vmax[:, c:wc - c]),
                       vmax[:, 2 * c:wc])
    # exact stride-2 subsample via 0/1 selection matmuls (f32, MXU is idle)
    sub = jnp.dot(sv_ref[...], hmax, preferred_element_type=jnp.float32)
    return jnp.dot(sub, sh_ref[...], preferred_element_type=jnp.float32)


def _net_kernel(x_ref,
                w1_ref, b1_ref, sv1_ref, sh1_ref,
                w2_ref, b2_ref, sv2_ref, sh2_ref,
                w3_ref, b3_ref, w4_ref, b4_ref, w5_ref, b5_ref,
                wf1_ref, bf1_ref, wf2_ref, bf2_ref,
                o_ref):
    x = x_ref[0]                                            # (17, 17*48) f32

    a1 = _conv_rows(x, w1_ref, b1_ref, oh=15)               # (15, 15*C1)
    p1 = _pool3x3s2(a1, 15, C1, sv1_ref, sh1_ref)           # (7, 7*C1)
    a2 = _conv_rows(_vpad(p1, 2), w2_ref, b2_ref, oh=7)     # (7, 7*C2)
    p2 = _pool3x3s2(a2, 7, C2, sv2_ref, sh2_ref)            # (3, 3*C2)
    a3 = _conv_rows(_vpad(p2, 1), w3_ref, b3_ref, oh=3)     # (3, 3*C3)
    a4 = _conv_rows(_vpad(a3, 1), w4_ref, b4_ref, oh=3)     # (3, 3*C4)
    a5 = _conv_rows(_vpad(a4, 1), w5_ref, b5_ref, oh=3)     # (3, 3*C5)

    # final 3x3 / stride-2 pool collapses 3x3 -> 1x1
    vmax = jnp.max(a5, axis=0, keepdims=True)               # (1, 3*C5)
    p3 = jnp.maximum(jnp.maximum(vmax[:, 0:C5], vmax[:, C5:2 * C5]),
                     vmax[:, 2 * C5:3 * C5])                # (1, C5)

    # classifier: Dropout-Linear-ReLU-Dropout-Linear-ReLU (dropout = identity)
    h1 = jnp.maximum(
        jnp.dot(p3.astype(jnp.bfloat16), wf1_ref[...],
                preferred_element_type=jnp.float32) + bf1_ref[...], 0.0)
    h2 = jnp.maximum(
        jnp.dot(h1.astype(jnp.bfloat16), wf2_ref[...],
                preferred_element_type=jnp.float32) + bf2_ref[...], 0.0)
    o_ref[0] = h2                                           # (1, FC)


# ----------------------------------------------------------------------------
# Parameter preparation (host-side, done once; pure jnp / numpy)
# ----------------------------------------------------------------------------
def _conv_row_weights(w_hwio, bias, w_in, pad):
    """Expand a stride-1 HWIO conv into per-kernel-row matmul weights.

    Kernel computes out[y, x*cout+co] = sum_i Xpad[y+i] @ Wr[i]; horizontal
    padding is folded into Wr (zero columns for out-of-range taps).
    Returns Wr (kh, w_in*cin, ow*cout) bf16 and bias row (1, ow*cout) f32.
    """
    kh, kw, cin, cout = w_hwio.shape
    ow = w_in + 2 * pad - kw + 1
    sel = np.zeros((kw, w_in, ow), np.float32)   # sel[j, q, x] = [q == x + j - pad]
    for j in range(kw):
        for x in range(ow):
            q = x + j - pad
            if 0 <= q < w_in:
                sel[j, q, x] = 1.0
    wr = jnp.einsum("jqx,ijcd->iqcxd", jnp.asarray(sel), w_hwio)
    wr = wr.reshape(kh, w_in * cin, ow * cout).astype(jnp.bfloat16)
    b_row = jnp.tile(bias, ow).reshape(1, ow * cout).astype(jnp.float32)
    return wr, b_row


def _pool_selectors(hw, c):
    """0/1 matrices implementing the stride-2 subsample of a 3x3 stride-1 pool."""
    oh = (hw - 3) // 2 + 1
    sv = np.zeros((oh, hw - 2), np.float32)
    for y in range(oh):
        sv[y, 2 * y] = 1.0
    sh = np.zeros(((hw - 2) * c, oh * c), np.float32)
    for x in range(oh):
        sh[2 * x * c:2 * x * c + c, x * c:x * c + c] = np.eye(c, dtype=np.float32)
    return jnp.asarray(sv), jnp.asarray(sh)


def prepare_params(params):
    """Convert raw (PyTorch-layout) params into the fused-kernel parameter set."""
    # conv1: 11x11 / stride-4 / pad-2 conv == 3x3 stride-1 conv on a 4x4
    # space-to-depth input (cin = 48). Fold, then expand to row-matmul weights.
    w1, b1 = params["conv1"]                                # (11, 11, 3, C1) HWIO
    m = np.zeros((3, S2D, 11), np.float32)                  # m[b, d, i] = [i == 4b+d]
    for bi in range(3):
        for di in range(S2D):
            i = S2D * bi + di
            if i < 11:
                m[bi, di, i] = 1.0
    m = jnp.asarray(m)
    w1s = jnp.einsum("pdi,qej,ijco->pqdeco", m, m, w1).reshape(3, 3, CIN0, C1)

    return {
        "c1": _conv_row_weights(w1s, b1, w_in=H0, pad=0),
        "c2": _conv_row_weights(*params["conv2"], w_in=7, pad=2),
        "c3": _conv_row_weights(*params["conv3"], w_in=3, pad=1),
        "c4": _conv_row_weights(*params["conv4"], w_in=3, pad=1),
        "c5": _conv_row_weights(*params["conv5"], w_in=3, pad=1),
        "p1": _pool_selectors(15, C1),
        "p2": _pool_selectors(7, C2),
        "f1": (params["fc1"][0].astype(jnp.bfloat16),
               params["fc1"][1].reshape(1, FC).astype(jnp.float32)),
        "f2": (params["fc2"][0].astype(jnp.bfloat16),
               params["fc2"][1].reshape(1, FC).astype(jnp.float32)),
    }


# ----------------------------------------------------------------------------
# Forward pass (single fused pallas_call)
# ----------------------------------------------------------------------------
@jax.jit
def net_forward(kp, x_nchw):
    B = x_nchw.shape[0]
    # NCHW -> NHWC, pad 2 (conv1's padding), 4x4 space-to-depth -> (B, 17, 17*48)
    x = jnp.transpose(x_nchw, (0, 2, 3, 1))
    x = jnp.pad(x, ((0, 0), (2, 2), (2, 2), (0, 0)))
    x = x.reshape(B, H0, S2D, H0, S2D, 3)
    x = x.transpose(0, 1, 3, 2, 4, 5).reshape(B, H0, H0 * CIN0)

    w1, b1 = kp["c1"]; sv1, sh1 = kp["p1"]
    w2, b2 = kp["c2"]; sv2, sh2 = kp["p2"]
    w3, b3 = kp["c3"]; w4, b4 = kp["c4"]; w5, b5 = kp["c5"]
    wf1, bf1 = kp["f1"]; wf2, bf2 = kp["f2"]
    consts = [w1, b1, sv1, sh1, w2, b2, sv2, sh2,
              w3, b3, w4, b4, w5, b5, wf1, bf1, wf2, bf2]

    def const_spec(a):
        nd = a.ndim
        return pl.BlockSpec(a.shape, lambda b: (0,) * nd)   # resident across grid

    in_specs = [pl.BlockSpec((1, H0, H0 * CIN0), lambda b: (b, 0, 0))]
    in_specs += [const_spec(a) for a in consts]

    out = pl.pallas_call(
        _net_kernel,
        out_shape=jax.ShapeDtypeStruct((B, 1, FC), jnp.float32),
        grid_spec=pltpu.PrefetchScalarGridSpec(
            num_scalar_prefetch=0,
            grid=(B,),
            in_specs=in_specs,
            out_specs=pl.BlockSpec((1, 1, FC), lambda b: (b, 0, 0)),
        ),
        compiler_params=pltpu.CompilerParams(
            dimension_semantics=("parallel",),       # batch across TCs on v7x
            vmem_limit_bytes=32 * 1024 * 1024,
        ),
    )(x, *consts)
    return out.reshape(B, FC)


# ----------------------------------------------------------------------------
# Raw parameters (PyTorch-like) and a pure-JAX reference for self-checking
# ----------------------------------------------------------------------------
def init_params(key):
    def conv_p(k, kh, kw, cin, cout):
        k1, k2 = jax.random.split(k)
        scale = 1.0 / jnp.sqrt(float(kh * kw * cin))
        w = jax.random.normal(k1, (kh, kw, cin, cout), jnp.float32) * scale
        b = jax.random.normal(k2, (cout,), jnp.float32) * scale
        return w, b

    def lin_p(k, cin, cout):
        k1, k2 = jax.random.split(k)
        scale = 1.0 / jnp.sqrt(float(cin))
        w = jax.random.normal(k1, (cin, cout), jnp.float32) * scale
        b = jax.random.normal(k2, (cout,), jnp.float32) * scale
        return w, b

    keys = jax.random.split(key, 7)
    return {
        "conv1": conv_p(keys[0], 11, 11, 3, C1),
        "conv2": conv_p(keys[1], 5, 5, C1, C2),
        "conv3": conv_p(keys[2], 3, 3, C2, C3),
        "conv4": conv_p(keys[3], 3, 3, C3, C4),
        "conv5": conv_p(keys[4], 3, 3, C4, C5),
        "fc1": lin_p(keys[5], FC_IN, FC),
        "fc2": lin_p(keys[6], FC, FC),
    }


@jax.jit
def reference_forward(params, x_nchw):
    x = jnp.transpose(x_nchw, (0, 2, 3, 1))

    def conv(x, w, b, stride, pad):
        y = jax.lax.conv_general_dilated(
            x, w, window_strides=(stride, stride),
            padding=[(pad, pad), (pad, pad)],
            dimension_numbers=("NHWC", "HWIO", "NHWC"))
        return jax.nn.relu(y + b)

    def pool(x):
        return jax.lax.reduce_window(x, -jnp.inf, jax.lax.max,
                                     (1, 3, 3, 1), (1, 2, 2, 1), "VALID")

    x = pool(conv(x, *params["conv1"], 4, 2))
    x = pool(conv(x, *params["conv2"], 1, 2))
    x = conv(x, *params["conv3"], 1, 1)
    x = conv(x, *params["conv4"], 1, 1)
    x = pool(conv(x, *params["conv5"], 1, 1))
    B = x.shape[0]
    x = jnp.transpose(x, (0, 3, 1, 2)).reshape(B, -1)       # NCHW flatten order
    x = jax.nn.relu(x @ params["fc1"][0] + params["fc1"][1])
    x = jax.nn.relu(x @ params["fc2"][0] + params["fc2"][1])
    return x


if __name__ == "__main__":
    key = jax.random.PRNGKey(0)
    pkey, xkey = jax.random.split(key)
    params = init_params(pkey)
    kparams = prepare_params(params)
    x = jax.random.normal(xkey, (2, 3, IMG, IMG), jnp.float32)  # NCHW like PyTorch

    out = jax.block_until_ready(net_forward(kparams, x))
    assert out.shape == (2, FC), out.shape
    assert bool(jnp.all(jnp.isfinite(out)))

    ref = jax.block_until_ready(reference_forward(params, x))
    assert bool(jnp.allclose(out, ref, rtol=5e-2, atol=5e-2)), \
        float(jnp.max(jnp.abs(out - ref)))
    print("KERNEL_OK")
</pallas_src>

<mosaic_0001>
module attributes {stable_mosaic.version = 11 : i64} {
  func.func @_net_kernel(%arg0: i32, %arg1: memref<1x17x816xf32, #tpu.memory_space<vmem>>, %arg2: memref<3x816x240xbf16, #tpu.memory_space<vmem>>, %arg3: memref<1x240xf32, #tpu.memory_space<vmem>>, %arg4: memref<7x13xf32, #tpu.memory_space<vmem>>, %arg5: memref<208x112xf32, #tpu.memory_space<vmem>>, %arg6: memref<5x112x168xbf16, #tpu.memory_space<vmem>>, %arg7: memref<1x168xf32, #tpu.memory_space<vmem>>, %arg8: memref<3x5xf32, #tpu.memory_space<vmem>>, %arg9: memref<120x72xf32, #tpu.memory_space<vmem>>, %arg10: memref<3x72x144xbf16, #tpu.memory_space<vmem>>, %arg11: memref<1x144xf32, #tpu.memory_space<vmem>>, %arg12: memref<3x144x96xbf16, #tpu.memory_space<vmem>>, %arg13: memref<1x96xf32, #tpu.memory_space<vmem>>, %arg14: memref<3x96x96xbf16, #tpu.memory_space<vmem>>, %arg15: memref<1x96xf32, #tpu.memory_space<vmem>>, %arg16: memref<32x64xbf16, #tpu.memory_space<vmem>>, %arg17: memref<1x64xf32, #tpu.memory_space<vmem>>, %arg18: memref<64x64xbf16, #tpu.memory_space<vmem>>, %arg19: memref<1x64xf32, #tpu.memory_space<vmem>>, %arg20: memref<1x1x64xf32, #tpu.memory_space<vmem>>) attributes {dimension_semantics = [#tpu.dimension_semantics<parallel>], iteration_bounds = array<i64: 2>, scalar_prefetch = 0 : i64, scratch_operands = 0 : i64, tpu.core_type = #tpu.core_type<tc>, window_params = [{transform_indices = @transform_0, window_bounds = array<i64: 1, 17, 816>}, {pipeline_mode = #tpu.pipeline_mode<synchronous>, transform_indices = @transform_1, window_bounds = array<i64: 3, 816, 240>}, {pipeline_mode = #tpu.pipeline_mode<synchronous>, transform_indices = @transform_2, window_bounds = array<i64: 1, 240>}, {pipeline_mode = #tpu.pipeline_mode<synchronous>, transform_indices = @transform_3, window_bounds = array<i64: 7, 13>}, {pipeline_mode = #tpu.pipeline_mode<synchronous>, transform_indices = @transform_4, window_bounds = array<i64: 208, 112>}, {pipeline_mode = #tpu.pipeline_mode<synchronous>, transform_indices = @transform_5, window_bounds = array<i64: 5, 112, 168>}, {pipeline_mode = #tpu.pipeline_mode<synchronous>, transform_indices = @transform_6, window_bounds = array<i64: 1, 168>}, {pipeline_mode = #tpu.pipeline_mode<synchronous>, transform_indices = @transform_7, window_bounds = array<i64: 3, 5>}, {pipeline_mode = #tpu.pipeline_mode<synchronous>, transform_indices = @transform_8, window_bounds = array<i64: 120, 72>}, {pipeline_mode = #tpu.pipeline_mode<synchronous>, transform_indices = @transform_9, window_bounds = array<i64: 3, 72, 144>}, {pipeline_mode = #tpu.pipeline_mode<synchronous>, transform_indices = @transform_10, window_bounds = array<i64: 1, 144>}, {pipeline_mode = #tpu.pipeline_mode<synchronous>, transform_indices = @transform_11, window_bounds = array<i64: 3, 144, 96>}, {pipeline_mode = #tpu.pipeline_mode<synchronous>, transform_indices = @transform_12, window_bounds = array<i64: 1, 96>}, {pipeline_mode = #tpu.pipeline_mode<synchronous>, transform_indices = @transform_13, window_bounds = array<i64: 3, 96, 96>}, {pipeline_mode = #tpu.pipeline_mode<synchronous>, transform_indices = @transform_14, window_bounds = array<i64: 1, 96>}, {pipeline_mode = #tpu.pipeline_mode<synchronous>, transform_indices = @transform_15, window_bounds = array<i64: 32, 64>}, {pipeline_mode = #tpu.pipeline_mode<synchronous>, transform_indices = @transform_16, window_bounds = array<i64: 1, 64>}, {pipeline_mode = #tpu.pipeline_mode<synchronous>, transform_indices = @transform_17, window_bounds = array<i64: 64, 64>}, {pipeline_mode = #tpu.pipeline_mode<synchronous>, transform_indices = @transform_18, window_bounds = array<i64: 1, 64>}, {transform_indices = @transform_19, window_bounds = array<i64: 1, 1, 64>}]} {
    %c0 = arith.constant 0 : index
    %c0_0 = arith.constant 0 : index
    %c0_1 = arith.constant 0 : index
    %0 = vector.load %arg1[%c0, %c0_0, %c0_1] : memref<1x17x816xf32, #tpu.memory_space<vmem>>, vector<1x17x816xf32>
    %1 = vector.shape_cast %0 : vector<1x17x816xf32> to vector<17x816xf32>
    %2 = vector.extract_strided_slice %1 {offsets = [0, 0], sizes = [15, 816], strides = [1, 1]} : vector<17x816xf32> to vector<15x816xf32>
    %3 = arith.truncf %2 : vector<15x816xf32> to vector<15x816xbf16>
    %c0_2 = arith.constant 0 : index
    %c0_3 = arith.constant 0 : index
    %c0_4 = arith.constant 0 : index
    %4 = vector.load %arg2[%c0_2, %c0_3, %c0_4] : memref<3x816x240xbf16, #tpu.memory_space<vmem>>, vector<1x816x240xbf16>
    %5 = vector.shape_cast %4 : vector<1x816x240xbf16> to vector<816x240xbf16>
    %cst = arith.constant dense<0.000000e+00> : vector<15x240xf32>
    %6 = tpu.matmul %3, %5, %cst {dimension_numbers = #tpu.dot_dimension_numbers<[1], [0], [0], [1], [0, 0, 1, 1], [], []>} : vector<15x816xbf16>, vector<816x240xbf16>, vector<15x240xf32> -> vector<15x240xf32>
    %7 = vector.extract_strided_slice %1 {offsets = [1, 0], sizes = [15, 816], strides = [1, 1]} : vector<17x816xf32> to vector<15x816xf32>
    %8 = arith.truncf %7 : vector<15x816xf32> to vector<15x816xbf16>
    %c1 = arith.constant 1 : index
    %c0_5 = arith.constant 0 : index
    %c0_6 = arith.constant 0 : index
    %9 = vector.load %arg2[%c1, %c0_5, %c0_6] : memref<3x816x240xbf16, #tpu.memory_space<vmem>>, vector<1x816x240xbf16>
    %10 = vector.shape_cast %9 : vector<1x816x240xbf16> to vector<816x240xbf16>
    %cst_7 = arith.constant dense<0.000000e+00> : vector<15x240xf32>
    %11 = tpu.matmul %8, %10, %cst_7 {dimension_numbers = #tpu.dot_dimension_numbers<[1], [0], [0], [1], [0, 0, 1, 1], [], []>} : vector<15x816xbf16>, vector<816x240xbf16>, vector<15x240xf32> -> vector<15x240xf32>
    %12 = arith.addf %6, %11 : vector<15x240xf32>
    %13 = vector.extract_strided_slice %1 {offsets = [2, 0], sizes = [15, 816], strides = [1, 1]} : vector<17x816xf32> to vector<15x816xf32>
    %14 = arith.truncf %13 : vector<15x816xf32> to vector<15x816xbf16>
    %c2 = arith.constant 2 : index
    %c0_8 = arith.constant 0 : index
    %c0_9 = arith.constant 0 : index
    %15 = vector.load %arg2[%c2, %c0_8, %c0_9] : memref<3x816x240xbf16, #tpu.memory_space<vmem>>, vector<1x816x240xbf16>
    %16 = vector.shape_cast %15 : vector<1x816x240xbf16> to vector<816x240xbf16>
    %cst_10 = arith.constant dense<0.000000e+00> : vector<15x240xf32>
    %17 = tpu.matmul %14, %16, %cst_10 {dimension_numbers = #tpu.dot_dimension_numbers<[1], [0], [0], [1], [0, 0, 1, 1], [], []>} : vector<15x816xbf16>, vector<816x240xbf16>, vector<15x240xf32> -> vector<15x240xf32>
    %18 = arith.addf %12, %17 : vector<15x240xf32>
    %c0_11 = arith.constant 0 : index
    %c0_12 = arith.constant 0 : index
    %19 = vector.load %arg3[%c0_11, %c0_12] : memref<1x240xf32, #tpu.memory_space<vmem>>, vector<1x240xf32>
    %20 = vector.broadcast %19 : vector<1x240xf32> to vector<15x240xf32>
    %21 = arith.addf %18, %20 : vector<15x240xf32>
    %cst_13 = arith.constant 0.000000e+00 : f32
    %22 = vector.broadcast %cst_13 : f32 to vector<15x240xf32>
    %23 = arith.maximumf %21, %22 : vector<15x240xf32>
    %24 = vector.extract_strided_slice %23 {offsets = [0, 0], sizes = [13, 240], strides = [1, 1]} : vector<15x240xf32> to vector<13x240xf32>
    %25 = vector.extract_strided_slice %23 {offsets = [1, 0], sizes = [13, 240], strides = [1, 1]} : vector<15x240xf32> to vector<13x240xf32>
    %26 = arith.maximumf %24, %25 : vector<13x240xf32>
    %27 = vector.extract_strided_slice %23 {offsets = [2, 0], sizes = [13, 240], strides = [1, 1]} : vector<15x240xf32> to vector<13x240xf32>
    %28 = arith.maximumf %26, %27 : vector<13x240xf32>
    %29 = vector.extract_strided_slice %28 {offsets = [0, 0], sizes = [13, 208], strides = [1, 1]} : vector<13x240xf32> to vector<13x208xf32>
    %30 = vector.extract_strided_slice %28 {offsets = [0, 16], sizes = [13, 208], strides = [1, 1]} : vector<13x240xf32> to vector<13x208xf32>
    %31 = arith.maximumf %29, %30 : vector<13x208xf32>
    %32 = vector.extract_strided_slice %28 {offsets = [0, 32], sizes = [13, 208], strides = [1, 1]} : vector<13x240xf32> to vector<13x208xf32>
    %33 = arith.maximumf %31, %32 : vector<13x208xf32>
    %c0_14 = arith.constant 0 : index
    %c0_15 = arith.constant 0 : index
    %34 = vector.load %arg4[%c0_14, %c0_15] : memref<7x13xf32, #tpu.memory_space<vmem>>, vector<7x13xf32>
    %cst_16 = arith.constant dense<0.000000e+00> : vector<7x208xf32>
    %35 = tpu.matmul %34, %33, %cst_16 {dimension_numbers = #tpu.dot_dimension_numbers<[1], [0], [0], [1], [0, 0, 1, 1], [], []>} : vector<7x13xf32>, vector<13x208xf32>, vector<7x208xf32> -> vector<7x208xf32>
    %c0_17 = arith.constant 0 : index
    %c0_18 = arith.constant 0 : index
    %36 = vector.load %arg5[%c0_17, %c0_18] : memref<208x112xf32, #tpu.memory_space<vmem>>, vector<208x112xf32>
    %cst_19 = arith.constant dense<0.000000e+00> : vector<7x112xf32>
    %37 = tpu.matmul %35, %36, %cst_19 {dimension_numbers = #tpu.dot_dimension_numbers<[1], [0], [0], [1], [0, 0, 1, 1], [], []>} : vector<7x208xf32>, vector<208x112xf32>, vector<7x112xf32> -> vector<7x112xf32>
    %cst_20 = arith.constant 0.000000e+00 : f32
    %38 = vector.broadcast %cst_20 : f32 to vector<2x112xf32>
    %39 = tpu.concatenate %38, %37, %38 in 0 : vector<2x112xf32>, vector<7x112xf32>, vector<2x112xf32> -> vector<11x112xf32>
    %40 = vector.extract_strided_slice %39 {offsets = [0, 0], sizes = [7, 112], strides = [1, 1]} : vector<11x112xf32> to vector<7x112xf32>
    %41 = arith.truncf %40 : vector<7x112xf32> to vector<7x112xbf16>
    %c0_21 = arith.constant 0 : index
    %c0_22 = arith.constant 0 : index
    %c0_23 = arith.constant 0 : index
    %42 = vector.load %arg6[%c0_21, %c0_22, %c0_23] : memref<5x112x168xbf16, #tpu.memory_space<vmem>>, vector<1x112x168xbf16>
    %43 = vector.shape_cast %42 : vector<1x112x168xbf16> to vector<112x168xbf16>
    %cst_24 = arith.constant dense<0.000000e+00> : vector<7x168xf32>
    %44 = tpu.matmul %41, %43, %cst_24 {dimension_numbers = #tpu.dot_dimension_numbers<[1], [0], [0], [1], [0, 0, 1, 1], [], []>} : vector<7x112xbf16>, vector<112x168xbf16>, vector<7x168xf32> -> vector<7x168xf32>
    %45 = vector.extract_strided_slice %39 {offsets = [1, 0], sizes = [7, 112], strides = [1, 1]} : vector<11x112xf32> to vector<7x112xf32>
    %46 = arith.truncf %45 : vector<7x112xf32> to vector<7x112xbf16>
    %c1_25 = arith.constant 1 : index
    %c0_26 = arith.constant 0 : index
    %c0_27 = arith.constant 0 : index
    %47 = vector.load %arg6[%c1_25, %c0_26, %c0_27] : memref<5x112x168xbf16, #tpu.memory_space<vmem>>, vector<1x112x168xbf16>
    %48 = vector.shape_cast %47 : vector<1x112x168xbf16> to vector<112x168xbf16>
    %cst_28 = arith.constant dense<0.000000e+00> : vector<7x168xf32>
    %49 = tpu.matmul %46, %48, %cst_28 {dimension_numbers = #tpu.dot_dimension_numbers<[1], [0], [0], [1], [0, 0, 1, 1], [], []>} : vector<7x112xbf16>, vector<112x168xbf16>, vector<7x168xf32> -> vector<7x168xf32>
    %50 = arith.addf %44, %49 : vector<7x168xf32>
    %51 = vector.extract_strided_slice %39 {offsets = [2, 0], sizes = [7, 112], strides = [1, 1]} : vector<11x112xf32> to vector<7x112xf32>
    %52 = arith.truncf %51 : vector<7x112xf32> to vector<7x112xbf16>
    %c2_29 = arith.constant 2 : index
    %c0_30 = arith.constant 0 : index
    %c0_31 = arith.constant 0 : index
    %53 = vector.load %arg6[%c2_29, %c0_30, %c0_31] : memref<5x112x168xbf16, #tpu.memory_space<vmem>>, vector<1x112x168xbf16>
    %54 = vector.shape_cast %53 : vector<1x112x168xbf16> to vector<112x168xbf16>
    %cst_32 = arith.constant dense<0.000000e+00> : vector<7x168xf32>
    %55 = tpu.matmul %52, %54, %cst_32 {dimension_numbers = #tpu.dot_dimension_numbers<[1], [0], [0], [1], [0, 0, 1, 1], [], []>} : vector<7x112xbf16>, vector<112x168xbf16>, vector<7x168xf32> -> vector<7x168xf32>
    %56 = arith.addf %50, %55 : vector<7x168xf32>
    %57 = vector.extract_strided_slice %39 {offsets = [3, 0], sizes = [7, 112], strides = [1, 1]} : vector<11x112xf32> to vector<7x112xf32>
    %58 = arith.truncf %57 : vector<7x112xf32> to vector<7x112xbf16>
    %c3 = arith.constant 3 : index
    %c0_33 = arith.constant 0 : index
    %c0_34 = arith.constant 0 : index
    %59 = vector.load %arg6[%c3, %c0_33, %c0_34] : memref<5x112x168xbf16, #tpu.memory_space<vmem>>, vector<1x112x168xbf16>
    %60 = vector.shape_cast %59 : vector<1x112x168xbf16> to vector<112x168xbf16>
    %cst_35 = arith.constant dense<0.000000e+00> : vector<7x168xf32>
    %61 = tpu.matmul %58, %60, %cst_35 {dimension_numbers = #tpu.dot_dimension_numbers<[1], [0], [0], [1], [0, 0, 1, 1], [], []>} : vector<7x112xbf16>, vector<112x168xbf16>, vector<7x168xf32> -> vector<7x168xf32>
    %62 = arith.addf %56, %61 : vector<7x168xf32>
    %63 = vector.extract_strided_slice %39 {offsets = [4, 0], sizes = [7, 112], strides = [1, 1]} : vector<11x112xf32> to vector<7x112xf32>
    %64 = arith.truncf %63 : vector<7x112xf32> to vector<7x112xbf16>
    %c4 = arith.constant 4 : index
    %c0_36 = arith.constant 0 : index
    %c0_37 = arith.constant 0 : index
    %65 = vector.load %arg6[%c4, %c0_36, %c0_37] : memref<5x112x168xbf16, #tpu.memory_space<vmem>>, vector<1x112x168xbf16>
    %66 = vector.shape_cast %65 : vector<1x112x168xbf16> to vector<112x168xbf16>
    %cst_38 = arith.constant dense<0.000000e+00> : vector<7x168xf32>
    %67 = tpu.matmul %64, %66, %cst_38 {dimension_numbers = #tpu.dot_dimension_numbers<[1], [0], [0], [1], [0, 0, 1, 1], [], []>} : vector<7x112xbf16>, vector<112x168xbf16>, vector<7x168xf32> -> vector<7x168xf32>
    %68 = arith.addf %62, %67 : vector<7x168xf32>
    %c0_39 = arith.constant 0 : index
    %c0_40 = arith.constant 0 : index
    %69 = vector.load %arg7[%c0_39, %c0_40] : memref<1x168xf32, #tpu.memory_space<vmem>>, vector<1x168xf32>
    %70 = vector.broadcast %69 : vector<1x168xf32> to vector<7x168xf32>
    %71 = arith.addf %68, %70 : vector<7x168xf32>
    %cst_41 = arith.constant 0.000000e+00 : f32
    %72 = vector.broadcast %cst_41 : f32 to vector<7x168xf32>
    %73 = arith.maximumf %71, %72 : vector<7x168xf32>
    %74 = vector.extract_strided_slice %73 {offsets = [0, 0], sizes = [5, 168], strides = [1, 1]} : vector<7x168xf32> to vector<5x168xf32>
    %75 = vector.extract_strided_slice %73 {offsets = [1, 0], sizes = [5, 168], strides = [1, 1]} : vector<7x168xf32> to vector<5x168xf32>
    %76 = arith.maximumf %74, %75 : vector<5x168xf32>
    %77 = vector.extract_strided_slice %73 {offsets = [2, 0], sizes = [5, 168], strides = [1, 1]} : vector<7x168xf32> to vector<5x168xf32>
    %78 = arith.maximumf %76, %77 : vector<5x168xf32>
    %79 = vector.extract_strided_slice %78 {offsets = [0, 0], sizes = [5, 120], strides = [1, 1]} : vector<5x168xf32> to vector<5x120xf32>
    %80 = vector.extract_strided_slice %78 {offsets = [0, 24], sizes = [5, 120], strides = [1, 1]} : vector<5x168xf32> to vector<5x120xf32>
    %81 = arith.maximumf %79, %80 : vector<5x120xf32>
    %82 = vector.extract_strided_slice %78 {offsets = [0, 48], sizes = [5, 120], strides = [1, 1]} : vector<5x168xf32> to vector<5x120xf32>
    %83 = arith.maximumf %81, %82 : vector<5x120xf32>
    %c0_42 = arith.constant 0 : index
    %c0_43 = arith.constant 0 : index
    %84 = vector.load %arg8[%c0_42, %c0_43] : memref<3x5xf32, #tpu.memory_space<vmem>>, vector<3x5xf32>
    %cst_44 = arith.constant dense<0.000000e+00> : vector<3x120xf32>
    %85 = tpu.matmul %84, %83, %cst_44 {dimension_numbers = #tpu.dot_dimension_numbers<[1], [0], [0], [1], [0, 0, 1, 1], [], []>} : vector<3x5xf32>, vector<5x120xf32>, vector<3x120xf32> -> vector<3x120xf32>
    %c0_45 = arith.constant 0 : index
    %c0_46 = arith.constant 0 : index
    %86 = vector.load %arg9[%c0_45, %c0_46] : memref<120x72xf32, #tpu.memory_space<vmem>>, vector<120x72xf32>
    %cst_47 = arith.constant dense<0.000000e+00> : vector<3x72xf32>
    %87 = tpu.matmul %85, %86, %cst_47 {dimension_numbers = #tpu.dot_dimension_numbers<[1], [0], [0], [1], [0, 0, 1, 1], [], []>} : vector<3x120xf32>, vector<120x72xf32>, vector<3x72xf32> -> vector<3x72xf32>
    %cst_48 = arith.constant 0.000000e+00 : f32
    %88 = vector.broadcast %cst_48 : f32 to vector<1x72xf32>
    %89 = tpu.concatenate %88, %87, %88 in 0 : vector<1x72xf32>, vector<3x72xf32>, vector<1x72xf32> -> vector<5x72xf32>
    %90 = vector.extract_strided_slice %89 {offsets = [0, 0], sizes = [3, 72], strides = [1, 1]} : vector<5x72xf32> to vector<3x72xf32>
    %91 = arith.truncf %90 : vector<3x72xf32> to vector<3x72xbf16>
    %c0_49 = arith.constant 0 : index
    %c0_50 = arith.constant 0 : index
    %c0_51 = arith.constant 0 : index
    %92 = vector.load %arg10[%c0_49, %c0_50, %c0_51] : memref<3x72x144xbf16, #tpu.memory_space<vmem>>, vector<1x72x144xbf16>
    %93 = vector.shape_cast %92 : vector<1x72x144xbf16> to vector<72x144xbf16>
    %cst_52 = arith.constant dense<0.000000e+00> : vector<3x144xf32>
    %94 = tpu.matmul %91, %93, %cst_52 {dimension_numbers = #tpu.dot_dimension_numbers<[1], [0], [0], [1], [0, 0, 1, 1], [], []>} : vector<3x72xbf16>, vector<72x144xbf16>, vector<3x144xf32> -> vector<3x144xf32>
    %95 = vector.extract_strided_slice %89 {offsets = [1, 0], sizes = [3, 72], strides = [1, 1]} : vector<5x72xf32> to vector<3x72xf32>
    %96 = arith.truncf %95 : vector<3x72xf32> to vector<3x72xbf16>
    %c1_53 = arith.constant 1 : index
    %c0_54 = arith.constant 0 : index
    %c0_55 = arith.constant 0 : index
    %97 = vector.load %arg10[%c1_53, %c0_54, %c0_55] : memref<3x72x144xbf16, #tpu.memory_space<vmem>>, vector<1x72x144xbf16>
    %98 = vector.shape_cast %97 : vector<1x72x144xbf16> to vector<72x144xbf16>
    %cst_56 = arith.constant dense<0.000000e+00> : vector<3x144xf32>
    %99 = tpu.matmul %96, %98, %cst_56 {dimension_numbers = #tpu.dot_dimension_numbers<[1], [0], [0], [1], [0, 0, 1, 1], [], []>} : vector<3x72xbf16>, vector<72x144xbf16>, vector<3x144xf32> -> vector<3x144xf32>
    %100 = arith.addf %94, %99 : vector<3x144xf32>
    %101 = vector.extract_strided_slice %89 {offsets = [2, 0], sizes = [3, 72], strides = [1, 1]} : vector<5x72xf32> to vector<3x72xf32>
    %102 = arith.truncf %101 : vector<3x72xf32> to vector<3x72xbf16>
    %c2_57 = arith.constant 2 : index
    %c0_58 = arith.constant 0 : index
    %c0_59 = arith.constant 0 : index
    %103 = vector.load %arg10[%c2_57, %c0_58, %c0_59] : memref<3x72x144xbf16, #tpu.memory_space<vmem>>, vector<1x72x144xbf16>
    %104 = vector.shape_cast %103 : vector<1x72x144xbf16> to vector<72x144xbf16>
    %cst_60 = arith.constant dense<0.000000e+00> : vector<3x144xf32>
    %105 = tpu.matmul %102, %104, %cst_60 {dimension_numbers = #tpu.dot_dimension_numbers<[1], [0], [0], [1], [0, 0, 1, 1], [], []>} : vector<3x72xbf16>, vector<72x144xbf16>, vector<3x144xf32> -> vector<3x144xf32>
    %106 = arith.addf %100, %105 : vector<3x144xf32>
    %c0_61 = arith.constant 0 : index
    %c0_62 = arith.constant 0 : index
    %107 = vector.load %arg11[%c0_61, %c0_62] : memref<1x144xf32, #tpu.memory_space<vmem>>, vector<1x144xf32>
    %108 = vector.broadcast %107 : vector<1x144xf32> to vector<3x144xf32>
    %109 = arith.addf %106, %108 : vector<3x144xf32>
    %cst_63 = arith.constant 0.000000e+00 : f32
    %110 = vector.broadcast %cst_63 : f32 to vector<3x144xf32>
    %111 = arith.maximumf %109, %110 : vector<3x144xf32>
    %cst_64 = arith.constant 0.000000e+00 : f32
    %112 = vector.broadcast %cst_64 : f32 to vector<1x144xf32>
    %113 = tpu.concatenate %112, %111, %112 in 0 : vector<1x144xf32>, vector<3x144xf32>, vector<1x144xf32> -> vector<5x144xf32>
    %114 = vector.extract_strided_slice %113 {offsets = [0, 0], sizes = [3, 144], strides = [1, 1]} : vector<5x144xf32> to vector<3x144xf32>
    %115 = arith.truncf %114 : vector<3x144xf32> to vector<3x144xbf16>
    %c0_65 = arith.constant 0 : index
    %c0_66 = arith.constant 0 : index
    %c0_67 = arith.constant 0 : index
    %116 = vector.load %arg12[%c0_65, %c0_66, %c0_67] : memref<3x144x96xbf16, #tpu.memory_space<vmem>>, vector<1x144x96xbf16>
    %117 = vector.shape_cast %116 : vector<1x144x96xbf16> to vector<144x96xbf16>
    %cst_68 = arith.constant dense<0.000000e+00> : vector<3x96xf32>
    %118 = tpu.matmul %115, %117, %cst_68 {dimension_numbers = #tpu.dot_dimension_numbers<[1], [0], [0], [1], [0, 0, 1, 1], [], []>} : vector<3x144xbf16>, vector<144x96xbf16>, vector<3x96xf32> -> vector<3x96xf32>
    %119 = vector.extract_strided_slice %113 {offsets = [1, 0], sizes = [3, 144], strides = [1, 1]} : vector<5x144xf32> to vector<3x144xf32>
    %120 = arith.truncf %119 : vector<3x144xf32> to vector<3x144xbf16>
    %c1_69 = arith.constant 1 : index
    %c0_70 = arith.constant 0 : index
    %c0_71 = arith.constant 0 : index
    %121 = vector.load %arg12[%c1_69, %c0_70, %c0_71] : memref<3x144x96xbf16, #tpu.memory_space<vmem>>, vector<1x144x96xbf16>
    %122 = vector.shape_cast %121 : vector<1x144x96xbf16> to vector<144x96xbf16>
    %cst_72 = arith.constant dense<0.000000e+00> : vector<3x96xf32>
    %123 = tpu.matmul %120, %122, %cst_72 {dimension_numbers = #tpu.dot_dimension_numbers<[1], [0], [0], [1], [0, 0, 1, 1], [], []>} : vector<3x144xbf16>, vector<144x96xbf16>, vector<3x96xf32> -> vector<3x96xf32>
    %124 = arith.addf %118, %123 : vector<3x96xf32>
    %125 = vector.extract_strided_slice %113 {offsets = [2, 0], sizes = [3, 144], strides = [1, 1]} : vector<5x144xf32> to vector<3x144xf32>
    %126 = arith.truncf %125 : vector<3x144xf32> to vector<3x144xbf16>
    %c2_73 = arith.constant 2 : index
    %c0_74 = arith.constant 0 : index
    %c0_75 = arith.constant 0 : index
    %127 = vector.load %arg12[%c2_73, %c0_74, %c0_75] : memref<3x144x96xbf16, #tpu.memory_space<vmem>>, vector<1x144x96xbf16>
    %128 = vector.shape_cast %127 : vector<1x144x96xbf16> to vector<144x96xbf16>
    %cst_76 = arith.constant dense<0.000000e+00> : vector<3x96xf32>
    %129 = tpu.matmul %126, %128, %cst_76 {dimension_numbers = #tpu.dot_dimension_numbers<[1], [0], [0], [1], [0, 0, 1, 1], [], []>} : vector<3x144xbf16>, vector<144x96xbf16>, vector<3x96xf32> -> vector<3x96xf32>
    %130 = arith.addf %124, %129 : vector<3x96xf32>
    %c0_77 = arith.constant 0 : index
    %c0_78 = arith.constant 0 : index
    %131 = vector.load %arg13[%c0_77, %c0_78] : memref<1x96xf32, #tpu.memory_space<vmem>>, vector<1x96xf32>
    %132 = vector.broadcast %131 : vector<1x96xf32> to vector<3x96xf32>
    %133 = arith.addf %130, %132 : vector<3x96xf32>
    %cst_79 = arith.constant 0.000000e+00 : f32
    %134 = vector.broadcast %cst_79 : f32 to vector<3x96xf32>
    %135 = arith.maximumf %133, %134 : vector<3x96xf32>
    %cst_80 = arith.constant 0.000000e+00 : f32
    %136 = vector.broadcast %cst_80 : f32 to vector<1x96xf32>
    %137 = tpu.concatenate %136, %135, %136 in 0 : vector<1x96xf32>, vector<3x96xf32>, vector<1x96xf32> -> vector<5x96xf32>
    %138 = vector.extract_strided_slice %137 {offsets = [0, 0], sizes = [3, 96], strides = [1, 1]} : vector<5x96xf32> to vector<3x96xf32>
    %139 = arith.truncf %138 : vector<3x96xf32> to vector<3x96xbf16>
    %c0_81 = arith.constant 0 : index
    %c0_82 = arith.constant 0 : index
    %c0_83 = arith.constant 0 : index
    %140 = vector.load %arg14[%c0_81, %c0_82, %c0_83] : memref<3x96x96xbf16, #tpu.memory_space<vmem>>, vector<1x96x96xbf16>
    %141 = vector.shape_cast %140 : vector<1x96x96xbf16> to vector<96x96xbf16>
    %cst_84 = arith.constant dense<0.000000e+00> : vector<3x96xf32>
    %142 = tpu.matmul %139, %141, %cst_84 {dimension_numbers = #tpu.dot_dimension_numbers<[1], [0], [0], [1], [0, 0, 1, 1], [], []>} : vector<3x96xbf16>, vector<96x96xbf16>, vector<3x96xf32> -> vector<3x96xf32>
    %143 = vector.extract_strided_slice %137 {offsets = [1, 0], sizes = [3, 96], strides = [1, 1]} : vector<5x96xf32> to vector<3x96xf32>
    %144 = arith.truncf %143 : vector<3x96xf32> to vector<3x96xbf16>
    %c1_85 = arith.constant 1 : index
    %c0_86 = arith.constant 0 : index
    %c0_87 = arith.constant 0 : index
    %145 = vector.load %arg14[%c1_85, %c0_86, %c0_87] : memref<3x96x96xbf16, #tpu.memory_space<vmem>>, vector<1x96x96xbf16>
    %146 = vector.shape_cast %145 : vector<1x96x96xbf16> to vector<96x96xbf16>
    %cst_88 = arith.constant dense<0.000000e+00> : vector<3x96xf32>
    %147 = tpu.matmul %144, %146, %cst_88 {dimension_numbers = #tpu.dot_dimension_numbers<[1], [0], [0], [1], [0, 0, 1, 1], [], []>} : vector<3x96xbf16>, vector<96x96xbf16>, vector<3x96xf32> -> vector<3x96xf32>
    %148 = arith.addf %142, %147 : vector<3x96xf32>
    %149 = vector.extract_strided_slice %137 {offsets = [2, 0], sizes = [3, 96], strides = [1, 1]} : vector<5x96xf32> to vector<3x96xf32>
    %150 = arith.truncf %149 : vector<3x96xf32> to vector<3x96xbf16>
    %c2_89 = arith.constant 2 : index
    %c0_90 = arith.constant 0 : index
    %c0_91 = arith.constant 0 : index
    %151 = vector.load %arg14[%c2_89, %c0_90, %c0_91] : memref<3x96x96xbf16, #tpu.memory_space<vmem>>, vector<1x96x96xbf16>
    %152 = vector.shape_cast %151 : vector<1x96x96xbf16> to vector<96x96xbf16>
    %cst_92 = arith.constant dense<0.000000e+00> : vector<3x96xf32>
    %153 = tpu.matmul %150, %152, %cst_92 {dimension_numbers = #tpu.dot_dimension_numbers<[1], [0], [0], [1], [0, 0, 1, 1], [], []>} : vector<3x96xbf16>, vector<96x96xbf16>, vector<3x96xf32> -> vector<3x96xf32>
    %154 = arith.addf %148, %153 : vector<3x96xf32>
    %c0_93 = arith.constant 0 : index
    %c0_94 = arith.constant 0 : index
    %155 = vector.load %arg15[%c0_93, %c0_94] : memref<1x96xf32, #tpu.memory_space<vmem>>, vector<1x96xf32>
    %156 = vector.broadcast %155 : vector<1x96xf32> to vector<3x96xf32>
    %157 = arith.addf %154, %156 : vector<3x96xf32>
    %cst_95 = arith.constant 0.000000e+00 : f32
    %158 = vector.broadcast %cst_95 : f32 to vector<3x96xf32>
    %159 = arith.maximumf %157, %158 : vector<3x96xf32>
    %cst_96 = arith.constant dense<0xFF800000> : vector<96xf32>
    %160 = vector.multi_reduction <maximumf>, %159, %cst_96 [0] : vector<3x96xf32> to vector<96xf32>
    %161 = vector.shape_cast %160 : vector<96xf32> to vector<1x96xf32>
    %162 = vector.extract_strided_slice %161 {offsets = [0, 0], sizes = [1, 32], strides = [1, 1]} : vector<1x96xf32> to vector<1x32xf32>
    %163 = vector.extract_strided_slice %161 {offsets = [0, 32], sizes = [1, 32], strides = [1, 1]} : vector<1x96xf32> to vector<1x32xf32>
    %164 = arith.maximumf %162, %163 : vector<1x32xf32>
    %165 = vector.extract_strided_slice %161 {offsets = [0, 64], sizes = [1, 32], strides = [1, 1]} : vector<1x96xf32> to vector<1x32xf32>
    %166 = arith.maximumf %164, %165 : vector<1x32xf32>
    %167 = arith.truncf %166 : vector<1x32xf32> to vector<1x32xbf16>
    %c0_97 = arith.constant 0 : index
    %c0_98 = arith.constant 0 : index
    %168 = vector.load %arg16[%c0_97, %c0_98] : memref<32x64xbf16, #tpu.memory_space<vmem>>, vector<32x64xbf16>
    %cst_99 = arith.constant dense<0.000000e+00> : vector<1x64xf32>
    %169 = tpu.matmul %167, %168, %cst_99 {dimension_numbers = #tpu.dot_dimension_numbers<[1], [0], [0], [1], [0, 0, 1, 1], [], []>} : vector<1x32xbf16>, vector<32x64xbf16>, vector<1x64xf32> -> vector<1x64xf32>
    %c0_100 = arith.constant 0 : index
    %c0_101 = arith.constant 0 : index
    %170 = vector.load %arg17[%c0_100, %c0_101] : memref<1x64xf32, #tpu.memory_space<vmem>>, vector<1x64xf32>
    %171 = arith.addf %169, %170 : vector<1x64xf32>
    %cst_102 = arith.constant 0.000000e+00 : f32
    %172 = vector.broadcast %cst_102 : f32 to vector<1x64xf32>
    %173 = arith.maximumf %171, %172 : vector<1x64xf32>
    %174 = arith.truncf %173 : vector<1x64xf32> to vector<1x64xbf16>
    %c0_103 = arith.constant 0 : index
    %c0_104 = arith.constant 0 : index
    %175 = vector.load %arg18[%c0_103, %c0_104] : memref<64x64xbf16, #tpu.memory_space<vmem>>, vector<64x64xbf16>
    %cst_105 = arith.constant dense<0.000000e+00> : vector<1x64xf32>
    %176 = tpu.matmul %174, %175, %cst_105 {dimension_numbers = #tpu.dot_dimension_numbers<[1], [0], [0], [1], [0, 0, 1, 1], [], []>} : vector<1x64xbf16>, vector<64x64xbf16>, vector<1x64xf32> -> vector<1x64xf32>
    %c0_106 = arith.constant 0 : index
    %c0_107 = arith.constant 0 : index
    %177 = vector.load %arg19[%c0_106, %c0_107] : memref<1x64xf32, #tpu.memory_space<vmem>>, vector<1x64xf32>
    %178 = arith.addf %176, %177 : vector<1x64xf32>
    %cst_108 = arith.constant 0.000000e+00 : f32
    %179 = vector.broadcast %cst_108 : f32 to vector<1x64xf32>
    %180 = arith.maximumf %178, %179 : vector<1x64xf32>
    %c0_109 = arith.constant 0 : index
    %c0_110 = arith.constant 0 : index
    %c0_111 = arith.constant 0 : index
    %181 = vector.load %arg20[%c0_109, %c0_110, %c0_111] : memref<1x1x64xf32, #tpu.memory_space<vmem>>, vector<1x1x64xf32>
    %182 = vector.shape_cast %181 : vector<1x1x64xf32> to vector<1x64xf32>
    %183 = vector.shape_cast %180 : vector<1x64xf32> to vector<1x1x64xf32>
    tpu.vector_store %arg20[%c0_109, %c0_110, %c0_111], %183 {strides = array<i32>} : memref<1x1x64xf32, #tpu.memory_space<vmem>>, vector<1x1x64xf32>,
    return
  }
  func.func @transform_0(%arg0: i32) -> (i32, i32, i32) {
    %c0_i32 = arith.constant 0 : i32
    %c0_i32_0 = arith.constant 0 : i32
    %c0_i32_1 = arith.constant 0 : i32
    return %arg0, %c0_i32, %c0_i32_0 : i32, i32, i32
  }
  func.func @transform_1(%arg0: i32) -> (i32, i32, i32) {
    %c0_i32 = arith.constant 0 : i32
    %c0_i32_0 = arith.constant 0 : i32
    %c0_i32_1 = arith.constant 0 : i32
    %c0_i32_2 = arith.constant 0 : i32
    return %c0_i32, %c0_i32_0, %c0_i32_1 : i32, i32, i32
  }
  func.func @transform_2(%arg0: i32) -> (i32, i32) {
    %c0_i32 = arith.constant 0 : i32
    %c0_i32_0 = arith.constant 0 : i32
    %c0_i32_1 = arith.constant 0 : i32
    return %c0_i32, %c0_i32_0 : i32, i32
  }
  func.func @transform_3(%arg0: i32) -> (i32, i32) {
    %c0_i32 = arith.constant 0 : i32
    %c0_i32_0 = arith.constant 0 : i32
    %c0_i32_1 = arith.constant 0 : i32
    return %c0_i32, %c0_i32_0 : i32, i32
  }
  func.func @transform_4(%arg0: i32) -> (i32, i32) {
    %c0_i32 = arith.constant 0 : i32
    %c0_i32_0 = arith.constant 0 : i32
    %c0_i32_1 = arith.constant 0 : i32
    return %c0_i32, %c0_i32_0 : i32, i32
  }
  func.func @transform_5(%arg0: i32) -> (i32, i32, i32) {
    %c0_i32 = arith.constant 0 : i32
    %c0_i32_0 = arith.constant 0 : i32
    %c0_i32_1 = arith.constant 0 : i32
    %c0_i32_2 = arith.constant 0 : i32
    return %c0_i32, %c0_i32_0, %c0_i32_1 : i32, i32, i32
  }
  func.func @transform_6(%arg0: i32) -> (i32, i32) {
    %c0_i32 = arith.constant 0 : i32
    %c0_i32_0 = arith.constant 0 : i32
    %c0_i32_1 = arith.constant 0 : i32
    return %c0_i32, %c0_i32_0 : i32, i32
  }
  func.func @transform_7(%arg0: i32) -> (i32, i32) {
    %c0_i32 = arith.constant 0 : i32
    %c0_i32_0 = arith.constant 0 : i32
    %c0_i32_1 = arith.constant 0 : i32
    return %c0_i32, %c0_i32_0 : i32, i32
  }
  func.func @transform_8(%arg0: i32) -> (i32, i32) {
    %c0_i32 = arith.constant 0 : i32
    %c0_i32_0 = arith.constant 0 : i32
    %c0_i32_1 = arith.constant 0 : i32
    return %c0_i32, %c0_i32_0 : i32, i32
  }
  func.func @transform_9(%arg0: i32) -> (i32, i32, i32) {
    %c0_i32 = arith.constant 0 : i32
    %c0_i32_0 = arith.constant 0 : i32
    %c0_i32_1 = arith.constant 0 : i32
    %c0_i32_2 = arith.constant 0 : i32
    return %c0_i32, %c0_i32_0, %c0_i32_1 : i32, i32, i32
  }
  func.func @transform_10(%arg0: i32) -> (i32, i32) {
    %c0_i32 = arith.constant 0 : i32
    %c0_i32_0 = arith.constant 0 : i32
    %c0_i32_1 = arith.constant 0 : i32
    return %c0_i32, %c0_i32_0 : i32, i32
  }
  func.func @transform_11(%arg0: i32) -> (i32, i32, i32) {
    %c0_i32 = arith.constant 0 : i32
    %c0_i32_0 = arith.constant 0 : i32
    %c0_i32_1 = arith.constant 0 : i32
    %c0_i32_2 = arith.constant 0 : i32
    return %c0_i32, %c0_i32_0, %c0_i32_1 : i32, i32, i32
  }
  func.func @transform_12(%arg0: i32) -> (i32, i32) {
    %c0_i32 = arith.constant 0 : i32
    %c0_i32_0 = arith.constant 0 : i32
    %c0_i32_1 = arith.constant 0 : i32
    return %c0_i32, %c0_i32_0 : i32, i32
  }
  func.func @transform_13(%arg0: i32) -> (i32, i32, i32) {
    %c0_i32 = arith.constant 0 : i32
    %c0_i32_0 = arith.constant 0 : i32
    %c0_i32_1 = arith.constant 0 : i32
    %c0_i32_2 = arith.constant 0 : i32
    return %c0_i32, %c0_i32_0, %c0_i32_1 : i32, i32, i32
  }
  func.func @transform_14(%arg0: i32) -> (i32, i32) {
    %c0_i32 = arith.constant 0 : i32
    %c0_i32_0 = arith.constant 0 : i32
    %c0_i32_1 = arith.constant 0 : i32
    return %c0_i32, %c0_i32_0 : i32, i32
  }
  func.func @transform_15(%arg0: i32) -> (i32, i32) {
    %c0_i32 = arith.constant 0 : i32
    %c0_i32_0 = arith.constant 0 : i32
    %c0_i32_1 = arith.constant 0 : i32
    return %c0_i32, %c0_i32_0 : i32, i32
  }
  func.func @transform_16(%arg0: i32) -> (i32, i32) {
    %c0_i32 = arith.constant 0 : i32
    %c0_i32_0 = arith.constant 0 : i32
    %c0_i32_1 = arith.constant 0 : i32
    return %c0_i32, %c0_i32_0 : i32, i32
  }
  func.func @transform_17(%arg0: i32) -> (i32, i32) {
    %c0_i32 = arith.constant 0 : i32
    %c0_i32_0 = arith.constant 0 : i32
    %c0_i32_1 = arith.constant 0 : i32
    return %c0_i32, %c0_i32_0 : i32, i32
  }
  func.func @transform_18(%arg0: i32) -> (i32, i32) {
    %c0_i32 = arith.constant 0 : i32
    %c0_i32_0 = arith.constant 0 : i32
    %c0_i32_1 = arith.constant 0 : i32
    return %c0_i32, %c0_i32_0 : i32, i32
  }
  func.func @transform_19(%arg0: i32) -> (i32, i32, i32) {
    %c0_i32 = arith.constant 0 : i32
    %c0_i32_0 = arith.constant 0 : i32
    %c0_i32_1 = arith.constant 0 : i32
    return %arg0, %c0_i32, %c0_i32_0 : i32, i32, i32
  }
}

</mosaic_0001>

<bundles_post_ra>
// kernel: net_forward.1
= control target key start
LH: loop header
LB: loop body
LE: loop exit
PB: predicated region body
PF: predicated region fallthrough
CT: control target
= control target key end

     0   :  { %s11077_s0 = inlined_call_operand.vmem [shape: f32[2,17,816], index: 0, kind: input, shape index: {}]   ;;  %s11078_s1 = inlined_call_operand.vmem [shape: bf16[3,816,240], index: 1, kind: input, shape index: {}]   ;;  %s11079_s2 = inlined_call_operand.vmem [shape: f32[1,240], index: 2, kind: input, shape index: {}]   ;;  %s11080_s3 = inlined_call_operand.vmem [shape: f32[7,13], index: 3, kind: input, shape index: {}]   ;;  %s11081_s4 = inlined_call_operand.vmem [shape: f32[208,112], index: 4, kind: input, shape index: {}]   ;;  %s11082_s5 = inlined_call_operand.vmem [shape: bf16[5,112,168], index: 5, kind: input, shape index: {}]   ;;  %s11083_s6 = inlined_call_operand.vmem [shape: f32[1,168], index: 6, kind: input, shape index: {}]   ;;  %s11084_s7 = inlined_call_operand.vmem [shape: f32[3,5], index: 7, kind: input, shape index: {}]   ;;  %s11085_s8 = inlined_call_operand.vmem [shape: f32[120,72], index: 8, kind: input, shape index: {}]   ;;  %s11086_s9 = inlined_call_operand.vmem [shape: bf16[3,72,144], index: 9, kind: input, shape index: {}]   ;;  %s11087_s10 = inlined_call_operand.vmem [shape: f32[1,144], index: 10, kind: input, shape index: {}]   ;;  %s11088_s11 = inlined_call_operand.vmem [shape: bf16[3,144,96], index: 11, kind: input, shape index: {}]   ;;  %s11089_s12 = inlined_call_operand.vmem [shape: f32[1,96], index: 12, kind: input, shape index: {}]   ;;  %s11090_s13 = inlined_call_operand.vmem [shape: bf16[3,96,96], index: 13, kind: input, shape index: {}]   ;;  %s11091_s14 = inlined_call_operand.vmem [shape: f32[1,96], index: 14, kind: input, shape index: {}]   ;;  %s11092_s15 = inlined_call_operand.vmem [shape: bf16[32,64], index: 15, kind: input, shape index: {}]   ;;  %s11093_s16 = inlined_call_operand.vmem [shape: f32[1,64], index: 16, kind: input, shape index: {}]   ;;  %s11094_s17 = inlined_call_operand.vmem [shape: bf16[64,64], index: 17, kind: input, shape index: {}]   ;;  %s11095_s18 = inlined_call_operand.vmem [shape: f32[1,64], index: 18, kind: input, shape index: {}]   ;;  %s11096_s19 = inlined_call_operand.hbm [shape: f32[2,1,64], index: 19, kind: output, shape index: {}]  }
   0x1   :  { %11106 = sst [smem:[#allocation12_spill]] %s11077_s0 }
   0x2   :  { %11107 = sst [smem:[#allocation13_spill]] %s11078_s1 }
   0x3   :  { %11108 = sst [smem:[#allocation14_spill]] %s11079_s2 }
   0x4   :  { %11109 = sst [smem:[#allocation15_spill]] %s11080_s3 }
   0x5   :  { %11110 = sst [smem:[#allocation16_spill]] %s11081_s4 }
   0x6   :  { %11111 = sst [smem:[#allocation17_spill]] %s11095_s18 }
   0x7   :  { %24 = vsyncpa [#allocation3], 0 }
   0x8   :  { %26 = vsyncpa [#allocation3 + $0x1], 0  ;;  %s7986_s0 = smov 0   ;;  %s7988_s30 = smov 0  }
   0x9   :  { %s7990_s20 = smov 0   ;;  %s7992_s21 = smov 0  }
   0xa LB: > { %11112 = sst [smem:[#allocation5_spill]] %s7867_s0  ;;  %s8007_s1 = sadd.s32 4294967295, %s7879_s21   ;;  %s7879_s21 = sphi %s7992_s21, %s11131_s21   ;;  %s7875_s20 = sphi %s7990_s20, %s11133_s20   ;;  %s7871_s30 = sphi %s7988_s30, %s11135_s30   ;;  %s7867_s0 = sphi %s7986_s0, %s11134_s0  }
   0xb   : > { %11113 = sst [smem:[#allocation6_spill]] %s7875_s20  ;;  %s5124_s22 = sadd.s32 4294967294, %s7879_s21  }
   0xc   : > { %11114 = sst [smem:[#allocation7_spill]] %s7879_s21  ;;  %s8011_s2 = sadd.s32 1, %s7879_s21  }
   0xd   : > { %11115 = sst [smem:[#allocation8_spill]] %s8011_s2  ;;  %s443_s23 = sadd.s32 1, %s7875_s20 }
   0xe   : > { %s440_s24 = ssub.s32 %s7879_s21, %s8011_s2  ;;  %p453_p0 = scmp.ne.s32.totalorder %s7875_s20, %s7871_s30 }
   0xf   : > { %p441_p1 = scmp.eq.s32.totalorder %s440_s24, 0  ;;  %p454_p2 = scmp.eq.s32.totalorder %s8007_s1, 1 }
  0x10   : > { %p459_p3 = scmp.ne.s32.totalorder %s7871_s30, %s7867_s0  ;;  %p460_p4 = scmp.eq.s32.totalorder %s5124_s22, 1 }
  0x11   : > { %s8022_s25 = scalar_select %p441_p1, %s7875_s20, %s443_s23  }
  0x12   : > { %p8024_p5 = por %p454_p2, %p453_p0  ;;  %p8028_p6 = por %p460_p4, %p459_p3 }
  0x13   : > { %11116 = sst [smem:[#allocation9_spill]] %s8022_s25  ;;  %p5127_p7 = scmp.ge.s32.totalorder %s7879_s21, 1 }
  0x14   : > { %s11117_s3 = scalar_select %p8024_p5, 1, 0 }
  0x15   : > { %s11119_s26 = scalar_select %p8028_p6, 1, 0 }
  0x16   : > { %11118 = sst [smem:[#allocation10_spill]] %s11117_s3  ;;  %p540_p8 = scmp.lt.s32.totalorder %s7879_s21, 3 }
  0x17   : > { %11120 = sst [smem:[#allocation11_spill]] %s11119_s26 }
  0x18   : > { %p541_p9 = pnand %p5127_p7, %p540_p8 }
  0x19   : > { %s11121_s29 = sld [smem:[#allocation13_spill]] (!%p541_p9)  ;;  %p595_p10 = scmp.lt.s32.totalorder (!%p541_p9), %s8007_s1, 1 }
  0x1a   : > { %544 = sbr.rel (%p541_p9) target bundleno = 2351 (0x92f), region = 96  ;;  %s11122_s20 = sld [smem:[#allocation12_spill]] (!%p541_p9) }
  0x1b   : > { %s11123_s21 = sld [smem:[#allocation14_spill]] (!%p541_p9)  ;;  %s7881_s23 = smov (!%p541_p9), 112  }
  0x1c   : > { %s7882_s27 = smov (!%p541_p9), 96   ;;  %s11124_s4 = sld [smem:[#allocation16_spill]] (!%p541_p9) }
  0x1d   : > { %s7883_s3 = smov (!%p541_p9), 80   ;;  %s7885_s28 = smov (!%p541_p9), 64  }
  0x1e   : > { %s593_s22 = sand.u32 (!%p541_p9), 1, %s7871_s30  }
  0x1f   : > { %v5289_v0 = vld [vmem:[%s11121_s29 + $0x3a0] sm:$0xf]  ;;  %v7431_v1 = vld [vmem:[%s11121_s29 + $0x3a4] sm:$0xf0]  ;;  %v5281_v11 = vld [vmem:[%s11121_s29 + $0x390] sm:$0xf] }
  0x20   : > { %v5353_v2 = vld [vmem:[%s11121_s29 + $0x420] sm:$0xf]  ;;  %v5290_v3 = vor.u32 %v7431_v1, %v5289_v0  ;;  %v7447_v4 = vld [vmem:[%s11121_s29 + $0x424] sm:$0xf0]  ;;  %v7429_v13 = vld [vmem:[%s11121_s29 + $0x394] sm:$0xf0] }
  0x21   : > { %v5417_v5 = vld [vmem:[%s11121_s29 + $0x4a0] sm:$0xf]  ;;  %v7463_v6 = vld [vmem:[%s11121_s29 + $0x4a4] sm:$0xf0]  ;;  %v5354_v7 = vor.u32 %v7447_v4, %v5353_v2  ;;  %v5345_v14 = vld [vmem:[%s11121_s29 + $0x410] sm:$0xf]  ;;  %v5282_v16 = vor.u32 %v7429_v13, %v5281_v11 }
  0x22   : > { %v5418_v8 = vor.u32 %v7463_v6, %v5417_v5  ;;  %v5481_v9 = vld [vmem:[%s11121_s29 + $0x520] sm:$0xf]  ;;  %v7479_v10 = vld [vmem:[%s11121_s29 + $0x524] sm:$0xf0]  ;;  %1403 = vmatpush.bf16.msra.mxu0 %v5290_v3  ;;  %v7445_v15 = vld [vmem:[%s11121_s29 + $0x414] sm:$0xf0] }
  0x23   : > { %v5482_v12 = vor.u32 %v7479_v10, %v5481_v9  ;;  %1417 = vmatpush.bf16.msra.mxu1 %v5354_v7  ;;  %v5346_v17 = vor.u32 %v7445_v15, %v5345_v14  ;;  %v5409_v18 = vld [vmem:[%s11121_s29 + $0x490] sm:$0xf]  ;;  %v7461_v19 = vld [vmem:[%s11121_s29 + $0x494] sm:$0xf0]  ;;  %v5273_v23 = vld [vmem:[%s11121_s29 + $0x380] sm:$0xf] }
  0x24   : > { %1431 = vmatpush.bf16.msra.mxu2 %v5418_v8  ;;  %v5473_v20 = vld [vmem:[%s11121_s29 + $0x510] sm:$0xf]  ;;  %v5410_v21 = vor.u32 %v7461_v19, %v5409_v18  ;;  %v7477_v22 = vld [vmem:[%s11121_s29 + $0x514] sm:$0xf0]  ;;  %v7427_v24 = vld [vmem:[%s11121_s29 + $0x384] sm:$0xf0] }
  0x25   : > { %1445 = vmatpush.bf16.msra.mxu3 %v5482_v12  ;;  %v5474_v25 = vor.u32 %v7477_v22, %v5473_v20  ;;  %v5337_v26 = vld [vmem:[%s11121_s29 + $0x400] sm:$0xf]  ;;  %v7443_v27 = vld [vmem:[%s11121_s29 + $0x404] sm:$0xf0]  ;;  %v5274_v29 = vor.u32 %v7427_v24, %v5273_v23  ;;  %v5265_v35 = vld [vmem:[%s11121_s29 + $0x370] sm:$0xf] }
  0x26   : > { %v5401_v28 = vld [vmem:[%s11121_s29 + $0x480] sm:$0xf]  ;;  %1404 = vmatpush.bf16.msra.mxu0 %v5282_v16  ;;  %v7459_v30 = vld [vmem:[%s11121_s29 + $0x484] sm:$0xf0]  ;;  %v5338_v33 = vor.u32 %v7443_v27, %v5337_v26  ;;  %v7425_v36 = vld [vmem:[%s11121_s29 + $0x374] sm:$0xf0] }
  0x27   : > { %v5465_v31 = vld [vmem:[%s11121_s29 + $0x500] sm:$0xf]  ;;  %v7475_v32 = vld [vmem:[%s11121_s29 + $0x504] sm:$0xf0]  ;;  %1418 = vmatpush.bf16.msra.mxu1 %v5346_v17  ;;  %v5402_v34 = vor.u32 %v7459_v30, %v5401_v28  ;;  %v5329_v37 = vld [vmem:[%s11121_s29 + $0x3f0] sm:$0xf]  ;;  %v5266_v44 = vor.u32 %v7425_v36, %v5265_v35 }
  0x28   : > { %1432 = vmatpush.bf16.msra.mxu2 %v5410_v21  ;;  %v5466_v38 = vor.u32 %v7475_v32, %v5465_v31  ;;  %v7441_v39 = vld [vmem:[%s11121_s29 + $0x3f4] sm:$0xf0]  ;;  %v5393_v40 = vld [vmem:[%s11121_s29 + $0x470] sm:$0xf]  ;;  %v5257_v47 = vld [vmem:[%s11121_s29 + $0x360] sm:$0xf] }
  0x29   : > { %1446 = vmatpush.bf16.msra.mxu3 %v5474_v25  ;;  %v7457_v41 = vld [vmem:[%s11121_s29 + $0x474] sm:$0xf0]  ;;  %v5457_v42 = vld [vmem:[%s11121_s29 + $0x4f0] sm:$0xf]  ;;  %v5330_v45 = vor.u32 %v7441_v39, %v5329_v37  ;;  %v7423_v48 = vld [vmem:[%s11121_s29 + $0x364] sm:$0xf0] }
  0x2a   : > { %v7473_v43 = vld [vmem:[%s11121_s29 + $0x4f4] sm:$0xf0]  ;;  %1405 = vmatpush.bf16.msra.mxu0 %v5274_v29  ;;  %v5394_v46 = vor.u32 %v7457_v41, %v5393_v40  ;;  %v5321_v49 = vld [vmem:[%s11121_s29 + $0x3e0] sm:$0xf]  ;;  %v7439_v51 = vld [vmem:[%s11121_s29 + $0x3e4] sm:$0xf0]  ;;  %v5258_v56 = vor.u32 %v7423_v48, %v5257_v47 }
  0x2b   : > { %1419 = vmatpush.bf16.msra.mxu1 %v5338_v33  ;;  %v5458_v50 = vor.u32 %v7473_v43, %v5457_v42  ;;  %v5385_v52 = vld [vmem:[%s11121_s29 + $0x460] sm:$0xf]  ;;  %v7455_v53 = vld [vmem:[%s11121_s29 + $0x464] sm:$0xf0]  ;;  %v5322_v57 = vor.u32 %v7439_v51, %v5321_v49  ;;  %v5249_v59 = vld [vmem:[%s11121_s29 + $0x350] sm:$0xf] }
  0x2c   : > { %1433 = vmatpush.bf16.msra.mxu2 %v5402_v34  ;;  %v5449_v54 = vld [vmem:[%s11121_s29 + $0x4e0] sm:$0xf]  ;;  %v7471_v55 = vld [vmem:[%s11121_s29 + $0x4e4] sm:$0xf0]  ;;  %v5386_v58 = vor.u32 %v7455_v53, %v5385_v52  ;;  %v7421_v60 = vld [vmem:[%s11121_s29 + $0x354] sm:$0xf0] }
  0x2d   : > { %1447 = vmatpush.bf16.msra.mxu3 %v5466_v38  ;;  %v5313_v61 = vld [vmem:[%s11121_s29 + $0x3d0] sm:$0xf]  ;;  %v5450_v62 = vor.u32 %v7471_v55, %v5449_v54  ;;  %v7437_v63 = vld [vmem:[%s11121_s29 + $0x3d4] sm:$0xf0]  ;;  %v5250_v4 = vor.u32 %v7421_v60, %v5249_v59  ;;  %v5241_v5 = vld [vmem:[%s11121_s29 + $0x340] sm:$0xf] }
  0x2e   : > { %1406 = vmatpush.bf16.msra.mxu0 %v5266_v44  ;;  %v5377_v0 = vld [vmem:[%s11121_s29 + $0x450] sm:$0xf]  ;;  %v7453_v1 = vld [vmem:[%s11121_s29 + $0x454] sm:$0xf0]  ;;  %v5314_v6 = vor.u32 %v7437_v63, %v5313_v61  ;;  %v7419_v8 = vld [vmem:[%s11121_s29 + $0x344] sm:$0xf0] }
  0x2f   : > { %1420 = vmatpush.bf16.msra.mxu1 %v5330_v45  ;;  %v5441_v2 = vld [vmem:[%s11121_s29 + $0x4d0] sm:$0xf]  ;;  %v7469_v3 = vld [vmem:[%s11121_s29 + $0x4d4] sm:$0xf0]  ;;  %v5378_v7 = vor.u32 %v7453_v1, %v5377_v0  ;;  %v5305_v9 = vld [vmem:[%s11121_s29 + $0x3c0] sm:$0xf]  ;;  %v5242_v18 = vor.u32 %v7419_v8, %v5241_v5 }
  0x30   : > { %1434 = vmatpush.bf16.msra.mxu2 %v5394_v46  ;;  %v7435_v10 = vld [vmem:[%s11121_s29 + $0x3c4] sm:$0xf0]  ;;  %v5442_v11 = vor.u32 %v7469_v3, %v5441_v2  ;;  %v5369_v12 = vld [vmem:[%s11121_s29 + $0x440] sm:$0xf]  ;;  %v5233_v16 = vld [vmem:[%s11121_s29 + $0x330] sm:$0xf] }
  0x31   : > { %1448 = vmatpush.bf16.msra.mxu3 %v5458_v50  ;;  %v7451_v13 = vld [vmem:[%s11121_s29 + $0x444] sm:$0xf0]  ;;  %v5433_v14 = vld [vmem:[%s11121_s29 + $0x4c0] sm:$0xf]  ;;  %v7417_v17 = vld [vmem:[%s11121_s29 + $0x334] sm:$0xf0]  ;;  %v5306_v23 = vor.u32 %v7435_v10, %v5305_v9 }
  0x32   : > { %1407 = vmatpush.bf16.msra.mxu0 %v5258_v56  ;;  %v7467_v15 = vld [vmem:[%s11121_s29 + $0x4c4] sm:$0xf0]  ;;  %v5297_v19 = vld [vmem:[%s11121_s29 + $0x3b0] sm:$0xf]  ;;  %v7433_v20 = vld [vmem:[%s11121_s29 + $0x3b4] sm:$0xf0]  ;;  %v5370_v24 = vor.u32 %v7451_v13, %v5369_v12  ;;  %v5234_v33 = vor.u32 %v7417_v17, %v5233_v16 }
  0x33   : > { %1421 = vmatpush.bf16.msra.mxu1 %v5322_v57  ;;  %v5361_v21 = vld [vmem:[%s11121_s29 + $0x430] sm:$0xf]  ;;  %v7449_v22 = vld [vmem:[%s11121_s29 + $0x434] sm:$0xf0]  ;;  %v5434_v27 = vor.u32 %v7467_v15, %v5433_v14  ;;  %v5545_v28 = vld [vmem:[%s11121_s29 + $0x5a0] sm:$0xf]  ;;  %v5298_v37 = vor.u32 %v7433_v20, %v5297_v19 }
  0x34   : > { %1435 = vmatpush.bf16.msra.mxu2 %v5386_v58  ;;  %v5425_v25 = vld [vmem:[%s11121_s29 + $0x4b0] sm:$0xf]  ;;  %v7465_v26 = vld [vmem:[%s11121_s29 + $0x4b4] sm:$0xf0]  ;;  %v7495_v29 = vld [vmem:[%s11121_s29 + $0x5a4] sm:$0xf0]  ;;  %v5362_v38 = vor.u32 %v7449_v22, %v5361_v21 }
  0x35   : > { %1449 = vmatpush.bf16.msra.mxu3 %v5450_v62  ;;  %v5609_v30 = vld [vmem:[%s11121_s29 + $0x620] sm:$0xf]  ;;  %v7511_v31 = vld [vmem:[%s11121_s29 + $0x624] sm:$0xf0]  ;;  %v5633_v32 = vld [vmem:[%s11121_s29 + $0x650] sm:$0xf]  ;;  %v5426_v41 = vor.u32 %v7465_v26, %v5425_v25  ;;  %v5546_v42 = vor.u32 %v7495_v29, %v5545_v28 }
  0x36   : > { %1408 = vmatpush.bf16.msra.mxu0 %v5250_v4  ;;  %s596_s2 = scalar_select %p595_p10, %s8007_s1, 1  ;;  %v7517_v34 = vld [vmem:[%s11121_s29 + $0x654] sm:$0xf0]  ;;  %v7430_v35 = vld [vmem:[%s11121_s29 + $0x3a4] sm:$0xf]  ;;  %v5610_v46 = vor.u32 %v7511_v31, %v5609_v30  ;;  %vm1399_vm0 = vcmask 392192  }
  0x37   : > { %1422 = vmatpush.bf16.msra.mxu1 %v5314_v6  ;;  %v5291_v36 = vld [vmem:[%s11121_s29 + $0x3a8] sm:$0xf0]  ;;  %v5537_v39 = vld [vmem:[%s11121_s29 + $0x590] sm:$0xf]  ;;  %v7493_v40 = vld [vmem:[%s11121_s29 + $0x594] sm:$0xf0]  ;;  %v5634_v47 = vor.u32 %v7517_v34, %v5633_v32 }
  0x38   : > { %1436 = vmatpush.bf16.msra.mxu2 %v5378_v7  ;;  %s7765_s24 = smul.u32 168, %s596_s2  ;;  %v5601_v43 = vld [vmem:[%s11121_s29 + $0x610] sm:$0xf]  ;;  %v7509_v44 = vld [vmem:[%s11121_s29 + $0x614] sm:$0xf0]  ;;  %v5294_v51 = vor.u32 %v7430_v35, %v5291_v36  ;;  %v5538_v57 = vor.u32 %v7493_v40, %v5537_v39  ;;  %vm2431_vm1 = vcmask 1046528  }
  0x39   : > { %1450 = vmatpush.bf16.msra.mxu3 %v5442_v11  ;;  %v5625_v45 = vld [vmem:[%s11121_s29 + $0x640] sm:$0xf]  ;;  %v7515_v48 = vld [vmem:[%s11121_s29 + $0x644] sm:$0xf0]  ;;  %v7428_v49 = vld [vmem:[%s11121_s29 + $0x394] sm:$0xf]  ;;  %v5602_v58 = vor.u32 %v7509_v44, %v5601_v43 }
  0x3a   : > { %1409 = vmatpush.bf16.msra.mxu0 %v5242_v18  ;;  %s8270_s0 = scalar_lea.vmem %s11122_s20, %s7765_s24  ;;  %v5283_v50 = vld [vmem:[%s11121_s29 + $0x398] sm:$0xf0]  ;;  %v5626_v62 = vor.u32 %v7515_v48, %v5625_v45  ;;  %v5529_v2 = vld [vmem:[%s11121_s29 + $0x580] sm:$0xf]  ;;  %v7491_v3 = vld [vmem:[%s11121_s29 + $0x584] sm:$0xf0] }
  0x3b   : > { %1423 = vmatpush.bf16.msra.mxu1 %v5306_v23  ;;  %v603_v52 = vld [vmem:[%s8270_s0 + $0x10] sm:$0xff]  ;;  %v610_v53 = vld [vmem:[%s8270_s0 + $0x48] sm:$0xff]  ;;  %v604_v54 = vld [vmem:[%s8270_s0 + $0x18] sm:$0xff]  ;;  %v5286_v6 = vor.u32 %v7428_v49, %v5283_v50  ;;  %vm3205_vm2 = vcmask 1045504   ;;  %vm3232_vm3 = vcmask 916480   ;;  %vm3251_vm4 = vcmask 785408  }
  0x3c   : > { %1437 = vmatpush.bf16.msra.mxu2 %v5370_v24  ;;  %v8284_v55 = vpack.c.bf16 %v610_v53, %v603_v52  ;;  %v611_v56 = vld [vmem:[%s8270_s0 + $0x50] sm:$0xff]  ;;  %v601_v59 = vld [vmem:[%s8270_s0] sm:$0xff]  ;;  %v608_v60 = vld [vmem:[%s8270_s0 + $0x38] sm:$0xff]  ;;  %vm3267_vm5 = vcmask 1044480   ;;  %vm3263_vm6 = vcmask 105472   ;;  %vm3340_vm7 = vcmask 654336  }
  0x3d   : > { %1451 = vmatpush.bf16.msra.mxu3 %v5434_v27  ;;  %v8289_v61 = vpack.c.bf16 %v611_v56, %v604_v54  ;;  %v8291_v63 = vpack.c.bf16 %v608_v60, %v601_v59  ;;  %v602_v0 = vld [vmem:[%s8270_s0 + $0x8] sm:$0xff]  ;;  %v609_v1 = vld [vmem:[%s8270_s0 + $0x40] sm:$0xff]  ;;  %v5617_v10 = vld [vmem:[%s11121_s29 + $0x630] sm:$0xf]  ;;  %v5530_v27 = vor.u32 %v7491_v3, %v5529_v2  ;;  %vm3387_vm8 = vcmask 1041408   ;;  %s7884_s24 = smov 104  }
  0x3e   : > { %1410 = vmatpush.bf16.msra.mxu0 %v5234_v33  ;;  %v849_v4 = vshrl.u32 %v8284_v55, 16  ;;  %v851_v5 = vshll.u32 %v8284_v55, 16  ;;  %v8303_v7 = vpack.c.bf16 %v609_v1, %v602_v0  ;;  %v5593_v8 = vld [vmem:[%s11121_s29 + $0x600] sm:$0xf]  ;;  %v7507_v9 = vld [vmem:[%s11121_s29 + $0x604] sm:$0xf0] }
  0x3f   : > { %1424 = vmatpush.bf16.msra.mxu1 %v5298_v37  ;;  %v7513_v11 = vld [vmem:[%s11121_s29 + $0x634] sm:$0xf0]  ;;  %v856_v12 = vshrl.u32 %v8289_v61, 16  ;;  %v858_v13 = vshll.u32 %v8289_v61, 16  ;;  %v835_v14 = vshrl.u32 %v8291_v63, 16  ;;  %v837_v15 = vshll.u32 %v8291_v63, 16 }
  0x40   : > { %1438 = vmatpush.bf16.msra.mxu2 %v5362_v38  ;;  %v7426_v16 = vld [vmem:[%s11121_s29 + $0x384] sm:$0xf]  ;;  %v853_v17 = vrot.slane %v851_v5, 1  ;;  %v842_v18 = vshrl.u32 %v8303_v7, 16  ;;  %v844_v19 = vshll.u32 %v8303_v7, 16  ;;  %v5594_v31 = vor.u32 %v7507_v9, %v5593_v8  ;;  %v614_v44 = vld [vmem:[%s8270_s0 + $0x68] sm:$0xff] }
  0x41   : > { %1452 = vmatpush.bf16.msra.mxu3 %v5426_v41  ;;  %v5275_v20 = vld [vmem:[%s11121_s29 + $0x388] sm:$0xf0]  ;;  %v860_v21 = vrot.slane %v858_v13, 1  ;;  %v839_v22 = vrot.slane %v837_v15, 1  ;;  %v7446_v23 = vld [vmem:[%s11121_s29 + $0x424] sm:$0xf]  ;;  %v5618_v32 = vor.u32 %v7513_v11, %v5617_v10 }
  0x42   : > { %1459 = vmatpush.bf16.msrb.mxu0 %v5546_v42  ;;  %v5355_v24 = vld [vmem:[%s11121_s29 + $0x428] sm:$0xf0]  ;;  %v8335_v25 = vor.u32 %v853_v17, %v849_v4  ;;  %v846_v26 = vrot.slane %v844_v19, 1  ;;  %v5521_v28 = vld [vmem:[%s11121_s29 + $0x570] sm:$0xf]  ;;  %v5278_v37 = vor.u32 %v7426_v16, %v5275_v20  ;;  %v605_v17 = vld [vmem:[%s8270_s0 + $0x20] sm:$0xff] }
  0x43   : > { %1473 = vmatpush.bf16.msrb.mxu1 %v5610_v46  ;;  %v8340_v29 = vor.u32 %v860_v21, %v856_v12  ;;  %v8342_v30 = vor.u32 %v839_v22, %v835_v14  ;;  %v7489_v33 = vld [vmem:[%s11121_s29 + $0x574] sm:$0xf0]  ;;  %v5585_v34 = vld [vmem:[%s11121_s29 + $0x5f0] sm:$0xf]  ;;  %v5358_v38 = vor.u32 %v7446_v23, %v5355_v24  ;;  %v7424_v39 = vld [vmem:[%s11121_s29 + $0x374] sm:$0xf] }
  0x44   : > { %1492 = vmatpush.bf16.msrb.mxu2 %v5634_v47  ;;  %v7505_v35 = vld [vmem:[%s11121_s29 + $0x5f4] sm:$0xf0]  ;;  %v8354_v36 = vor.u32 %v846_v26, %v842_v18  ;;  %v5267_v40 = vld [vmem:[%s11121_s29 + $0x378] sm:$0xf0]  ;;  %v607_v41 = vld [vmem:[%s8270_s0 + $0x30] sm:$0xff]  ;;  %v5522_v45 = vor.u32 %v7489_v33, %v5521_v28  ;;  %vm3389_vm9 = vcmask 1040384  }
  0x45   : > { %1501 = vmatpush.bf16.msrb.mxu3 %v5294_v51  ;;  %1439 = vmatmul.bf16.vlgmr.msra.gmra.mxu2 %v8335_v25  ;;  %v7444_v42 = vld [vmem:[%s11121_s29 + $0x414] sm:$0xf]  ;;  %v5347_v43 = vld [vmem:[%s11121_s29 + $0x418] sm:$0xf0]  ;;  %v5586_v46 = vor.u32 %v7505_v35, %v5585_v34  ;;  %v5513_v47 = vld [vmem:[%s11121_s29 + $0x560] sm:$0xf]  ;;  %v5270_v49 = vor.u32 %v7424_v39, %v5267_v40  ;;  %v8388_v54 = vpack.c.bf16 %v614_v44, %v607_v41 }
  0x46   : > { %1460 = vmatpush.bf16.msrb.mxu0 %v5538_v57  ;;  %1453 = vmatmul.bf16.vlgmr.msra.gmra.mxu3 %v8340_v29  ;;  %v7487_v48 = vld [vmem:[%s11121_s29 + $0x564] sm:$0xf0]  ;;  %v5350_v50 = vor.u32 %v7444_v42, %v5347_v43  ;;  %v5577_v51 = vld [vmem:[%s11121_s29 + $0x5e0] sm:$0xf]  ;;  %v7422_v53 = vld [vmem:[%s11121_s29 + $0x364] sm:$0xf] }
  0x47   : > { %1474 = vmatpush.bf16.msrb.mxu1 %v5602_v58  ;;  %1411 = vmatmul.bf16.vlgmr.msra.gmra.mxu0 %v8342_v30  ;;  %v7503_v52 = vld [vmem:[%s11121_s29 + $0x5e4] sm:$0xf0]  ;;  %v5259_v56 = vld [vmem:[%s11121_s29 + $0x368] sm:$0xf0]  ;;  %v7442_v57 = vld [vmem:[%s11121_s29 + $0x404] sm:$0xf]  ;;  %v5514_v59 = vor.u32 %v7487_v48, %v5513_v47 }
  0x48   : > { %1493 = vmatpush.bf16.msrb.mxu2 %v5626_v62  ;;  %1425 = vmatmul.bf16.vlgmr.msra.gmra.mxu1 %v8354_v36  ;;  %v5339_v58 = vld [vmem:[%s11121_s29 + $0x408] sm:$0xf0]  ;;  %v5505_v60 = vld [vmem:[%s11121_s29 + $0x550] sm:$0xf]  ;;  %v7485_v62 = vld [vmem:[%s11121_s29 + $0x554] sm:$0xf0]  ;;  %v5578_v0 = vor.u32 %v7503_v52, %v5577_v51  ;;  %v5262_v4 = vor.u32 %v7422_v53, %v5259_v56 }
  0x49   : > { %1502 = vmatpush.bf16.msrb.mxu3 %v5286_v6  ;;  %v5569_v1 = vld [vmem:[%s11121_s29 + $0x5d0] sm:$0xf]  ;;  %v7501_v2 = vld [vmem:[%s11121_s29 + $0x5d4] sm:$0xf0]  ;;  %v7420_v3 = vld [vmem:[%s11121_s29 + $0x354] sm:$0xf]  ;;  %v5342_v5 = vor.u32 %v7442_v57, %v5339_v58  ;;  %v5506_v13 = vor.u32 %v7485_v62, %v5505_v60 }
  0x4a   : > { %1461 = vmatpush.bf16.msrb.mxu0 %v5530_v27  ;;  %v5251_v6 = vld [vmem:[%s11121_s29 + $0x358] sm:$0xf0]  ;;  %v7440_v8 = vld [vmem:[%s11121_s29 + $0x3f4] sm:$0xf]  ;;  %v879_v9 = vshll.u32 %v8388_v54, 16  ;;  %v877_v12 = vshrl.u32 %v8388_v54, 16  ;;  %v5570_v18 = vor.u32 %v7501_v2, %v5569_v1 }
  0x4b   : > { %1475 = vmatpush.bf16.msrb.mxu1 %v5594_v31  ;;  %v5331_v10 = vld [vmem:[%s11121_s29 + $0x3f8] sm:$0xf0]  ;;  %v5497_v11 = vld [vmem:[%s11121_s29 + $0x540] sm:$0xf]  ;;  %v7483_v14 = vld [vmem:[%s11121_s29 + $0x544] sm:$0xf0]  ;;  %v5254_v22 = vor.u32 %v7420_v3, %v5251_v6 }
  0x4c   : > { %1494 = vmatpush.bf16.msrb.mxu2 %v5618_v32  ;;  %v5561_v15 = vld [vmem:[%s11121_s29 + $0x5c0] sm:$0xf]  ;;  %v881_v16 = vrot.slane %v879_v9, 1  ;;  %v7499_v19 = vld [vmem:[%s11121_s29 + $0x5c4] sm:$0xf0]  ;;  %v5334_v23 = vor.u32 %v7440_v8, %v5331_v10  ;;  %v612_v24 = vld [vmem:[%s8270_s0 + $0x58] sm:$0xff] }
  0x4d   : > { %1503 = vmatpush.bf16.msrb.mxu3 %v5278_v37  ;;  %v7418_v20 = vld [vmem:[%s11121_s29 + $0x344] sm:$0xf]  ;;  %v5243_v21 = vld [vmem:[%s11121_s29 + $0x348] sm:$0xf0]  ;;  %v5489_v32 = vld [vmem:[%s11121_s29 + $0x530] sm:$0xf]  ;;  %v8458_v34 = vpack.c.bf16 %v612_v24, %v605_v17  ;;  %v5498_v37 = vor.u32 %v7483_v14, %v5497_v11  ;;  %v5562_v41 = vor.u32 %v7499_v19, %v5561_v15 }
  0x4e   : > { %1462 = vmatpush.bf16.msrb.mxu0 %v5522_v45  ;;  %v606_v26 = vld [vmem:[%s8270_s0 + $0x28] sm:$0xff]  ;;  %v613_v27 = vld [vmem:[%s8270_s0 + $0x60] sm:$0xff]  ;;  %v8456_v33 = vor.u32 %v881_v16, %v877_v12  ;;  %v5553_v39 = vld [vmem:[%s11121_s29 + $0x5b0] sm:$0xf]  ;;  %v5246_v47 = vor.u32 %v7418_v20, %v5243_v21  ;;  %vm4015_vm10 = vcmask 850944   ;;  %vm4027_vm11 = vcmask 39936  }
  0x4f   : > { %1476 = vmatpush.bf16.msrb.mxu1 %v5586_v46  ;;  %v7438_v28 = vld [vmem:[%s11121_s29 + $0x3e4] sm:$0xf]  ;;  %v5323_v31 = vld [vmem:[%s11121_s29 + $0x3e8] sm:$0xf0]  ;;  %v8460_v35 = vpack.c.bf16 %v613_v27, %v606_v26  ;;  %v7497_v40 = vld [vmem:[%s11121_s29 + $0x5b4] sm:$0xf0] }
  0x50   : > { %1515 = vmatpush.bf16.msra.mxu2 %v5358_v38  ;;  %v7481_v38 = vld [vmem:[%s11121_s29 + $0x534] sm:$0xf0]  ;;  %v7416_v42 = vld [vmem:[%s11121_s29 + $0x334] sm:$0xf]  ;;  %v5235_v43 = vld [vmem:[%s11121_s29 + $0x338] sm:$0xf0]  ;;  %v5326_v48 = vor.u32 %v7438_v28, %v5323_v31  ;;  %v5554_v1 = vor.u32 %v7497_v40, %v5553_v39 }
  0x51   : > { %1504 = vmatpush.bf16.msrb.mxu3 %v5270_v49  ;;  %v7436_v44 = vld [vmem:[%s11121_s29 + $0x3d4] sm:$0xf]  ;;  %v865_v45 = vshll.u32 %v8458_v34, 16  ;;  %v872_v46 = vshll.u32 %v8460_v35, 16  ;;  %v5315_v49 = vld [vmem:[%s11121_s29 + $0x3d8] sm:$0xf0]  ;;  %v5490_v52 = vor.u32 %v7481_v38, %v5489_v32  ;;  %v5238_v3 = vor.u32 %v7416_v42, %v5235_v43 }
  0x52   : > { %1463 = vmatpush.bf16.msrb.mxu0 %v5514_v59  ;;  %v5419_v51 = vld [vmem:[%s11121_s29 + $0x4a8] sm:$0xf0]  ;;  %v7478_v53 = vld [vmem:[%s11121_s29 + $0x524] sm:$0xf]  ;;  %v863_v59 = vshrl.u32 %v8458_v34, 16  ;;  %v870_v62 = vshrl.u32 %v8460_v35, 16 }
  0x53   : > { %1477 = vmatpush.bf16.msrb.mxu1 %v5578_v0  ;;  %v5483_v56 = vld [vmem:[%s11121_s29 + $0x528] sm:$0xf0]  ;;  %v7494_v57 = vld [vmem:[%s11121_s29 + $0x5a4] sm:$0xf]  ;;  %v867_v60 = vrot.slane %v865_v45, 1  ;;  %v874_v0 = vrot.slane %v872_v46, 1 }
  0x54   : > { %1516 = vmatpush.bf16.msra.mxu2 %v5350_v50  ;;  %v7462_v50 = vld [vmem:[%s11121_s29 + $0x4a4] sm:$0xf]  ;;  %v5547_v58 = vld [vmem:[%s11121_s29 + $0x5a8] sm:$0xf0]  ;;  %v5411_v6 = vld [vmem:[%s11121_s29 + $0x498] sm:$0xf0]  ;;  %v5486_v8 = vor.u32 %v7478_v53, %v5483_v56 }
  0x55   : > { %1505 = vmatpush.bf16.msrb.mxu3 %v5262_v4  ;;  %5639 = vmatmul.msk.bf16.vlgmr.msrb.gmra.mxu2 %vm1399_vm0, %v8456_v33  ;;  %v5422_v2 = vor.u32 %v7462_v50, %v5419_v51  ;;  %v5318_v4 = vor.u32 %v7436_v44, %v5315_v49  ;;  %v5550_v9 = vor.u32 %v7494_v57, %v5547_v58  ;;  %v7434_v10 = vld [vmem:[%s11121_s29 + $0x3c4] sm:$0xf]  ;;  %v5307_v11 = vld [vmem:[%s11121_s29 + $0x3c8] sm:$0xf0]  ;;  %v7476_v12 = vld [vmem:[%s11121_s29 + $0x514] sm:$0xf] }
  0x56   : > { %1464 = vmatpush.bf16.msrb.mxu0 %v5506_v13  ;;  %v8522_v13 = vor.u32 %v867_v60, %v863_v59  ;;  %v8524_v14 = vor.u32 %v874_v0, %v870_v62  ;;  %v5475_v15 = vld [vmem:[%s11121_s29 + $0x518] sm:$0xf0]  ;;  %v7492_v16 = vld [vmem:[%s11121_s29 + $0x594] sm:$0xf]  ;;  %v5310_v19 = vor.u32 %v7434_v10, %v5307_v11  ;;  %v7458_v20 = vld [vmem:[%s11121_s29 + $0x484] sm:$0xf] }
  0x57   : > { %1478 = vmatpush.bf16.msrb.mxu1 %v5570_v18  ;;  %v5539_v17 = vld [vmem:[%s11121_s29 + $0x598] sm:$0xf0]  ;;  %v5403_v21 = vld [vmem:[%s11121_s29 + $0x488] sm:$0xf0]  ;;  %v7432_v24 = vld [vmem:[%s11121_s29 + $0x3b4] sm:$0xf] }
  0x58   : > { %1517 = vmatpush.bf16.msra.mxu2 %v5342_v5  ;;  %v7460_v5 = vld [vmem:[%s11121_s29 + $0x494] sm:$0xf]  ;;  %v5299_v26 = vld [vmem:[%s11121_s29 + $0x3b8] sm:$0xf0]  ;;  %v7474_v27 = vld [vmem:[%s11121_s29 + $0x504] sm:$0xf] }
  0x59   : > { %1506 = vmatpush.bf16.msrb.mxu3 %v5254_v22  ;;  %v5414_v18 = vor.u32 %v7460_v5, %v5411_v6  ;;  %v5478_v22 = vor.u32 %v7476_v12, %v5475_v15  ;;  %v5467_v28 = vld [vmem:[%s11121_s29 + $0x508] sm:$0xf0]  ;;  %v7490_v31 = vld [vmem:[%s11121_s29 + $0x584] sm:$0xf]  ;;  %v5302_v40 = vor.u32 %v7432_v24, %v5299_v26  ;;  %v5395_v42 = vld [vmem:[%s11121_s29 + $0x478] sm:$0xf0] }
  0x5a   : > { %1465 = vmatpush.bf16.msrb.mxu0 %v5498_v37  ;;  %v5531_v32 = vld [vmem:[%s11121_s29 + $0x588] sm:$0xf0]  ;;  %v5406_v37 = vor.u32 %v7458_v20, %v5403_v21  ;;  %v7510_v38 = vld [vmem:[%s11121_s29 + $0x624] sm:$0xf]  ;;  %v5470_v43 = vor.u32 %v7474_v27, %v5467_v28  ;;  %v7472_v45 = vld [vmem:[%s11121_s29 + $0x4f4] sm:$0xf] }
  0x5b   : > { %1479 = vmatpush.bf16.msrb.mxu1 %v5562_v41  ;;  %v5611_v39 = vld [vmem:[%s11121_s29 + $0x628] sm:$0xf0]  ;;  %v7456_v41 = vld [vmem:[%s11121_s29 + $0x474] sm:$0xf]  ;;  %v5534_v44 = vor.u32 %v7490_v31, %v5531_v32  ;;  %v5603_v51 = vld [vmem:[%s11121_s29 + $0x618] sm:$0xf0] }
  0x5c   : > { %1518 = vmatpush.bf16.msra.mxu2 %v5334_v23  ;;  %v5542_v23 = vor.u32 %v7492_v16, %v5539_v17  ;;  %v5614_v46 = vor.u32 %v7510_v38, %v5611_v39  ;;  %v5398_v49 = vor.u32 %v7456_v41, %v5395_v42  ;;  %v7508_v50 = vld [vmem:[%s11121_s29 + $0x614] sm:$0xf]  ;;  %v5387_v53 = vld [vmem:[%s11121_s29 + $0x468] sm:$0xf0]  ;;  %v7470_v58 = vld [vmem:[%s11121_s29 + $0x4e4] sm:$0xf] }
  0x5d   : > { %1507 = vmatpush.bf16.msrb.mxu3 %v5246_v47  ;;  %v7488_v47 = vld [vmem:[%s11121_s29 + $0x574] sm:$0xf]  ;;  %v5606_v59 = vor.u32 %v7508_v50, %v5603_v51  ;;  %v5451_v60 = vld [vmem:[%s11121_s29 + $0x4e8] sm:$0xf0]  ;;  %v7486_v62 = vld [vmem:[%s11121_s29 + $0x564] sm:$0xf] }
  0x5e   : > { %1466 = vmatpush.bf16.msrb.mxu0 %v5490_v52  ;;  %v7454_v52 = vld [vmem:[%s11121_s29 + $0x464] sm:$0xf]  ;;  %v5515_v0 = vld [vmem:[%s11121_s29 + $0x568] sm:$0xf0]  ;;  %v5379_v5 = vld [vmem:[%s11121_s29 + $0x458] sm:$0xf0]  ;;  %v5454_v6 = vor.u32 %v7470_v58, %v5451_v60 }
  0x5f   : > { %1480 = vmatpush.bf16.msrb.mxu1 %v5554_v1  ;;  %v5390_v1 = vor.u32 %v7454_v52, %v5387_v53  ;;  %v7484_v11 = vld [vmem:[%s11121_s29 + $0x554] sm:$0xf]  ;;  %v5507_v12 = vld [vmem:[%s11121_s29 + $0x558] sm:$0xf0]  ;;  %v5435_v24 = vld [vmem:[%s11121_s29 + $0x4c8] sm:$0xf0] }
  0x60   : > { %1519 = vmatpush.bf16.msra.mxu2 %v5326_v48  ;;  %v5523_v48 = vld [vmem:[%s11121_s29 + $0x578] sm:$0xf0]  ;;  %v7504_v16 = vld [vmem:[%s11121_s29 + $0x5f4] sm:$0xf]  ;;  %v5510_v21 = vor.u32 %v7484_v11, %v5507_v12  ;;  %v7482_v26 = vld [vmem:[%s11121_s29 + $0x544] sm:$0xf] }
  0x61   : > { %1508 = vmatpush.bf16.msrb.mxu3 %v5238_v3  ;;  %1467 = vmatmul.bf16.vlgmr.msrb.gmra.mxu0 %v8522_v13  ;;  %v5526_v57 = vor.u32 %v7488_v47, %v5523_v48  ;;  %v5595_v3 = vld [vmem:[%s11121_s29 + $0x608] sm:$0xf0]  ;;  %v5587_v17 = vld [vmem:[%s11121_s29 + $0x5f8] sm:$0xf0]  ;;  %v7502_v31 = vld [vmem:[%s11121_s29 + $0x5e4] sm:$0xf] }
  0x62   : > { %1529 = vmatpush.bf16.msra.mxu0 %v5422_v2  ;;  %1481 = vmatmul.bf16.vlgmr.msrb.gmra.mxu1 %v8524_v14  ;;  %v7506_v2 = vld [vmem:[%s11121_s29 + $0x604] sm:$0xf]  ;;  %v5499_v27 = vld [vmem:[%s11121_s29 + $0x548] sm:$0xf0]  ;;  %v5363_v38 = vld [vmem:[%s11121_s29 + $0x438] sm:$0xf0] }
  0x63   : > { %1543 = vmatpush.bf16.msra.mxu1 %v5486_v8  ;;  %v5518_v8 = vor.u32 %v7486_v62, %v5515_v0  ;;  %v5598_v10 = vor.u32 %v7506_v2, %v5595_v3  ;;  %v5579_v32 = vld [vmem:[%s11121_s29 + $0x5e8] sm:$0xf0]  ;;  %v7464_v39 = vld [vmem:[%s11121_s29 + $0x4b4] sm:$0xf]  ;;  %v5502_v41 = vor.u32 %v7482_v26, %v5499_v27  ;;  %v5427_v42 = vld [vmem:[%s11121_s29 + $0x4b8] sm:$0xf0] }
  0x64   : > { %1520 = vmatpush.bf16.msra.mxu2 %v5318_v4  ;;  %1509 = vmatmul.bf16.vlgmr.msrb.gmra.mxu3 %v8342_v30  ;;  %v5459_v30 = vld [vmem:[%s11121_s29 + $0x4f8] sm:$0xf0]  ;;  %v7452_v4 = vld [vmem:[%s11121_s29 + $0x454] sm:$0xf]  ;;  %v5699_v50 = vld [vmem:[%s11121_s29 + $0x70] sm:$0xf] }
  0x65   : > { %1557 = vmatpush.bf16.msra.mxu3 %v5550_v9  ;;  %v5462_v56 = vor.u32 %v7472_v45, %v5459_v30  ;;  %v7468_v9 = vld [vmem:[%s11121_s29 + $0x4d4] sm:$0xf]  ;;  %v5382_v15 = vor.u32 %v7452_v4, %v5379_v5  ;;  %v5582_v45 = vor.u32 %v7502_v31, %v5579_v32  ;;  %v5491_v30 = vld [vmem:[%s11121_s29 + $0x538] sm:$0xf0]  ;;  %v7329_v51 = vld [vmem:[%s11121_s29 + $0x74] sm:$0xf0] }
  0x66   : > { %1530 = vmatpush.bf16.msra.mxu0 %v5414_v18  ;;  %v7450_v18 = vld [vmem:[%s11121_s29 + $0x444] sm:$0xf]  ;;  %v7500_v47 = vld [vmem:[%s11121_s29 + $0x5d4] sm:$0xf]  ;;  %v5763_v53 = vld [vmem:[%s11121_s29 + $0xf0] sm:$0xf]  ;;  %v5700_v0 = vor.u32 %v7329_v51, %v5699_v50 }
  0x67   : > { %1544 = vmatpush.bf16.msra.mxu1 %v5478_v22  ;;  %v7466_v22 = vld [vmem:[%s11121_s29 + $0x4c4] sm:$0xf]  ;;  %v5627_v60 = vld [vmem:[%s11121_s29 + $0x648] sm:$0xf0]  ;;  %v5691_v4 = vld [vmem:[%s11121_s29 + $0x60] sm:$0xf] }
  0x68   : > { %1521 = vmatpush.bf16.msra.mxu2 %v5310_v19  ;;  %v5371_v19 = vld [vmem:[%s11121_s29 + $0x448] sm:$0xf0]  ;;  %v7327_v5 = vld [vmem:[%s11121_s29 + $0x64] sm:$0xf0]  ;;  %v5619_v11 = vld [vmem:[%s11121_s29 + $0x638] sm:$0xf0] }
  0x69   : > { %1558 = vmatpush.bf16.msra.mxu3 %v5542_v23  ;;  %v5590_v23 = vor.u32 %v7504_v16, %v5587_v17  ;;  %v5374_v28 = vor.u32 %v7450_v18, %v5371_v19  ;;  %v5563_v3 = vld [vmem:[%s11121_s29 + $0x5c8] sm:$0xf0]  ;;  %v5555_v16 = vld [vmem:[%s11121_s29 + $0x5b8] sm:$0xf0]  ;;  %v5827_v17 = vld [vmem:[%s11121_s29 + $0x170] sm:$0xf] }
  0x6a   : > { %1531 = vmatpush.bf16.msra.mxu0 %v5406_v37  ;;  %v7448_v37 = vld [vmem:[%s11121_s29 + $0x434] sm:$0xf]  ;;  %v7361_v18 = vld [vmem:[%s11121_s29 + $0x174] sm:$0xf0]  ;;  %v5819_v31 = vld [vmem:[%s11121_s29 + $0x160] sm:$0xf] }
  0x6b   : > { %1545 = vmatpush.bf16.msra.mxu1 %v5470_v43  ;;  %v7516_v43 = vld [vmem:[%s11121_s29 + $0x654] sm:$0xf]  ;;  %v5366_v48 = vor.u32 %v7448_v37, %v5363_v38  ;;  %v7377_v26 = vld [vmem:[%s11121_s29 + $0x1f4] sm:$0xf0]  ;;  %v5828_v27 = vor.u32 %v7361_v18, %v5827_v17  ;;  %v7359_v32 = vld [vmem:[%s11121_s29 + $0x164] sm:$0xf0] }
  0x6c   : > { %1522 = vmatpush.bf16.msra.mxu2 %v5302_v40  ;;  %v5438_v40 = vor.u32 %v7466_v22, %v5435_v24  ;;  %v5747_v22 = vld [vmem:[%s11121_s29 + $0xd0] sm:$0xf]  ;;  %v7321_v50 = vld [vmem:[%s11121_s29 + $0x34] sm:$0xf0]  ;;  %vm4097_vm12 = vcmask 1043456   ;;  %vm4069_vm13 = vcmask 982016  }
  0x6d   : > { %1559 = vmatpush.bf16.msra.mxu3 %v5534_v44  ;;  %v5635_v44 = vld [vmem:[%s11121_s29 + $0x658] sm:$0xf0]  ;;  %v5891_v24 = vld [vmem:[%s11121_s29 + $0x1f0] sm:$0xf]  ;;  %v7333_v17 = vld [vmem:[%s11121_s29 + $0x94] sm:$0xf0] }
  0x6e   : > { %1532 = vmatpush.bf16.msra.mxu0 %v5398_v49  ;;  %v5571_v49 = vld [vmem:[%s11121_s29 + $0x5d8] sm:$0xf0]  ;;  %v5638_v52 = vor.u32 %v7516_v43, %v5635_v44  ;;  %v5892_v38 = vor.u32 %v7377_v26, %v5891_v24  ;;  %v7375_v43 = vld [vmem:[%s11121_s29 + $0x1e4] sm:$0xf0]  ;;  %v5820_v44 = vor.u32 %v7359_v32, %v5819_v31  ;;  %v5731_v51 = vld [vmem:[%s11121_s29 + $0xb0] sm:$0xf] }
  0x6f   : > { %1523 = vmatmul.bf16.vlgmr.msra.gmra.mxu2 %v8354_v36  ;;  %1546 = vmatpush.bf16.msra.mxu1 %v5462_v56  ;;  %v5443_v36 = vld [vmem:[%s11121_s29 + $0x4d8] sm:$0xf0]  ;;  %v7345_v56 = vld [vmem:[%s11121_s29 + $0xf4] sm:$0xf0]  ;;  %v5574_v62 = vor.u32 %v7500_v47, %v5571_v49  ;;  %v5667_v49 = vld [vmem:[%s11121_s29 + $0x30] sm:$0xf] }
  0x70   : > { %1571 = vmatpush.bf16.msrb.mxu2 %v5614_v46  ;;  %v5446_v20 = vor.u32 %v7468_v9, %v5443_v36  ;;  %v7480_v46 = vld [vmem:[%s11121_s29 + $0x534] sm:$0xf]  ;;  %v5764_v2 = vor.u32 %v7345_v56, %v5763_v53  ;;  %v7343_v9 = vld [vmem:[%s11121_s29 + $0xe4] sm:$0xf0]  ;;  %v5875_v53 = vld [vmem:[%s11121_s29 + $0x1d0] sm:$0xf] }
  0x71   : > { %1560 = vmatpush.bf16.msra.mxu3 %v5526_v57  ;;  %v5430_v57 = vor.u32 %v7464_v39, %v5427_v42  ;;  %v5494_v58 = vor.u32 %v7480_v46, %v5491_v30  ;;  %v7512_v36 = vld [vmem:[%s11121_s29 + $0x634] sm:$0xf]  ;;  %v7323_v39 = vld [vmem:[%s11121_s29 + $0x44] sm:$0xf0]  ;;  %v5883_v42 = vld [vmem:[%s11121_s29 + $0x1e0] sm:$0xf] }
  0x72   : > { %1533 = vmatpush.bf16.msra.mxu0 %v5390_v1  ;;  %v7498_v1 = vld [vmem:[%s11121_s29 + $0x5c4] sm:$0xf]  ;;  %v5811_v46 = vld [vmem:[%s11121_s29 + $0x150] sm:$0xf]  ;;  %v7357_v30 = vld [vmem:[%s11121_s29 + $0x154] sm:$0xf0] }
  0x73   : > { %1547 = vmatpush.bf16.msra.mxu1 %v5454_v6  ;;  %v5566_v12 = vor.u32 %v7498_v1, %v5563_v3  ;;  %v7373_v56 = vld [vmem:[%s11121_s29 + $0x1d4] sm:$0xf0]  ;;  %v7319_v1 = vld [vmem:[%s11121_s29 + $0x24] sm:$0xf0]  ;;  %v5859_v18 = vld [vmem:[%s11121_s29 + $0x1b0] sm:$0xf] }
  0x74   : > { %1572 = vmatpush.bf16.msrb.mxu2 %v5606_v59  ;;  %v7514_v59 = vld [vmem:[%s11121_s29 + $0x644] sm:$0xf]  ;;  %v7335_v3 = vld [vmem:[%s11121_s29 + $0xa4] sm:$0xf0]  ;;  %v5955_v32 = vld [vmem:[%s11121_s29 + $0x270] sm:$0xf] }
  0x75   : > { %1561 = vmatpush.bf16.msra.mxu3 %v5518_v8  ;;  %v5630_v6 = vor.u32 %v7514_v59, %v5627_v60  ;;  %v5755_v8 = vld [vmem:[%s11121_s29 + $0xe0] sm:$0xf]  ;;  %v7355_v60 = vld [vmem:[%s11121_s29 + $0x144] sm:$0xf0]  ;;  %vm4171_vm14 = vcmask 588800   ;;  %vm7128_vm15 = vmpackc.low %vm4097_vm12, %vm4097_vm12 }
  0x76   : > { %1534 = vmatpush.bf16.msra.mxu0 %v5382_v15  ;;  %v5692_v15 = vor.u32 %v7327_v5, %v5691_v4  ;;  %v5756_v19 = vor.u32 %v7343_v9, %v5755_v8  ;;  %v5803_v59 = vld [vmem:[%s11121_s29 + $0x140] sm:$0xf]  ;;  %v7371_v5 = vld [vmem:[%s11121_s29 + $0x1c4] sm:$0xf0]  ;;  %v5651_v8 = vld [vmem:[%s11121_s29 + $0x10] sm:$0xf] }
  0x77   : > { %1548 = vmatpush.bf16.msra.mxu1 %v5446_v20  ;;  %v5683_v20 = vld [vmem:[%s11121_s29 + $0x50] sm:$0xf]  ;;  %v5867_v4 = vld [vmem:[%s11121_s29 + $0x1c0] sm:$0xf]  ;;  %v7315_v26 = vld [vmem:[%s11121_s29 + $0x4] sm:$0xf0] }
  0x78   : > { %1573 = vmatpush.bf16.msrb.mxu2 %v5598_v10  ;;  %v7496_v10 = vld [vmem:[%s11121_s29 + $0x5b4] sm:$0xf]  ;;  %v7367_v31 = vld [vmem:[%s11121_s29 + $0x1a4] sm:$0xf0] }
  0x79   : > { %1562 = vmatpush.bf16.msra.mxu3 %v5510_v21  ;;  %v7325_v21 = vld [vmem:[%s11121_s29 + $0x54] sm:$0xf0] }
  0x7a   : > { %1535 = vmatpush.bf16.msra.mxu0 %v5374_v28  ;;  %v5684_v28 = vor.u32 %v7325_v21, %v5683_v20 }
  0x7b   : > { %1549 = vmatpush.bf16.msra.mxu1 %v5438_v40  ;;  %v5739_v40 = vld [vmem:[%s11121_s29 + $0xc0] sm:$0xf] }
  0x7c   : > { %1574 = vmatpush.bf16.msrb.mxu2 %v5590_v23  ;;  %v5622_v23 = vor.u32 %v7512_v36, %v5619_v11  ;;  %v7353_v36 = vld [vmem:[%s11121_s29 + $0x134] sm:$0xf0] }
  0x7d   : > { %1563 = vmatpush.bf16.msra.mxu3 %v5502_v41  ;;  %v7339_v41 = vld [vmem:[%s11121_s29 + $0xc4] sm:$0xf0] }
  0x7e   : > { %1536 = vmatpush.bf16.msra.mxu0 %v5366_v48  ;;  %v5740_v47 = vor.u32 %v7339_v41, %v5739_v40  ;;  %v5884_v48 = vor.u32 %v7375_v43, %v5883_v42  ;;  %v5779_v41 = vld [vmem:[%s11121_s29 + $0x110] sm:$0xf]  ;;  %v7349_v42 = vld [vmem:[%s11121_s29 + $0x114] sm:$0xf0] }
  0x7f   : > { %1550 = vmatpush.bf16.msra.mxu1 %v5430_v57  ;;  %v5812_v57 = vor.u32 %v7357_v30, %v5811_v46  ;;  %v5843_v30 = vld [vmem:[%s11121_s29 + $0x190] sm:$0xf] }
  0x80   : > { %1575 = vmatpush.bf16.msrb.mxu2 %v5582_v45 }
  0x81   : > { %1564 = vmatpush.bf16.msra.mxu3 %v5494_v58  ;;  %1537 = vmatmul.bf16.vlgmr.msra.gmra.mxu0 %v8335_v25  ;;  %v7341_v25 = vld [vmem:[%s11121_s29 + $0xd4] sm:$0xf0]  ;;  %v5668_v58 = vor.u32 %v7321_v50, %v5667_v49  ;;  %v5780_v49 = vor.u32 %v7349_v42, %v5779_v41  ;;  %v7391_v50 = vld [vmem:[%s11121_s29 + $0x264] sm:$0xf0] }
  0x82   : > { %1590 = vmatpush.bf16.msrb.mxu0 %v5638_v52  ;;  %1551 = vmatmul.bf16.vlgmr.msra.gmra.mxu1 %v8340_v29  ;;  %v5748_v37 = vor.u32 %v7341_v25, %v5747_v22  ;;  %v5675_v29 = vld [vmem:[%s11121_s29 + $0x40] sm:$0xf]  ;;  %v7337_v52 = vld [vmem:[%s11121_s29 + $0xb4] sm:$0xf0] }
  0x83   : > { %2111 = vmatpush.bf16.msrb.mxu1 %v5700_v0  ;;  %v5676_v45 = vor.u32 %v7323_v39, %v5675_v29  ;;  %v5876_v0 = vor.u32 %v7373_v56, %v5875_v53  ;;  %v5787_v22 = vld [vmem:[%s11121_s29 + $0x120] sm:$0xf]  ;;  %v6019_v29 = vld [vmem:[%s11121_s29 + $0x2f0] sm:$0xf]  ;;  %v7409_v39 = vld [vmem:[%s11121_s29 + $0x2f4] sm:$0xf0] }
  0x84   : > { %1576 = vmatpush.bf16.msrb.mxu2 %v5574_v62  ;;  %1565 = vmatmul.bf16.vlgmr.msra.gmra.mxu3 %v8522_v13  ;;  %v5558_v13 = vor.u32 %v7496_v10, %v5555_v16  ;;  %v5732_v62 = vor.u32 %v7337_v52, %v5731_v51  ;;  %v5795_v10 = vld [vmem:[%s11121_s29 + $0x130] sm:$0xf]  ;;  %v6020_v46 = vor.u32 %v7409_v39, %v6019_v29  ;;  %v6011_v51 = vld [vmem:[%s11121_s29 + $0x2e0] sm:$0xf]  ;;  %v7407_v52 = vld [vmem:[%s11121_s29 + $0x2e4] sm:$0xf0] }
  0x85   : > { %2125 = vmatpush.bf16.msrb.mxu3 %v5764_v2  ;;  %v5723_v2 = vld [vmem:[%s11121_s29 + $0xa0] sm:$0xf]  ;;  %v5715_v16 = vld [vmem:[%s11121_s29 + $0x90] sm:$0xf]  ;;  %v5796_v20 = vor.u32 %v7353_v36, %v5795_v10  ;;  %v7347_v56 = vld [vmem:[%s11121_s29 + $0x104] sm:$0xf0] }
  0x86   : > { %1591 = vmatpush.bf16.msrb.mxu0 %v5630_v6  ;;  %v5804_v6 = vor.u32 %v7355_v60, %v5803_v59  ;;  %v5724_v11 = vor.u32 %v7335_v3, %v5723_v2  ;;  %v5716_v25 = vor.u32 %v7333_v17, %v5715_v16  ;;  %v5771_v53 = vld [vmem:[%s11121_s29 + $0x100] sm:$0xf]  ;;  %v7415_v59 = vld [vmem:[%s11121_s29 + $0x324] sm:$0xf0]  ;;  %v7389_v3 = vld [vmem:[%s11121_s29 + $0x254] sm:$0xf0] }
  0x87   : > { %2112 = vmatpush.bf16.msrb.mxu1 %v5692_v15  ;;  %v7317_v15 = vld [vmem:[%s11121_s29 + $0x14] sm:$0xf0]  ;;  %v5772_v2 = vor.u32 %v7347_v56, %v5771_v53  ;;  %v6035_v36 = vld [vmem:[%s11121_s29 + $0x310] sm:$0xf]  ;;  %v5931_v16 = vld [vmem:[%s11121_s29 + $0x240] sm:$0xf] }
  0x88   : > { %1577 = vmatpush.bf16.msrb.mxu2 %v5566_v12  ;;  %v5868_v12 = vor.u32 %v7371_v5, %v5867_v4  ;;  %v5652_v21 = vor.u32 %v7317_v15, %v5651_v8  ;;  %v6003_v4 = vld [vmem:[%s11121_s29 + $0x2d0] sm:$0xf]  ;;  %v7405_v5 = vld [vmem:[%s11121_s29 + $0x2d4] sm:$0xf0]  ;;  %v7328_v8 = vld [vmem:[%s11121_s29 + $0x74] sm:$0xf] }
  0x89   : > { %2126 = vmatpush.bf16.msrb.mxu3 %v5756_v19  ;;  %v7369_v19 = vld [vmem:[%s11121_s29 + $0x1b4] sm:$0xf0]  ;;  %v6004_v15 = vor.u32 %v7405_v5, %v6003_v4  ;;  %v7324_v39 = vld [vmem:[%s11121_s29 + $0x54] sm:$0xf]  ;;  %v5899_v4 = vld [vmem:[%s11121_s29 + $0x200] sm:$0xf] }
  0x8a   : > { %1592 = vmatpush.bf16.msrb.mxu0 %v5622_v23  ;;  %v7351_v23 = vld [vmem:[%s11121_s29 + $0x124] sm:$0xf0]  ;;  %v5860_v24 = vor.u32 %v7369_v19, %v5859_v18  ;;  %v5995_v19 = vld [vmem:[%s11121_s29 + $0x2c0] sm:$0xf] }
  0x8b   : > { %2113 = vmatpush.bf16.msrb.mxu1 %v5684_v28  ;;  %v5851_v28 = vld [vmem:[%s11121_s29 + $0x1a0] sm:$0xf]  ;;  %v7387_v18 = vld [vmem:[%s11121_s29 + $0x244] sm:$0xf0] }
  0x8c   : > { %1578 = vmatpush.bf16.msrb.mxu2 %v5558_v13  ;;  %v7331_v13 = vld [vmem:[%s11121_s29 + $0x84] sm:$0xf0] }
  0x8d   : > { %2127 = vmatpush.bf16.msrb.mxu3 %v5748_v37  ;;  %v5788_v37 = vor.u32 %v7351_v23, %v5787_v22  ;;  %v5693_v22 = vld [vmem:[%s11121_s29 + $0x68] sm:$0xf0]  ;;  %v6027_v23 = vld [vmem:[%s11121_s29 + $0x300] sm:$0xf] }
  0x8e   : > { %2139 = vmatpush.bf16.msra.mxu0 %v5828_v27  ;;  %v5707_v27 = vld [vmem:[%s11121_s29 + $0x80] sm:$0xf] }
  0x8f   : > { %1579 = vmatmul.bf16.vlgmr.msrb.gmra.mxu2 %v8524_v14  ;;  %2114 = vmatpush.bf16.msrb.mxu1 %v5676_v45  ;;  %v5659_v14 = vld [vmem:[%s11121_s29 + $0x20] sm:$0xf]  ;;  %v5708_v43 = vor.u32 %v7331_v13, %v5707_v27  ;;  %v5923_v27 = vld [vmem:[%s11121_s29 + $0x230] sm:$0xf]  ;;  %v7344_v13 = vld [vmem:[%s11121_s29 + $0xf4] sm:$0xf] }
  0x90   : > { %2153 = vmatpush.bf16.msra.mxu2 %v5892_v38  ;;  %v5660_v9 = vor.u32 %v7319_v1, %v5659_v14  ;;  %v7393_v38 = vld [vmem:[%s11121_s29 + $0x274] sm:$0xf0]  ;;  %v7363_v14 = vld [vmem:[%s11121_s29 + $0x184] sm:$0xf0]  ;;  %v5939_v1 = vld [vmem:[%s11121_s29 + $0x250] sm:$0xf] }
  0x91   : > { %2128 = vmatpush.bf16.msrb.mxu3 %v5740_v47  ;;  %5640 = vmatmul.msk.bf16.vlgmr.msrb.gmra.mxu0 %vm1399_vm0, %v8456_v33  ;;  %v5643_v33 = vld [vmem:[%s11121_s29] sm:$0xf]  ;;  %v5956_v45 = vor.u32 %v7393_v38, %v5955_v32  ;;  %v7365_v47 = vld [vmem:[%s11121_s29 + $0x194] sm:$0xf0] }
  0x92   : > { %2140 = vmatpush.bf16.msra.mxu0 %v5820_v44  ;;  %v5644_v40 = vor.u32 %v7315_v26, %v5643_v33  ;;  %v5852_v44 = vor.u32 %v7367_v31, %v5851_v28  ;;  %v7326_v33 = vld [vmem:[%s11121_s29 + $0x64] sm:$0xf]  ;;  %v5765_v28 = vld [vmem:[%s11121_s29 + $0xf8] sm:$0xf0]  ;;  %v7385_v32 = vld [vmem:[%s11121_s29 + $0x234] sm:$0xf0] }
  0x93   : > { %2115 = vmatpush.bf16.msrb.mxu1 %v5668_v58  ;;  %v6043_v58 = vld [vmem:[%s11121_s29 + $0x320] sm:$0xf]  ;;  %v5696_v31 = vor.u32 %v7326_v33, %v5693_v22  ;;  %v7401_v38 = vld [vmem:[%s11121_s29 + $0x2b4] sm:$0xf0]  ;;  %v5768_v41 = vor.u32 %v7344_v13, %v5765_v28  ;;  %v5924_v42 = vor.u32 %v7385_v32, %v5923_v27  ;;  %v5733_v27 = vld [vmem:[%s11121_s29 + $0xb8] sm:$0xf0] }
  0x94   : > { %2154 = vmatpush.bf16.msra.mxu2 %v5884_v48  ;;  %v5947_v48 = vld [vmem:[%s11121_s29 + $0x260] sm:$0xf]  ;;  %v5653_v28 = vld [vmem:[%s11121_s29 + $0x18] sm:$0xf0]  ;;  %v5821_v32 = vld [vmem:[%s11121_s29 + $0x168] sm:$0xf0] }
  0x95   : > { %2129 = vmatpush.bf16.msrb.mxu3 %v5732_v62  ;;  %v5948_v60 = vor.u32 %v7391_v50, %v5947_v48  ;;  %v6012_v62 = vor.u32 %v7407_v52, %v6011_v51  ;;  %v5979_v48 = vld [vmem:[%s11121_s29 + $0x2a0] sm:$0xf]  ;;  %v7322_v50 = vld [vmem:[%s11121_s29 + $0x44] sm:$0xf]  ;;  %v5677_v51 = vld [vmem:[%s11121_s29 + $0x48] sm:$0xf0] }
  0x96   : > { %2141 = vmatpush.bf16.msra.mxu0 %v5812_v57  ;;  %v5844_v57 = vor.u32 %v7365_v47, %v5843_v30  ;;  %v7383_v47 = vld [vmem:[%s11121_s29 + $0x224] sm:$0xf0] }
  0x97   : > { %2116 = vmatpush.bf16.msrb.mxu1 %v5660_v9  ;;  %v5701_v9 = vld [vmem:[%s11121_s29 + $0x78] sm:$0xf0] }
  0x98   : > { %2155 = vmatpush.bf16.msra.mxu2 %v5876_v0  ;;  %v5835_v0 = vld [vmem:[%s11121_s29 + $0x180] sm:$0xf]  ;;  %v5704_v17 = vor.u32 %v7328_v8, %v5701_v9  ;;  %v7379_v8 = vld [vmem:[%s11121_s29 + $0x204] sm:$0xf0]  ;;  %v7338_v9 = vld [vmem:[%s11121_s29 + $0xc4] sm:$0xf] }
  0x99   : > { %2130 = vmatpush.bf16.msrb.mxu3 %v5724_v11  ;;  %v5836_v10 = vor.u32 %v7363_v14, %v5835_v0  ;;  %v7413_v11 = vld [vmem:[%s11121_s29 + $0x314] sm:$0xf0]  ;;  %v5971_v0 = vld [vmem:[%s11121_s29 + $0x290] sm:$0xf]  ;;  %v5900_v33 = vor.u32 %v7379_v8, %v5899_v4  ;;  %v7352_v4 = vld [vmem:[%s11121_s29 + $0x134] sm:$0xf] }
  0x9a   : > { %2142 = vmatpush.bf16.msra.mxu0 %v5804_v6  ;;  %v6044_v6 = vor.u32 %v7415_v59, %v6043_v58  ;;  %v7340_v58 = vld [vmem:[%s11121_s29 + $0xd4] sm:$0xf]  ;;  %v5749_v59 = vld [vmem:[%s11121_s29 + $0xd8] sm:$0xf0]  ;;  %v7397_v14 = vld [vmem:[%s11121_s29 + $0x294] sm:$0xf0] }
  0x9b   : > { %2117 = vmatpush.bf16.msrb.mxu1 %v5652_v21  ;;  %v6036_v21 = vor.u32 %v7413_v11, %v6035_v36  ;;  %v5963_v11 = vld [vmem:[%s11121_s29 + $0x280] sm:$0xf]  ;;  %v7330_v8 = vld [vmem:[%s11121_s29 + $0x84] sm:$0xf] }
  0x9c   : > { %2156 = vmatpush.bf16.msra.mxu2 %v5868_v12  ;;  %v5940_v12 = vor.u32 %v7389_v3, %v5939_v1  ;;  %v7320_v1 = vld [vmem:[%s11121_s29 + $0x34] sm:$0xf]  ;;  %v5752_v3 = vor.u32 %v7340_v58, %v5749_v59 }
  0x9d   : > { %2131 = vmatpush.bf16.msrb.mxu3 %v5716_v25  ;;  %v7411_v25 = vld [vmem:[%s11121_s29 + $0x304] sm:$0xf0] }
  0x9e   : > { %2143 = vmatpush.bf16.msra.mxu0 %v5796_v20  ;;  %v7403_v20 = vld [vmem:[%s11121_s29 + $0x2c4] sm:$0xf0]  ;;  %v6028_v29 = vor.u32 %v7411_v25, %v6027_v23 }
  0x9f   : > { %2118 = vmatpush.bf16.msrb.mxu1 %v5644_v40  ;;  %v5996_v26 = vor.u32 %v7403_v20, %v5995_v19  ;;  %v5685_v40 = vld [vmem:[%s11121_s29 + $0x58] sm:$0xf0]  ;;  %v7376_v19 = vld [vmem:[%s11121_s29 + $0x1f4] sm:$0xf] }
  0xa0   : > { %2157 = vmatpush.bf16.msra.mxu2 %v5860_v24  ;;  %v5932_v24 = vor.u32 %v7387_v18, %v5931_v16  ;;  %v5688_v30 = vor.u32 %v7324_v39, %v5685_v40  ;;  %v5661_v16 = vld [vmem:[%s11121_s29 + $0x28] sm:$0xf0]  ;;  %v5829_v18 = vld [vmem:[%s11121_s29 + $0x178] sm:$0xf0]  ;;  %v7314_v39 = vld [vmem:[%s11121_s29 + $0x4] sm:$0xf] }
  0xa1   : > { %2132 = vmatpush.bf16.msrb.mxu3 %v5708_v43  ;;  %v5893_v20 = vld [vmem:[%s11121_s29 + $0x1f8] sm:$0xf0] }
  0xa2   : > { %2144 = vmatpush.bf16.msra.mxu0 %v5788_v37  ;;  %2119 = vmatmul.bf16.vlgmr.msrb.gmra.mxu1 %v8291_v63  ;;  %v5987_v37 = vld [vmem:[%s11121_s29 + $0x2b0] sm:$0xf]  ;;  %v5896_v13 = vor.u32 %v7376_v19, %v5893_v20 }
  0xa3   : > { %2167 = vmatpush.bf16.msra.mxu1 %v5956_v45  ;;  %v5988_v43 = vor.u32 %v7401_v38, %v5987_v37  ;;  %v7342_v45 = vld [vmem:[%s11121_s29 + $0xe4] sm:$0xf]  ;;  %v5885_v38 = vld [vmem:[%s11121_s29 + $0x1e8] sm:$0xf0] }
  0xa4   : > { %2158 = vmatpush.bf16.msra.mxu2 %v5852_v44  ;;  %2133 = vmatmul.bf16.vlgmr.msrb.gmra.mxu3 %v8303_v7  ;;  %v5915_v44 = vld [vmem:[%s11121_s29 + $0x220] sm:$0xf]  ;;  %v7374_v37 = vld [vmem:[%s11121_s29 + $0x1e4] sm:$0xf] }
  0xa5   : > { %2181 = vmatpush.bf16.msra.mxu3 %v6020_v46  ;;  %v5757_v46 = vld [vmem:[%s11121_s29 + $0xe8] sm:$0xf0]  ;;  %v5916_v53 = vor.u32 %v7383_v47, %v5915_v44  ;;  %v7372_v47 = vld [vmem:[%s11121_s29 + $0x1d4] sm:$0xf] }
  0xa6   : > { %2145 = vmatpush.bf16.msra.mxu0 %v5780_v49  ;;  %v7399_v49 = vld [vmem:[%s11121_s29 + $0x2a4] sm:$0xf0]  ;;  %v5760_v52 = vor.u32 %v7342_v45, %v5757_v46  ;;  %v5725_v44 = vld [vmem:[%s11121_s29 + $0xa8] sm:$0xf0]  ;;  %v5888_v45 = vor.u32 %v7374_v37, %v5885_v38  ;;  %v7356_v46 = vld [vmem:[%s11121_s29 + $0x154] sm:$0xf] }
  0xa7   : > { %2168 = vmatpush.bf16.msra.mxu1 %v5948_v60  ;;  %v5980_v56 = vor.u32 %v7399_v49, %v5979_v48  ;;  %v5680_v60 = vor.u32 %v7322_v50, %v5677_v51  ;;  %v5877_v48 = vld [vmem:[%s11121_s29 + $0x1d8] sm:$0xf0]  ;;  %v7392_v49 = vld [vmem:[%s11121_s29 + $0x274] sm:$0xf]  ;;  %v5933_v37 = vld [vmem:[%s11121_s29 + $0x248] sm:$0xf0] }
  0xa8   : > { %2159 = vmatpush.bf16.msra.mxu2 %v5844_v57  ;;  %v5907_v57 = vld [vmem:[%s11121_s29 + $0x210] sm:$0xf]  ;;  %v5957_v50 = vld [vmem:[%s11121_s29 + $0x278] sm:$0xf0]  ;;  %v5880_v58 = vor.u32 %v7372_v47, %v5877_v48  ;;  %v7384_v48 = vld [vmem:[%s11121_s29 + $0x234] sm:$0xf] }
  0xa9   : > { %2182 = vmatpush.bf16.msra.mxu3 %v6012_v62  ;;  %v7381_v62 = vld [vmem:[%s11121_s29 + $0x214] sm:$0xf0]  ;;  %v5960_v59 = vor.u32 %v7392_v49, %v5957_v50  ;;  %v5845_v47 = vld [vmem:[%s11121_s29 + $0x198] sm:$0xf0] }
  0xaa   : > { %2146 = vmatpush.bf16.msra.mxu0 %v5772_v2  ;;  %v5669_v2 = vld [vmem:[%s11121_s29 + $0x38] sm:$0xf0]  ;;  %v5908_v5 = vor.u32 %v7381_v62, %v5907_v57  ;;  %v5805_v62 = vld [vmem:[%s11121_s29 + $0x148] sm:$0xf0] }
  0xab   : > { %2169 = vmatpush.bf16.msra.mxu1 %v5940_v12  ;;  %v5672_v36 = vor.u32 %v7320_v1, %v5669_v2  ;;  %v7395_v12 = vld [vmem:[%s11121_s29 + $0x284] sm:$0xf0]  ;;  %v5717_v57 = vld [vmem:[%s11121_s29 + $0x98] sm:$0xf0]  ;;  %v7390_v1 = vld [vmem:[%s11121_s29 + $0x264] sm:$0xf] }
  0xac   : > { %2160 = vmatpush.bf16.msra.mxu2 %v5836_v10  ;;  %v5741_v10 = vld [vmem:[%s11121_s29 + $0xc8] sm:$0xf0]  ;;  %v5964_v22 = vor.u32 %v7395_v12, %v5963_v11  ;;  %v7368_v11 = vld [vmem:[%s11121_s29 + $0x1b4] sm:$0xf]  ;;  %v5925_v49 = vld [vmem:[%s11121_s29 + $0x238] sm:$0xf0] }
  0xad   : > { %2183 = vmatpush.bf16.msra.mxu3 %v6004_v15  ;;  %2147 = vmatmul.bf16.vlgmr.msra.gmra.mxu0 %v8284_v55  ;;  %v7318_v15 = vld [vmem:[%s11121_s29 + $0x24] sm:$0xf]  ;;  %v5949_v2 = vld [vmem:[%s11121_s29 + $0x268] sm:$0xf0]  ;;  %v7408_v12 = vld [vmem:[%s11121_s29 + $0x2f4] sm:$0xf] }
  0xae   : > { %2200 = vmatpush.bf16.msrb.mxu0 %v6044_v6  ;;  %v5972_v6 = vor.u32 %v7397_v14, %v5971_v0  ;;  %v5664_v23 = vor.u32 %v7318_v15, %v5661_v16  ;;  %v7370_v0 = vld [vmem:[%s11121_s29 + $0x1c4] sm:$0xf]  ;;  %v5869_v14 = vld [vmem:[%s11121_s29 + $0x1c8] sm:$0xf0]  ;;  %v6021_v15 = vld [vmem:[%s11121_s29 + $0x2f8] sm:$0xf0] }
  0xaf   : > { %2161 = vmatmul.bf16.vlgmr.msra.gmra.mxu2 %v8289_v61  ;;  %2170 = vmatpush.bf16.msra.mxu1 %v5932_v24  ;;  %v7316_v24 = vld [vmem:[%s11121_s29 + $0x14] sm:$0xf]  ;;  %v5861_v16 = vld [vmem:[%s11121_s29 + $0x1b8] sm:$0xf0] }
  0xb0   : > { %2209 = vmatpush.bf16.msrb.mxu2 %v5704_v17  ;;  %v7360_v17 = vld [vmem:[%s11121_s29 + $0x174] sm:$0xf]  ;;  %v5656_v40 = vor.u32 %v7316_v24, %v5653_v28 }
  0xb1   : > { %2184 = vmatpush.bf16.msra.mxu3 %v5996_v26  ;;  %v5832_v25 = vor.u32 %v7360_v17, %v5829_v18  ;;  %v7336_v26 = vld [vmem:[%s11121_s29 + $0xb4] sm:$0xf]  ;;  %v5941_v18 = vld [vmem:[%s11121_s29 + $0x258] sm:$0xf0] }
  0xb2   : > { %2201 = vmatpush.bf16.msrb.mxu0 %v6036_v21  ;;  %v5744_v21 = vor.u32 %v7338_v9, %v5741_v10  ;;  %v5709_v9 = vld [vmem:[%s11121_s29 + $0x88] sm:$0xf0]  ;;  %v5872_v10 = vor.u32 %v7370_v0, %v5869_v14  ;;  %v7388_v17 = vld [vmem:[%s11121_s29 + $0x254] sm:$0xf]  ;;  %v7402_v14 = vld [vmem:[%s11121_s29 + $0x2c4] sm:$0xf] }
  0xb3   : > { %2171 = vmatpush.bf16.msra.mxu1 %v5924_v42  ;;  %v5645_v42 = vld [vmem:[%s11121_s29 + $0x8] sm:$0xf0]  ;;  %v5712_v19 = vor.u32 %v7330_v8, %v5709_v9  ;;  %v5944_v24 = vor.u32 %v7388_v17, %v5941_v18  ;;  %v6211_v9 = vld [vmem:[%s11121_s29 + $0x6d0] sm:$0xf]  ;;  %v5989_v17 = vld [vmem:[%s11121_s29 + $0x2b8] sm:$0xf0] }
  0xb4   : > { %2210 = vmatpush.bf16.msrb.mxu2 %v5696_v31  ;;  %v7358_v31 = vld [vmem:[%s11121_s29 + $0x164] sm:$0xf]  ;;  %v5837_v0 = vld [vmem:[%s11121_s29 + $0x188] sm:$0xf0] }
  0xb5   : > { %2185 = vmatpush.bf16.msra.mxu3 %v5988_v43  ;;  %v7334_v43 = vld [vmem:[%s11121_s29 + $0xa4] sm:$0xf]  ;;  %v6045_v8 = vld [vmem:[%s11121_s29 + $0x328] sm:$0xf0] }
  0xb6   : > { %2202 = vmatpush.bf16.msrb.mxu0 %v6028_v29  ;;  %v5736_v29 = vor.u32 %v7336_v26, %v5733_v27  ;;  %v5728_v51 = vor.u32 %v7334_v43, %v5725_v44  ;;  %v7366_v26 = vld [vmem:[%s11121_s29 + $0x1a4] sm:$0xf]  ;;  %v7364_v44 = vld [vmem:[%s11121_s29 + $0x194] sm:$0xf] }
  0xb7   : > { %2172 = vmatpush.bf16.msra.mxu1 %v5916_v53  ;;  %v7406_v27 = vld [vmem:[%s11121_s29 + $0x2e4] sm:$0xf] }
  0xb8   : > { %2211 = vmatpush.bf16.msrb.mxu2 %v5688_v30  ;;  %v5813_v30 = vld [vmem:[%s11121_s29 + $0x158] sm:$0xf0] }
  0xb9   : > { %2186 = vmatpush.bf16.msra.mxu3 %v5980_v56  ;;  %v5816_v53 = vor.u32 %v7356_v46, %v5813_v30  ;;  %v7332_v56 = vld [vmem:[%s11121_s29 + $0x94] sm:$0xf]  ;;  %v6005_v46 = vld [vmem:[%s11121_s29 + $0x2d8] sm:$0xf0] }
  0xba   : > { %2223 = vmatpush.bf16.msra.mxu0 %v5768_v41  ;;  %v5824_v41 = vor.u32 %v7358_v31, %v5821_v32  ;;  %v5853_v31 = vld [vmem:[%s11121_s29 + $0x1a8] sm:$0xf0]  ;;  %v7386_v32 = vld [vmem:[%s11121_s29 + $0x244] sm:$0xf] }
  0xbb   : > { %2173 = vmatpush.bf16.msra.mxu1 %v5908_v5  ;;  %v5936_v43 = vor.u32 %v7386_v32, %v5933_v37  ;;  %v7378_v32 = vld [vmem:[%s11121_s29 + $0x204] sm:$0xf] }
  0xbc   : > { %2212 = vmatpush.bf16.msrb.mxu2 %v5680_v60  ;;  %v7354_v60 = vld [vmem:[%s11121_s29 + $0x144] sm:$0xf] }
  0xbd   : > { %2187 = vmatpush.bf16.msra.mxu3 %v5972_v6  ;;  %6049 = vmatmul.msk.bf16.vlgmr.msrb.gmra.mxu0 %vm1399_vm0, %v8388_v54  ;;  %v5808_v5 = vor.u32 %v7354_v60, %v5805_v62  ;;  %v5797_v6 = vld [vmem:[%s11121_s29 + $0x138] sm:$0xf0]  ;;  %v5848_v60 = vor.u32 %v7364_v44, %v5845_v47  ;;  %v5928_v62 = vor.u32 %v7384_v48, %v5925_v49  ;;  %v7398_v37 = vld [vmem:[%s11121_s29 + $0x2a4] sm:$0xf]  ;;  %v7529_v44 = vld [vmem:[%s11121_s29 + $0x6b4] sm:$0xf0] }
  0xbe   : > { %2224 = vmatpush.bf16.msra.mxu0 %v5760_v52  ;;  %v5648_v52 = vor.u32 %v7314_v39, %v5645_v42  ;;  %v5800_v20 = vor.u32 %v7352_v4, %v5797_v6  ;;  %v5856_v42 = vor.u32 %v7366_v26, %v5853_v31  ;;  %v5917_v4 = vld [vmem:[%s11121_s29 + $0x228] sm:$0xf0]  ;;  %v6203_v26 = vld [vmem:[%s11121_s29 + $0x6c0] sm:$0xf]  ;;  %v6339_v47 = vld [vmem:[%s11121_s29 + $0x7d0] sm:$0xf] }
  0xbf   : > { %2174 = vmatpush.bf16.msra.mxu1 %v5900_v33  ;;  %v7350_v33 = vld [vmem:[%s11121_s29 + $0x124] sm:$0xf]  ;;  %v7565_v48 = vld [vmem:[%s11121_s29 + $0x7d4] sm:$0xf0] }
  0xc0   : > { %2213 = vmatpush.bf16.msrb.mxu2 %v5672_v36  ;;  %v5952_v36 = vor.u32 %v7390_v1, %v5949_v2  ;;  %v5997_v1 = vld [vmem:[%s11121_s29 + $0x2c8] sm:$0xf0] }
  0xc1   : > { %2188 = vmatpush.bf16.msra.mxu3 %v5964_v22  ;;  %v5789_v22 = vld [vmem:[%s11121_s29 + $0x128] sm:$0xf0] }
  0xc2   : > { %2225 = vmatpush.bf16.msra.mxu0 %v5752_v3  ;;  %2175 = vmatmul.bf16.vlgmr.msra.gmra.mxu1 %v8458_v34  ;;  %v5720_v3 = vor.u32 %v7332_v56, %v5717_v57  ;;  %v7346_v56 = vld [vmem:[%s11121_s29 + $0x104] sm:$0xf]  ;;  %v5773_v57 = vld [vmem:[%s11121_s29 + $0x108] sm:$0xf0] }
  0xc3   : > { %2237 = vmatpush.bf16.msrb.mxu1 %v5832_v25  ;;  %v5864_v25 = vor.u32 %v7368_v11, %v5861_v16  ;;  %v6000_v11 = vor.u32 %v7402_v14, %v5997_v1  ;;  %v7400_v16 = vld [vmem:[%s11121_s29 + $0x2b4] sm:$0xf] }
  0xc4   : > { %2214 = vmatpush.bf16.msrb.mxu2 %v5664_v23  ;;  %2189 = vmatmul.bf16.vlgmr.msra.gmra.mxu3 %v8460_v35  ;;  %v1412_v23 = vpop.f32.mrf.mxu0 }
  0xc5   : > { %2251 = vmatpush.bf16.msrb.mxu3 %v5896_v13  ;;  %v6013_v13 = vld [vmem:[%s11121_s29 + $0x2e8] sm:$0xf0]  ;;  %v1426_v28 = vpop.f32.mrf.mxu1 }
  0xc6   : > { %2226 = vmatpush.bf16.msra.mxu0 %v5744_v21  ;;  %v6024_v21 = vor.u32 %v7408_v12, %v6021_v15  ;;  %v1427_v38 = vadd.f32 %v1426_v28, %v1412_v23  ;;  %v6016_v39 = vor.u32 %v7406_v27, %v6013_v13  ;;  %v7531_v27 = vld [vmem:[%s11121_s29 + $0x6c4] sm:$0xf0]  ;;  %v5992_v13 = vor.u32 %v7400_v16, %v5989_v17  ;;  %v6179_v16 = vld [vmem:[%s11121_s29 + $0x690] sm:$0xf]  ;;  %v7525_v17 = vld [vmem:[%s11121_s29 + $0x694] sm:$0xf0] }
  0xc7   : > { %2238 = vmatpush.bf16.msrb.mxu1 %v5824_v41  ;;  %v5781_v41 = vld [vmem:[%s11121_s29 + $0x118] sm:$0xf0] }
  0xc8   : > { %2215 = vmatpush.bf16.msrb.mxu2 %v5656_v40  ;;  %v7348_v40 = vld [vmem:[%s11121_s29 + $0x114] sm:$0xf]  ;;  %v1440_v30 = vpop.f32.mrf.mxu2 }
  0xc9   : > { %2252 = vmatpush.bf16.msrb.mxu3 %v5888_v45  ;;  %v7404_v45 = vld [vmem:[%s11121_s29 + $0x2d4] sm:$0xf]  ;;  %v9269_v50 = vadd.f32 %v1440_v30, %v1427_v38  ;;  %v5981_v38 = vld [vmem:[%s11121_s29 + $0x2a8] sm:$0xf0]  ;;  %v7549_v30 = vld [vmem:[%s11121_s29 + $0x754] sm:$0xf0] }
  0xca   : > { %2227 = vmatpush.bf16.msra.mxu0 %v5736_v29  ;;  %v5792_v29 = vor.u32 %v7350_v33, %v5789_v22  ;;  %v5909_v33 = vld [vmem:[%s11121_s29 + $0x218] sm:$0xf0]  ;;  %v7412_v22 = vld [vmem:[%s11121_s29 + $0x314] sm:$0xf] }
  0xcb   : > { %2239 = vmatpush.bf16.msrb.mxu1 %v5816_v53  ;;  %v6008_v53 = vor.u32 %v7404_v45, %v6005_v46  ;;  %v6275_v45 = vld [vmem:[%s11121_s29 + $0x750] sm:$0xf]  ;;  %v5984_v46 = vor.u32 %v7398_v37, %v5981_v38  ;;  %v7523_v37 = vld [vmem:[%s11121_s29 + $0x684] sm:$0xf0]  ;;  %v6251_v38 = vld [vmem:[%s11121_s29 + $0x720] sm:$0xf] }
  0xcc   : > { %2216 = vmatpush.bf16.msrb.mxu2 %v5648_v52  ;;  %v5784_v52 = vor.u32 %v7348_v40, %v5781_v41  ;;  %v5901_v40 = vld [vmem:[%s11121_s29 + $0x208] sm:$0xf0]  ;;  %v7410_v41 = vld [vmem:[%s11121_s29 + $0x304] sm:$0xf] }
  0xcd   : > { %2253 = vmatpush.bf16.msrb.mxu3 %v5880_v58  ;;  %v7362_v58 = vld [vmem:[%s11121_s29 + $0x184] sm:$0xf]  ;;  %v1428_v2 = vpop.f32.mrf.mxu1  ;;  %v5904_v49 = vor.u32 %v7378_v32, %v5901_v40  ;;  %v6171_v32 = vld [vmem:[%s11121_s29 + $0x680] sm:$0xf]  ;;  %v7559_v40 = vld [vmem:[%s11121_s29 + $0x7a4] sm:$0xf0] }
  0xce   : > { %2228 = vmatpush.bf16.msra.mxu0 %v5728_v51  ;;  %v9271_v51 = vpop.f32.mrf.mxu3  ;;  %v5840_v12 = vor.u32 %v7362_v58, %v5837_v0  ;;  %v6276_v58 = vor.u32 %v7549_v30, %v6275_v45  ;;  %v6267_v0 = vld [vmem:[%s11121_s29 + $0x740] sm:$0xf]  ;;  %v6387_v30 = vld [vmem:[%s11121_s29 + $0x830] sm:$0xf] }
  0xcf   : > { %2217 = vmatmul.bf16.vlgmr.msrb.gmra.mxu2 %v8291_v63  ;;  %2240 = vmatpush.bf16.msrb.mxu1 %v5808_v5  ;;  %v7414_v5 = vld [vmem:[%s11121_s29 + $0x324] sm:$0xf] }
  0xd0   : > { %2265 = vmatpush.bf16.msra.mxu2 %v5960_v59  ;;  %v1414_v59 = vpop.f32.mrf.mxu0  ;;  %v1442_v18 = vpop.f32.mrf.mxu2 }
  0xd1   : > { %2254 = vmatpush.bf16.msrb.mxu3 %v5872_v10  ;;  %v1429_v6 = vadd.f32 %v1428_v2, %v1414_v59  ;;  %v7533_v10 = vld [vmem:[%s11121_s29 + $0x6d4] sm:$0xf0]  ;;  %v6340_v59 = vor.u32 %v7565_v48, %v6339_v47  ;;  %v7547_v2 = vld [vmem:[%s11121_s29 + $0x744] sm:$0xf0] }
  0xd2   : > { %2229 = vmatpush.bf16.msra.mxu0 %v5720_v3  ;;  %v7382_v3 = vld [vmem:[%s11121_s29 + $0x224] sm:$0xf]  ;;  %v7577_v47 = vld [vmem:[%s11121_s29 + $0x834] sm:$0xf0] }
  0xd3   : > { %2241 = vmatpush.bf16.msrb.mxu1 %v5800_v20  ;;  %v5920_v15 = vor.u32 %v7382_v3, %v5917_v4  ;;  %v6212_v20 = vor.u32 %v7533_v10, %v6211_v9  ;;  %v1443_v23 = vadd.f32 %v1442_v18, %v1429_v6  ;;  %v6331_v3 = vld [vmem:[%s11121_s29 + $0x7c0] sm:$0xf]  ;;  %v7563_v4 = vld [vmem:[%s11121_s29 + $0x7c4] sm:$0xf0]  ;;  %v7394_v6 = vld [vmem:[%s11121_s29 + $0x284] sm:$0xf] }
  0xd4   : > { %2266 = vmatpush.bf16.msra.mxu2 %v5952_v36  ;;  %v5776_v36 = vor.u32 %v7346_v56, %v5773_v57  ;;  %v6259_v18 = vld [vmem:[%s11121_s29 + $0x730] sm:$0xf] }
  0xd5   : > { %2255 = vmatpush.bf16.msrb.mxu3 %v5864_v25 }
  0xd6   : > { %2230 = vmatpush.bf16.msra.mxu0 %v5712_v19  ;;  %v6048_v19 = vor.u32 %v7414_v5, %v6045_v8  ;;  %v1456_v25 = vpop.f32.mrf.mxu3  ;;  %v1455_v5 = vadd.f32 %v9271_v51, %v9269_v50  ;;  %v5965_v8 = vld [vmem:[%s11121_s29 + $0x288] sm:$0xf0]  ;;  %v7581_v50 = vld [vmem:[%s11121_s29 + $0x854] sm:$0xf0] }
  0xd7   : > { %2242 = vmatpush.bf16.msrb.mxu1 %v5792_v29  ;;  %v9333_v28 = vadd.f32 %v1456_v25, %v1443_v23  ;;  %v6180_v25 = vor.u32 %v7525_v17, %v6179_v16 }
  0xd8   : > { %2267 = vmatpush.bf16.msra.mxu2 %v5944_v24  ;;  %v6037_v24 = vld [vmem:[%s11121_s29 + $0x318] sm:$0xf0]  ;;  %v1496_v14 = vpop.f32.mrf.mxu2 }
  0xd9   : > { %2231 = vmatmul.bf16.vlgmr.msra.gmra.mxu0 %v8303_v7  ;;  %2256 = vmatpush.bf16.msrb.mxu3 %v5856_v42  ;;  %v6040_v29 = vor.u32 %v7412_v22, %v6037_v24  ;;  %v6029_v42 = vld [vmem:[%s11121_s29 + $0x308] sm:$0xf0]  ;;  %v6395_v24 = vld [vmem:[%s11121_s29 + $0x840] sm:$0xf] }
  0xda   : > { %2279 = vmatpush.bf16.msrb.mxu0 %v6024_v21  ;;  %v7380_v21 = vld [vmem:[%s11121_s29 + $0x214] sm:$0xf]  ;;  %v6032_v56 = vor.u32 %v7410_v41, %v6029_v42 }
  0xdb   : > { %2243 = vmatpush.bf16.msrb.mxu1 %v5784_v52  ;;  %v5912_v31 = vor.u32 %v7380_v21, %v5909_v33  ;;  %v7396_v52 = vld [vmem:[%s11121_s29 + $0x294] sm:$0xf]  ;;  %v6323_v21 = vld [vmem:[%s11121_s29 + $0x7b0] sm:$0xf]  ;;  %v7561_v33 = vld [vmem:[%s11121_s29 + $0x7b4] sm:$0xf0] }
  0xdc   : > { %2268 = vmatpush.bf16.msra.mxu2 %v5936_v43  ;;  %v6195_v43 = vld [vmem:[%s11121_s29 + $0x6b0] sm:$0xf] }
  0xdd   : > { %2257 = vmatpush.bf16.msrb.mxu3 %v5848_v60  ;;  %v6196_v57 = vor.u32 %v7529_v44, %v6195_v43  ;;  %v6187_v60 = vld [vmem:[%s11121_s29 + $0x6a0] sm:$0xf]  ;;  %v6172_v44 = vor.u32 %v7523_v37, %v6171_v32  ;;  %v7595_v32 = vld [vmem:[%s11121_s29 + $0x8c4] sm:$0xf0] }
  0xde   : > { %2280 = vmatpush.bf16.msrb.mxu0 %v6016_v39  ;;  %v6204_v39 = vor.u32 %v7531_v27, %v6203_v26  ;;  %v1468_v9 = vpop.f32.mrf.mxu0  ;;  %v7579_v26 = vld [vmem:[%s11121_s29 + $0x844] sm:$0xf0] }
  0xdf   : > { %2244 = vmatpush.bf16.msrb.mxu1 %v5776_v36  ;;  %v1482_v36 = vpop.f32.mrf.mxu1  ;;  %v1469_v51 = vadd.f32 %v1468_v9, %v1455_v5  ;;  %v6396_v41 = vor.u32 %v7579_v26, %v6395_v24  ;;  %v6155_v5 = vld [vmem:[%s11121_s29 + $0x660] sm:$0xf]  ;;  %v7553_v26 = vld [vmem:[%s11121_s29 + $0x774] sm:$0xf0] }
  0xe0   : > { %2269 = vmatpush.bf16.msra.mxu2 %v5928_v62  ;;  %v7527_v62 = vld [vmem:[%s11121_s29 + $0x6a4] sm:$0xf0]  ;;  %v9456_v42 = vpop.f32.mrf.mxu2 }
  0xe1   : > { %2258 = vmatpush.bf16.msrb.mxu3 %v5840_v12  ;;  %v6188_v10 = vor.u32 %v7527_v62, %v6187_v60  ;;  %v6268_v12 = vor.u32 %v7547_v2, %v6267_v0  ;;  %v1483_v22 = vadd.f32 %v1482_v36, %v1469_v51  ;;  %v6388_v62 = vor.u32 %v7577_v47, %v6387_v30  ;;  %v6299_v36 = vld [vmem:[%s11121_s29 + $0x780] sm:$0xf]  ;;  %v7597_v51 = vld [vmem:[%s11121_s29 + $0x8d4] sm:$0xf0] }
  0xe2   : > { %2281 = vmatpush.bf16.msrb.mxu0 %v6008_v53  ;;  %2245 = vmatmul.bf16.vlgmr.msrb.gmra.mxu1 %v8284_v55  ;;  %v5973_v53 = vld [vmem:[%s11121_s29 + $0x298] sm:$0xf0] }
  0xe3   : > { %2298 = vmatpush.bf16.msra.mxu1 %v6048_v19  ;;  %v5976_v1 = vor.u32 %v7396_v52, %v5973_v53  ;;  %v5968_v19 = vor.u32 %v7394_v6, %v5965_v8  ;;  %v9436_v27 = vadd.f32 %v1496_v14, %v1483_v22  ;;  %v7521_v53 = vld [vmem:[%s11121_s29 + $0x674] sm:$0xf0]  ;;  %v6379_v14 = vld [vmem:[%s11121_s29 + $0x820] sm:$0xf]  ;;  %v7519_v6 = vld [vmem:[%s11121_s29 + $0x664] sm:$0xf0] }
  0xe4   : > { %2270 = vmatpush.bf16.msra.mxu2 %v5920_v15  ;;  %2259 = vmatmul.bf16.vlgmr.msrb.gmra.mxu3 %v8289_v61  ;;  %v6332_v15 = vor.u32 %v7563_v4, %v6331_v3  ;;  %v6235_v8 = vld [vmem:[%s11121_s29 + $0x700] sm:$0xf]  ;;  %v6156_v17 = vor.u32 %v7519_v6, %v6155_v5  ;;  %v2435_v6 = vrot.slane %v8303_v7, 1  ;;  %v7611_v7 = vld [vmem:[%s11121_s29 + $0x944] sm:$0xf0] }
  0xe5   : > { %2972 = vmatpush.bf16.msra.mxu3 %v6212_v20  ;;  %v7545_v20 = vld [vmem:[%s11121_s29 + $0x734] sm:$0xf0] }
  0xe6   : > { %2282 = vmatpush.bf16.msrb.mxu0 %v6000_v11  ;;  %v6403_v11 = vld [vmem:[%s11121_s29 + $0x850] sm:$0xf]  ;;  %v1470_v43 = vpop.f32.mrf.mxu0 }
  0xe7   : > { %2299 = vmatpush.bf16.msra.mxu1 %v6040_v29  ;;  %v6404_v23 = vor.u32 %v7581_v50, %v6403_v11  ;;  %v7543_v29 = vld [vmem:[%s11121_s29 + $0x724] sm:$0xf0]  ;;  %v1484_v45 = vpop.f32.mrf.mxu1  ;;  %v1471_v48 = vadd.f32 %v1470_v43, %v9333_v28  ;;  %v7541_v28 = vld [vmem:[%s11121_s29 + $0x714] sm:$0xf0]  ;;  %v9504_v9 = vpop.f32.mrf.mxu3  ;;  %v6467_v50 = vld [vmem:[%s11121_s29 + $0x8d0] sm:$0xf] }
  0xe8   : > { %2271 = vmatpush.bf16.msra.mxu2 %v5912_v31  ;;  %v6324_v31 = vor.u32 %v7561_v33, %v6323_v21  ;;  %v7555_v11 = vld [vmem:[%s11121_s29 + $0x784] sm:$0xf0]  ;;  %v6468_v24 = vor.u32 %v7597_v51, %v6467_v50  ;;  %v6443_v50 = vld [vmem:[%s11121_s29 + $0x8a0] sm:$0xf] }
  0xe9   : > { %2973 = vmatpush.bf16.msra.mxu3 %v6204_v39  ;;  %v6315_v39 = vld [vmem:[%s11121_s29 + $0x7a0] sm:$0xf]  ;;  %v9487_v60 = vadd.f32 %v1484_v45, %v1471_v48  ;;  %v6300_v22 = vor.u32 %v7555_v11, %v6299_v36  ;;  %v7591_v51 = vld [vmem:[%s11121_s29 + $0x8a4] sm:$0xf0] }
  0xea   : > { %2283 = vmatpush.bf16.msrb.mxu0 %v5992_v13  ;;  %v6260_v13 = vor.u32 %v7545_v20, %v6259_v18  ;;  %v6316_v52 = vor.u32 %v7559_v40, %v6315_v39  ;;  %v6371_v18 = vld [vmem:[%s11121_s29 + $0x810] sm:$0xf]  ;;  %v2432_v20 = vrot.slane %v8291_v63, 1  ;;  %v617_v63 = vld [vmem:[%s8270_s0 + $0x80] sm:$0x1] }
  0xeb   : > { %2300 = vmatpush.bf16.msra.mxu1 %v6032_v56  ;;  %v6243_v56 = vld [vmem:[%s11121_s29 + $0x710] sm:$0xf]  ;;  %v6363_v40 = vld [vmem:[%s11121_s29 + $0x800] sm:$0xf]  ;;  %v2309_v30 = vpack.c.bf16 %v617_v63, %v617_v63 }
  0xec   : > { %2272 = vmatpush.bf16.msra.mxu2 %v5904_v49  ;;  %v6252_v49 = vor.u32 %v7543_v29, %v6251_v38  ;;  %v6244_v3 = vor.u32 %v7541_v28, %v6243_v56  ;;  %v6219_v29 = vld [vmem:[%s11121_s29 + $0x6e0] sm:$0xf]  ;;  %v7613_v28 = vld [vmem:[%s11121_s29 + $0x954] sm:$0xf0] }
  0xed   : > { %2974 = vmatpush.bf16.msra.mxu3 %v6196_v57  ;;  %v615_v57 = vld [vmem:[%s8270_s0 + $0x70] sm:$0x1]  ;;  %v6283_v45 = vld [vmem:[%s11121_s29 + $0x760] sm:$0xf]  ;;  %v2439_v5 = vrot.slane %v2309_v30, 1 }
  0xee   : > { %2284 = vmatpush.bf16.msrb.mxu0 %v5984_v46  ;;  %v6163_v46 = vld [vmem:[%s11121_s29 + $0x670] sm:$0xf]  ;;  %v2307_v2 = vpack.c.bf16 %v615_v57, %v615_v57 }
  0xef   : > { %2986 = vmatpush.bf16.msrb.mxu1 %v6276_v58  ;;  %2273 = vmatmul.bf16.vlgmr.msra.gmra.mxu2 %v8458_v34  ;;  %v6307_v58 = vld [vmem:[%s11121_s29 + $0x790] sm:$0xf]  ;;  %v6164_v0 = vor.u32 %v7521_v53, %v6163_v46  ;;  %v7551_v46 = vld [vmem:[%s11121_s29 + $0x764] sm:$0xf0]  ;;  %v1512_v53 = vpop.f32.mrf.mxu3 }
  0xf0   : > { %3000 = vmatpush.bf16.msrb.mxu2 %v6340_v59  ;;  %v7557_v59 = vld [vmem:[%s11121_s29 + $0x794] sm:$0xf0]  ;;  %v2433_v21 = vrot.slane %v2307_v2, 1  ;;  %v6531_v57 = vld [vmem:[%s11121_s29 + $0x950] sm:$0xf] }
  0xf1   : > { %2975 = vmatpush.bf16.msra.mxu3 %v6188_v10  ;;  %v6308_v4 = vor.u32 %v7557_v59, %v6307_v58  ;;  %v7539_v10 = vld [vmem:[%s11121_s29 + $0x704] sm:$0xf0]  ;;  %v6555_v58 = vld [vmem:[%s11121_s29 + $0x980] sm:$0xf]  ;;  %v7569_v2 = vld [vmem:[%s11121_s29 + $0x7f4] sm:$0xf0]  ;;  %v6532_v11 = vor.u32 %v7613_v28, %v6531_v57 }
  0xf2   : > { %2285 = vmatpush.bf16.msrb.mxu0 %v5976_v1  ;;  %6050 = vmatmul.msk.bf16.vlgmr.msra.gmra.mxu1 %vm1399_vm0, %v8388_v54  ;;  %v7575_v1 = vld [vmem:[%s11121_s29 + $0x824] sm:$0xf0]  ;;  %v9524_v16 = vpop.f32.mrf.mxu2  ;;  %v6236_v33 = vor.u32 %v7539_v10, %v6235_v8  ;;  %v9554_v39 = vsel %vm2431_vm1, %v2432_v20, %v2433_v21  ;;  %v6507_v28 = vld [vmem:[%s11121_s29 + $0x920] sm:$0xf] }
  0xf3   : > { %2987 = vmatpush.bf16.msrb.mxu1 %v6268_v12  ;;  %v6380_v12 = vor.u32 %v7575_v1, %v6379_v14  ;;  %v7619_v14 = vld [vmem:[%s11121_s29 + $0x984] sm:$0xf0]  ;;  %v6355_v1 = vld [vmem:[%s11121_s29 + $0x7f0] sm:$0xf] }
  0xf4   : > { %3001 = vmatpush.bf16.msrb.mxu2 %v6332_v15  ;;  %v6227_v15 = vld [vmem:[%s11121_s29 + $0x6f0] sm:$0xf]  ;;  %v618_v10 = vld [vmem:[%s8270_s0 + $0x88] sm:$0x1] }
  0xf5   : > { %2976 = vmatpush.bf16.msra.mxu3 %v6180_v25  ;;  %v6291_v25 = vld [vmem:[%s11121_s29 + $0x770] sm:$0xf]  ;;  %v7567_v20 = vld [vmem:[%s11121_s29 + $0x7e4] sm:$0xf0]  ;;  %v2310_v21 = vpack.c.bf16 %v618_v10, %v618_v10  ;;  %v6197_v10 = vld [vmem:[%s11121_s29 + $0x6b8] sm:$0xf0] }
  0xf6   : > { %2286 = vmatpush.bf16.msrb.mxu0 %v5968_v19  ;;  %v7573_v19 = vld [vmem:[%s11121_s29 + $0x814] sm:$0xf0]  ;;  %v6292_v43 = vor.u32 %v7553_v26, %v6291_v25  ;;  %v7532_v25 = vld [vmem:[%s11121_s29 + $0x6d4] sm:$0xf]  ;;  %v6444_v26 = vor.u32 %v7591_v51, %v6443_v50  ;;  %v6419_v50 = vld [vmem:[%s11121_s29 + $0x870] sm:$0xf] }
  0xf7   : > { %2988 = vmatpush.bf16.msrb.mxu1 %v6260_v13  ;;  %v616_v13 = vld [vmem:[%s8270_s0 + $0x78] sm:$0x1]  ;;  %v6372_v37 = vor.u32 %v7573_v19, %v6371_v18  ;;  %v6347_v19 = vld [vmem:[%s11121_s29 + $0x7e0] sm:$0xf]  ;;  %v2442_v30 = vrot.slane %v2310_v21, 1 }
  0xf8   : > { %3002 = vmatpush.bf16.msrb.mxu2 %v6324_v31  ;;  %v6459_v31 = vld [vmem:[%s11121_s29 + $0x8c0] sm:$0xf]  ;;  %v2308_v47 = vpack.c.bf16 %v616_v13, %v616_v13  ;;  %v7617_v18 = vld [vmem:[%s11121_s29 + $0x974] sm:$0xf0]  ;;  %v6435_v13 = vld [vmem:[%s11121_s29 + $0x890] sm:$0xf] }
  0xf9   : > { %2287 = vmatmul.bf16.vlgmr.msrb.gmra.mxu0 %v8460_v35  ;;  %2977 = vmatpush.bf16.msra.mxu3 %v6172_v44  ;;  %v7535_v44 = vld [vmem:[%s11121_s29 + $0x6e4] sm:$0xf0]  ;;  %v6460_v48 = vor.u32 %v7595_v32, %v6459_v31  ;;  %v7589_v31 = vld [vmem:[%s11121_s29 + $0x894] sm:$0xf0] }
  0xfa   : > { %3014 = vmatpush.bf16.msra.mxu0 %v6404_v23  ;;  %v7537_v23 = vld [vmem:[%s11121_s29 + $0x6f4] sm:$0xf0]  ;;  %v1526_v59 = vpop.f32.mrf.mxu2  ;;  %v2436_v8 = vrot.slane %v2308_v47, 1  ;;  %v6277_v47 = vld [vmem:[%s11121_s29 + $0x758] sm:$0xf0] }
  0xfb   : > { %2989 = vmatpush.bf16.msrb.mxu1 %v6252_v49  ;;  %v6228_v38 = vor.u32 %v7537_v23, %v6227_v15  ;;  %v6451_v49 = vld [vmem:[%s11121_s29 + $0x8b0] sm:$0xf]  ;;  %v6356_v15 = vor.u32 %v7569_v2, %v6355_v1  ;;  %v7546_v2 = vld [vmem:[%s11121_s29 + $0x744] sm:$0xf]  ;;  %v7585_v51 = vld [vmem:[%s11121_s29 + $0x874] sm:$0xf0] }
  0xfc   : > { %3003 = vmatpush.bf16.msrb.mxu2 %v6316_v52  ;;  %v7593_v52 = vld [vmem:[%s11121_s29 + $0x8b4] sm:$0xf0]  ;;  %v9631_v23 = vsel %vm2431_vm1, %v2435_v6, %v2436_v8  ;;  %v6269_v6 = vld [vmem:[%s11121_s29 + $0x748] sm:$0xf0]  ;;  %v7528_v8 = vld [vmem:[%s11121_s29 + $0x6b4] sm:$0xf]  ;;  %v6420_v21 = vor.u32 %v7585_v51, %v6419_v50 }
  0xfd   : > { %2978 = vmatpush.bf16.msra.mxu3 %v6164_v0  ;;  %v6284_v0 = vor.u32 %v7551_v46, %v6283_v45  ;;  %v6452_v36 = vor.u32 %v7593_v52, %v6451_v49  ;;  %v7548_v45 = vld [vmem:[%s11121_s29 + $0x754] sm:$0xf]  ;;  %v2441_v46 = vrot.slane %v8289_v61, 1  ;;  %v6205_v49 = vld [vmem:[%s11121_s29 + $0x6c8] sm:$0xf0]  ;;  %v6436_v52 = vor.u32 %v7589_v31, %v6435_v13 }
  0xfe   : > { %3015 = vmatpush.bf16.msra.mxu0 %v6396_v41  ;;  %v7571_v41 = vld [vmem:[%s11121_s29 + $0x804] sm:$0xf0]  ;;  %v6427_v61 = vld [vmem:[%s11121_s29 + $0x880] sm:$0xf]  ;;  %v6173_v50 = vld [vmem:[%s11121_s29 + $0x688] sm:$0xf0] }
  0xff   : > { %2990 = vmatpush.bf16.msrb.mxu1 %v6244_v3  ;;  %v6364_v56 = vor.u32 %v7571_v41, %v6363_v40  ;;  %v9596_v3 = vadd.f32 %v1526_v59, %v1512_v53  ;;  %v7609_v40 = vld [vmem:[%s11121_s29 + $0x934] sm:$0xf0]  ;;  %v6539_v41 = vld [vmem:[%s11121_s29 + $0x960] sm:$0xf]  ;;  %v7583_v31 = vld [vmem:[%s11121_s29 + $0x864] sm:$0xf0] }
 0x100   : > { %3004 = vmatpush.bf16.msrb.mxu2 %v6308_v4  ;;  %v2438_v4 = vrot.slane %v8284_v55, 1  ;;  %v6523_v55 = vld [vmem:[%s11121_s29 + $0x940] sm:$0xf] }
 0x101   : > { %2979 = vmatpush.bf16.msra.mxu3 %v6156_v17  ;;  %v6547_v17 = vld [vmem:[%s11121_s29 + $0x970] sm:$0xf]  ;;  %v6524_v63 = vor.u32 %v7611_v7, %v6523_v55  ;;  %v621_v59 = vld [vmem:[%s8270_s0 + $0xa0] sm:$0x1] }
 0x102   : > { %3016 = vmatpush.bf16.msra.mxu0 %v6388_v62  ;;  %v6220_v62 = vor.u32 %v7535_v44, %v6219_v29  ;;  %v6548_v32 = vor.u32 %v7617_v18, %v6547_v17  ;;  %v6515_v29 = vld [vmem:[%s11121_s29 + $0x930] sm:$0xf]  ;;  %v6272_v17 = vor.u32 %v7546_v2, %v6269_v6  ;;  %v6411_v13 = vld [vmem:[%s11121_s29 + $0x860] sm:$0xf]  ;;  %v7601_v2 = vld [vmem:[%s11121_s29 + $0x8f4] sm:$0xf0] }
 0x103   : > { %2991 = vmatpush.bf16.msrb.mxu1 %v6236_v33  ;;  %v9626_v33 = vsel %vm2431_vm1, %v2438_v4, %v2439_v5  ;;  %v6516_v53 = vor.u32 %v7609_v40, %v6515_v29  ;;  %v6499_v55 = vld [vmem:[%s11121_s29 + $0x910] sm:$0xf]  ;;  %v6491_v40 = vld [vmem:[%s11121_s29 + $0x900] sm:$0xf]  ;;  %v6333_v6 = vld [vmem:[%s11121_s29 + $0x7c8] sm:$0xf0] }
 0x104   : > { %3005 = vmatpush.bf16.msrb.mxu2 %v6300_v22  ;;  %2980 = vmatmul.bf16.vlgmr.msra.gmra.mxu3 %v9554_v39  ;;  %v9628_v22 = vpop.f32.mrf.mxu0  ;;  %v619_v7 = vld [vmem:[%s8270_s0 + $0x90] sm:$0x1] }
 0x105   : > { %3028 = vmatpush.bf16.msrb.mxu3 %v6468_v24  ;;  %v6213_v24 = vld [vmem:[%s11121_s29 + $0x6d8] sm:$0xf0] }
 0x106   : > { %3017 = vmatpush.bf16.msra.mxu0 %v6380_v12  ;;  %v6556_v12 = vor.u32 %v7619_v14, %v6555_v58  ;;  %v6216_v44 = vor.u32 %v7532_v25, %v6213_v24  ;;  %v7607_v58 = vld [vmem:[%s11121_s29 + $0x924] sm:$0xf0]  ;;  %v9690_v14 = vsel %vm2431_vm1, %v2441_v46, %v2442_v30  ;;  %v6261_v25 = vld [vmem:[%s11121_s29 + $0x738] sm:$0xf0]  ;;  %v7526_v24 = vld [vmem:[%s11121_s29 + $0x6a4] sm:$0xf] }
 0x107   : > { %2992 = vmatpush.bf16.msrb.mxu1 %v6228_v38  ;;  %v6348_v38 = vor.u32 %v7567_v20, %v6347_v19  ;;  %v6200_v19 = vor.u32 %v7528_v8, %v6197_v10  ;;  %v7544_v20 = vld [vmem:[%s11121_s29 + $0x734] sm:$0xf]  ;;  %v7542_v30 = vld [vmem:[%s11121_s29 + $0x724] sm:$0xf] }
 0x108   : > { %3006 = vmatpush.bf16.msrb.mxu2 %v6292_v43  ;;  %v7615_v43 = vld [vmem:[%s11121_s29 + $0x964] sm:$0xf0]  ;;  %v7540_v10 = vld [vmem:[%s11121_s29 + $0x714] sm:$0xf] }
 0x109   : > { %3029 = vmatpush.bf16.msrb.mxu3 %v6460_v48  ;;  %v7530_v48 = vld [vmem:[%s11121_s29 + $0x6c4] sm:$0xf]  ;;  %v6540_v57 = vor.u32 %v7615_v43, %v6539_v41  ;;  %v7603_v41 = vld [vmem:[%s11121_s29 + $0x904] sm:$0xf0] }
 0x10a   : > { %3018 = vmatpush.bf16.msra.mxu0 %v6372_v37  ;;  %v9645_v37 = vpop.f32.mrf.mxu1  ;;  %v6208_v1 = vor.u32 %v7530_v48, %v6205_v49  ;;  %v6412_v49 = vor.u32 %v7583_v31, %v6411_v13  ;;  %v7520_v13 = vld [vmem:[%s11121_s29 + $0x674] sm:$0xf]  ;;  %v6165_v31 = vld [vmem:[%s11121_s29 + $0x678] sm:$0xf0] }
 0x10b   : > { %2993 = vmatpush.bf16.msrb.mxu1 %v6220_v62  ;;  %v9687_v62 = vpop.f32.mrf.mxu3 }
 0x10c   : > { %3007 = vmatpush.bf16.msrb.mxu2 %v6284_v0  ;;  %v6280_v0 = vor.u32 %v7548_v45, %v6277_v47  ;;  %v1540_v4 = vpop.f32.mrf.mxu0  ;;  %v7564_v45 = vld [vmem:[%s11121_s29 + $0x7d4] sm:$0xf] }
 0x10d   : > { %3030 = vmatpush.bf16.msrb.mxu3 %v6452_v36  ;;  %v1541_v36 = vadd.f32 %v1540_v4, %v9596_v3  ;;  %v7605_v3 = vld [vmem:[%s11121_s29 + $0x914] sm:$0xf0] }
 0x10e   : > { %3019 = vmatpush.bf16.msra.mxu0 %v6364_v56  ;;  %2994 = vmatmul.bf16.vlgmr.msrb.gmra.mxu1 %v9631_v23  ;;  %v7587_v56 = vld [vmem:[%s11121_s29 + $0x884] sm:$0xf0]  ;;  %v620_v4 = vld [vmem:[%s8270_s0 + $0x98] sm:$0x1]  ;;  %s11125_s0 = sld [smem:[#allocation15_spill]] }
 0x10f   : > { %3042 = vmatpush.bf16.msra.mxu1 %v6532_v11  ;;  %3008 = vmatmul.bf16.vlgmr.msrb.gmra.mxu2 %v9626_v33  ;;  %v6428_v5 = vor.u32 %v7587_v56, %v6427_v61  ;;  %v6508_v11 = vor.u32 %v7607_v58, %v6507_v28  ;;  %v6181_v61 = vld [vmem:[%s11121_s29 + $0x698] sm:$0xf0]  ;;  %v2444_v28 = vrot.slane %v8458_v34, 1  ;;  %v7562_v34 = vld [vmem:[%s11121_s29 + $0x7c4] sm:$0xf] }
 0x110   : > { %3061 = vmatpush.bf16.msra.mxu2 %v6556_v12  ;;  %v2313_v12 = vpack.c.bf16 %v621_v59, %v621_v59 }
 0x111   : > { %3031 = vmatpush.bf16.msrb.mxu3 %v6444_v26  ;;  %v6189_v26 = vld [vmem:[%s11121_s29 + $0x6a8] sm:$0xf0] }
 0x112   : > { %3020 = vmatpush.bf16.msra.mxu0 %v6356_v15  ;;  %v1554_v15 = vpop.f32.mrf.mxu1  ;;  %v2451_v29 = vrot.slane %v2313_v12, 1  ;;  %v6192_v46 = vor.u32 %v7526_v24, %v6189_v26  ;;  %v9753_v48 = vpop.f32.mrf.mxu2  ;;  %v6405_v24 = vld [vmem:[%s11121_s29 + $0x858] sm:$0xf0] }
 0x113   : > { %3043 = vmatpush.bf16.msra.mxu1 %v6524_v63  ;;  %v1555_v18 = vadd.f32 %v1554_v15, %v1541_v36  ;;  %v6500_v63 = vor.u32 %v7605_v3, %v6499_v55  ;;  %v1568_v43 = vpop.f32.mrf.mxu3  ;;  %v6245_v36 = vld [vmem:[%s11121_s29 + $0x718] sm:$0xf0]  ;;  %v6475_v15 = vld [vmem:[%s11121_s29 + $0x8e0] sm:$0xf]  ;;  %v2312_v55 = vpack.c.bf16 %v620_v4, %v620_v4  ;;  %v6336_v3 = vor.u32 %v7562_v34, %v6333_v6 }
 0x114   : > { %3062 = vmatpush.bf16.msra.mxu2 %v6548_v32  ;;  %v2311_v32 = vpack.c.bf16 %v619_v7, %v619_v7  ;;  %v9764_v56 = vpop.f32.mrf.mxu0  ;;  %v7599_v7 = vld [vmem:[%s11121_s29 + $0x8e4] sm:$0xf0]  ;;  %v6309_v6 = vld [vmem:[%s11121_s29 + $0x798] sm:$0xf0] }
 0x115   : > { %3032 = vmatpush.bf16.msrb.mxu3 %v6436_v52  ;;  %v1569_v47 = vadd.f32 %v1568_v43, %v1555_v18  ;;  %v6253_v52 = vld [vmem:[%s11121_s29 + $0x728] sm:$0xf0]  ;;  %v6325_v18 = vld [vmem:[%s11121_s29 + $0x7b8] sm:$0xf0] }
 0x116   : > { %3021 = vmatpush.bf16.msra.mxu0 %v6348_v38  ;;  %v2450_v38 = vrot.slane %v8388_v54, 1  ;;  %v6341_v54 = vld [vmem:[%s11121_s29 + $0x7d8] sm:$0xf0]  ;;  %v2445_v58 = vrot.slane %v2311_v32, 1 }
 0x117   : > { %3044 = vmatpush.bf16.msra.mxu1 %v6516_v53  ;;  %v7524_v53 = vld [vmem:[%s11121_s29 + $0x694] sm:$0xf] }
 0x118   : > { %3063 = vmatpush.bf16.msra.mxu2 %v6540_v57  ;;  %v6492_v57 = vor.u32 %v7603_v41, %v6491_v40  ;;  %v9768_v59 = vsel %vm2431_vm1, %v2450_v38, %v2451_v29  ;;  %v6184_v8 = vor.u32 %v7524_v53, %v6181_v61  ;;  %v9798_v51 = vsel %vm2431_vm1, %v2444_v28, %v2445_v58  ;;  %v6229_v53 = vld [vmem:[%s11121_s29 + $0x6f8] sm:$0xf0]  ;;  %v7518_v61 = vld [vmem:[%s11121_s29 + $0x664] sm:$0xf]  ;;  %v7596_v58 = vld [vmem:[%s11121_s29 + $0x8d4] sm:$0xf] }
 0x119   : > { %3022 = vmatmul.bf16.vlgmr.msra.gmra.mxu0 %v9690_v14  ;;  %3033 = vmatpush.bf16.msrb.mxu3 %v6428_v5  ;;  %v6256_v5 = vor.u32 %v7542_v30, %v6253_v52  ;;  %v6476_v29 = vor.u32 %v7599_v7, %v6475_v15  ;;  %v2447_v40 = vrot.slane %v8460_v35, 1  ;;  %v2448_v41 = vrot.slane %v2312_v55, 1  ;;  %v7536_v35 = vld [vmem:[%s11121_s29 + $0x6f4] sm:$0xf]  ;;  %v6397_v52 = vld [vmem:[%s11121_s29 + $0x848] sm:$0xf0] }
 0x11a   : > { %3070 = vmatpush.bf16.msrb.mxu0 %v6216_v44  ;;  %v6264_v44 = vor.u32 %v7544_v20, %v6261_v25  ;;  %v7580_v25 = vld [vmem:[%s11121_s29 + $0x854] sm:$0xf]  ;;  %v1582_v26 = vpop.f32.mrf.mxu2  ;;  %v6232_v34 = vor.u32 %v7536_v35, %v6229_v53  ;;  %v6533_v55 = vld [vmem:[%s11121_s29 + $0x958] sm:$0xf0]  ;;  %v6461_v7 = vld [vmem:[%s11121_s29 + $0x8c8] sm:$0xf0] }
 0x11b   : > { %3045 = vmatpush.bf16.msra.mxu1 %v6508_v11  ;;  %v7522_v11 = vld [vmem:[%s11121_s29 + $0x684] sm:$0xf]  ;;  %v1583_v32 = vadd.f32 %v1582_v26, %v1569_v47  ;;  %v6168_v47 = vor.u32 %v7520_v13, %v6165_v31  ;;  %v9859_v28 = vsel %vm2431_vm1, %v2447_v40, %v2448_v41  ;;  %v7612_v15 = vld [vmem:[%s11121_s29 + $0x954] sm:$0xf]  ;;  %v1499_v31 = vadd.f32 %v9456_v42, %v9487_v60 }
 0x11c   : > { %3084 = vmatpush.bf16.msrb.mxu2 %v6280_v0  ;;  %v6344_v0 = vor.u32 %v7564_v45, %v6341_v54  ;;  %v6176_v20 = vor.u32 %v7522_v11, %v6173_v50  ;;  %v1596_v38 = vpop.f32.mrf.mxu0  ;;  %v7558_v45 = vld [vmem:[%s11121_s29 + $0x7a4] sm:$0xf]  ;;  %v6317_v54 = vld [vmem:[%s11121_s29 + $0x7a8] sm:$0xf0]  ;;  %v6536_v26 = vor.u32 %v7612_v15, %v6533_v55  ;;  %v7552_v42 = vld [vmem:[%s11121_s29 + $0x774] sm:$0xf] }
 0x11d   : > { %3034 = vmatpush.bf16.msrb.mxu3 %v6420_v21  ;;  %v7538_v21 = vld [vmem:[%s11121_s29 + $0x704] sm:$0xf]  ;;  %v6221_v50 = vld [vmem:[%s11121_s29 + $0x6e8] sm:$0xf0]  ;;  %v7568_v15 = vld [vmem:[%s11121_s29 + $0x7f4] sm:$0xf] }
 0x11e   : > { %3071 = vmatpush.bf16.msrb.mxu0 %v6208_v1  ;;  %v6483_v1 = vld [vmem:[%s11121_s29 + $0x8f0] sm:$0xf]  ;;  %v7534_v11 = vld [vmem:[%s11121_s29 + $0x6e4] sm:$0xf]  ;;  %v6357_v55 = vld [vmem:[%s11121_s29 + $0x7f8] sm:$0xf0] }
 0x11f   : > { %3046 = vmatpush.bf16.msra.mxu1 %v6500_v63  ;;  %6561 = vmatmul.msk.bf16.vlgmr.msra.gmra.mxu2 %vm1399_vm0, %v9768_v59  ;;  %v6484_v12 = vor.u32 %v7601_v2, %v6483_v1  ;;  %v6237_v63 = vld [vmem:[%s11121_s29 + $0x708] sm:$0xf0]  ;;  %v9867_v1 = vpop.f32.mrf.mxu1  ;;  %v6320_v2 = vor.u32 %v7558_v45, %v6317_v54  ;;  %v7610_v13 = vld [vmem:[%s11121_s29 + $0x944] sm:$0xf]  ;;  %v6293_v45 = vld [vmem:[%s11121_s29 + $0x778] sm:$0xf0] }
 0x120   : > { %3085 = vmatpush.bf16.msrb.mxu2 %v6272_v17  ;;  %v7560_v17 = vld [vmem:[%s11121_s29 + $0x7b4] sm:$0xf]  ;;  %v6240_v30 = vor.u32 %v7538_v21, %v6237_v63  ;;  %v6301_v21 = vld [vmem:[%s11121_s29 + $0x788] sm:$0xf0]  ;;  %v7590_v53 = vld [vmem:[%s11121_s29 + $0x8a4] sm:$0xf] }
 0x121   : > { %3035 = vmatpush.bf16.msrb.mxu3 %v6412_v49  ;;  %v6328_v43 = vor.u32 %v7560_v17, %v6325_v18  ;;  %v7578_v49 = vld [vmem:[%s11121_s29 + $0x844] sm:$0xf]  ;;  %v7572_v54 = vld [vmem:[%s11121_s29 + $0x814] sm:$0xf] }
 0x122   : > { %3072 = vmatpush.bf16.msrb.mxu0 %v6200_v19  ;;  %v6248_v19 = vor.u32 %v7540_v10, %v6245_v36  ;;  %v6400_v4 = vor.u32 %v7578_v49, %v6397_v52  ;;  %v7576_v10 = vld [vmem:[%s11121_s29 + $0x834] sm:$0xf]  ;;  %v6389_v36 = vld [vmem:[%s11121_s29 + $0x838] sm:$0xf0] }
 0x123   : > { %3047 = vmatpush.bf16.msra.mxu1 %v6492_v57  ;;  %v6157_v57 = vld [vmem:[%s11121_s29 + $0x668] sm:$0xf0]  ;;  %v6392_v18 = vor.u32 %v7576_v10, %v6389_v36  ;;  %v7608_v49 = vld [vmem:[%s11121_s29 + $0x934] sm:$0xf]  ;;  %v6517_v52 = vld [vmem:[%s11121_s29 + $0x938] sm:$0xf0] }
 0x124   : > { %3086 = vmatpush.bf16.msrb.mxu2 %v6264_v44  ;;  %3036 = vmatmul.bf16.vlgmr.msrb.gmra.mxu3 %v9798_v51  ;;  %v6408_v44 = vor.u32 %v7580_v25, %v6405_v24  ;;  %v7574_v25 = vld [vmem:[%s11121_s29 + $0x824] sm:$0xf]  ;;  %v6381_v24 = vld [vmem:[%s11121_s29 + $0x828] sm:$0xf0]  ;;  %v7588_v36 = vld [vmem:[%s11121_s29 + $0x894] sm:$0xf] }
 0x125   : > { %3098 = vmatpush.bf16.msra.mxu3 %v6344_v0  ;;  %v6469_v0 = vld [vmem:[%s11121_s29 + $0x8d8] sm:$0xf0]  ;;  %v6509_v10 = vld [vmem:[%s11121_s29 + $0x928] sm:$0xf0] }
 0x126   : > { %3073 = vmatpush.bf16.msrb.mxu0 %v6192_v46  ;;  %v9838_v46 = vadd.f32 %v1596_v38, %v1583_v32  ;;  %v6525_v32 = vld [vmem:[%s11121_s29 + $0x948] sm:$0xf0]  ;;  %v7592_v38 = vld [vmem:[%s11121_s29 + $0x8b4] sm:$0xf] }
 0x127   : > { %3048 = vmatpush.bf16.msra.mxu1 %v6484_v12  ;;  %v6472_v12 = vor.u32 %v7596_v58, %v6469_v0  ;;  %v2122_v40 = vpop.f32.mrf.mxu1  ;;  %v7550_v58 = vld [vmem:[%s11121_s29 + $0x764] sm:$0xf]  ;;  %v6285_v0 = vld [vmem:[%s11121_s29 + $0x768] sm:$0xf0] }
 0x128   : > { %3087 = vmatpush.bf16.msrb.mxu2 %v6256_v5  ;;  %v7556_v5 = vld [vmem:[%s11121_s29 + $0x794] sm:$0xf]  ;;  %v9931_v60 = vadd.f32 %v2122_v40, %v1499_v31  ;;  %v6349_v31 = vld [vmem:[%s11121_s29 + $0x7e8] sm:$0xf0]  ;;  %v7602_v40 = vld [vmem:[%s11121_s29 + $0x904] sm:$0xf] }
 0x129   : > { %3099 = vmatpush.bf16.msra.mxu3 %v6336_v3  ;;  %v7594_v3 = vld [vmem:[%s11121_s29 + $0x8c4] sm:$0xf]  ;;  %v6312_v17 = vor.u32 %v7556_v5, %v6309_v6  ;;  %v6520_v5 = vor.u32 %v7608_v49, %v6517_v52  ;;  %v7600_v52 = vld [vmem:[%s11121_s29 + $0x8f4] sm:$0xf] }
 0x12a   : > { %3074 = vmatpush.bf16.msrb.mxu0 %v6184_v8  ;;  %v6160_v8 = vor.u32 %v7518_v61, %v6157_v57  ;;  %v6464_v63 = vor.u32 %v7594_v3, %v6461_v7  ;;  %v9926_v41 = vpop.f32.mrf.mxu0  ;;  %v6296_v61 = vor.u32 %v7552_v42, %v6293_v45  ;;  %v7618_v6 = vld [vmem:[%s11121_s29 + $0x984] sm:$0xf]  ;;  %v6493_v42 = vld [vmem:[%s11121_s29 + $0x908] sm:$0xf0]  ;;  %v7584_v45 = vld [vmem:[%s11121_s29 + $0x874] sm:$0xf] }
 0x12b   : > { %3049 = vmatpush.bf16.msra.mxu1 %v6476_v29  ;;  %v6453_v29 = vld [vmem:[%s11121_s29 + $0x8b8] sm:$0xf0] }
 0x12c   : > { %3088 = vmatpush.bf16.msrb.mxu2 %v6248_v19  ;;  %v7554_v19 = vld [vmem:[%s11121_s29 + $0x784] sm:$0xf]  ;;  %v6456_v35 = vor.u32 %v7592_v38, %v6453_v29 }
 0x12d   : > { %3100 = vmatpush.bf16.msra.mxu3 %v6328_v43  ;;  %v6304_v43 = vor.u32 %v7554_v19, %v6301_v21  ;;  %v7604_v19 = vld [vmem:[%s11121_s29 + $0x914] sm:$0xf]  ;;  %v6549_v21 = vld [vmem:[%s11121_s29 + $0x978] sm:$0xf0] }
 0x12e   : > { %3075 = vmatpush.bf16.msrb.mxu0 %v6176_v20  ;;  %3050 = vmatmul.bf16.vlgmr.msra.gmra.mxu1 %v9859_v28  ;;  %v6224_v20 = vor.u32 %v7534_v11, %v6221_v50  ;;  %v6437_v11 = vld [vmem:[%s11121_s29 + $0x898] sm:$0xf0]  ;;  %v6288_v50 = vor.u32 %v7550_v58, %v6285_v0  ;;  %v2134_v58 = vpop.f32.mrf.mxu3 }
 0x12f   : > { %3112 = vmatpush.bf16.msrb.mxu1 %v6408_v44  ;;  %v6384_v44 = vor.u32 %v7574_v25, %v6381_v24  ;;  %v6501_v25 = vld [vmem:[%s11121_s29 + $0x918] sm:$0xf0]  ;;  %v7586_v24 = vld [vmem:[%s11121_s29 + $0x884] sm:$0xf] }
 0x130   : > { %3089 = vmatpush.bf16.msrb.mxu2 %v6240_v30  ;;  %v6373_v30 = vld [vmem:[%s11121_s29 + $0x818] sm:$0xf0]  ;;  %v6504_v38 = vor.u32 %v7604_v19, %v6501_v25 }
 0x131   : > { %3101 = vmatpush.bf16.msra.mxu3 %v6320_v2  ;;  %v6376_v57 = vor.u32 %v7572_v54, %v6373_v30  ;;  %v7570_v2 = vld [vmem:[%s11121_s29 + $0x804] sm:$0xf]  ;;  %v6421_v54 = vld [vmem:[%s11121_s29 + $0x878] sm:$0xf0] }
 0x132   : > { %3076 = vmatpush.bf16.msrb.mxu0 %v6168_v47  ;;  %v6528_v47 = vor.u32 %v7610_v13, %v6525_v32  ;;  %v9992_v7 = vpop.f32.mrf.mxu0  ;;  %v7566_v13 = vld [vmem:[%s11121_s29 + $0x7e4] sm:$0xf]  ;;  %v6424_v49 = vor.u32 %v7584_v45, %v6421_v54 }
 0x133   : > { %3113 = vmatpush.bf16.msrb.mxu1 %v6400_v4  ;;  %v6365_v4 = vld [vmem:[%s11121_s29 + $0x808] sm:$0xf0]  ;;  %v6352_v30 = vor.u32 %v7566_v13, %v6349_v31 }
 0x134   : > { %3090 = vmatpush.bf16.msrb.mxu2 %v6232_v34 }
 0x135   : > { %3102 = vmatpush.bf16.msra.mxu3 %v6312_v17 }
 0x136   : > { %3077 = vmatpush.bf16.msrb.mxu0 %v6160_v8  ;;  %v6557_v8 = vld [vmem:[%s11121_s29 + $0x988] sm:$0xf0] }
 0x137   : > { %3114 = vmatpush.bf16.msrb.mxu1 %v6392_v18  ;;  %v6560_v3 = vor.u32 %v7618_v6, %v6557_v8  ;;  %v6440_v18 = vor.u32 %v7588_v36, %v6437_v11 }
 0x138   : > { %3091 = vmatpush.bf16.msrb.mxu2 %v6224_v20  ;;  %v7616_v20 = vld [vmem:[%s11121_s29 + $0x974] sm:$0xf] }
 0x139   : > { %3078 = vmatmul.bf16.vlgmr.msrb.gmra.mxu0 %v9554_v39  ;;  %v6445_v39 = vld [vmem:[%s11121_s29 + $0x8a8] sm:$0xf0]  ;;  %3103 = vmatpush.bf16.msra.mxu3 %v6304_v43  ;;  %v6552_v32 = vor.u32 %v7616_v20, %v6549_v21  ;;  %v7614_v43 = vld [vmem:[%s11121_s29 + $0x964] sm:$0xf] }
 0x13a   : > { %3126 = vmatpush.bf16.msra.mxu0 %v6472_v12  ;;  %v6448_v34 = vor.u32 %v7590_v53, %v6445_v39  ;;  %v6368_v12 = vor.u32 %v7570_v2, %v6365_v4  ;;  %v10042_v53 = vpop.f32.mrf.mxu2  ;;  %v6485_v39 = vld [vmem:[%s11121_s29 + $0x8f8] sm:$0xf0]  ;;  %v7598_v4 = vld [vmem:[%s11121_s29 + $0x8e4] sm:$0xf] }
 0x13b   : > { %3115 = vmatpush.bf16.msrb.mxu1 %v6384_v44  ;;  %3092 = vmatmul.bf16.vlgmr.msrb.gmra.mxu2 %v9631_v23  ;;  %v7606_v23 = vld [vmem:[%s11121_s29 + $0x924] sm:$0xf]  ;;  %v6541_v44 = vld [vmem:[%s11121_s29 + $0x968] sm:$0xf0]  ;;  %v6488_v0 = vor.u32 %v7600_v52, %v6485_v39 }
 0x13c   : > { %3140 = vmatpush.bf16.msra.mxu2 %v6536_v26  ;;  %v6512_v17 = vor.u32 %v7606_v23, %v6509_v10  ;;  %v6429_v26 = vld [vmem:[%s11121_s29 + $0x888] sm:$0xf0]  ;;  %v1525_v10 = vadd.f32 %v9524_v16, %v9504_v9 }
 0x13d   : > { %3104 = vmatpush.bf16.msra.mxu3 %v6296_v61  ;;  %v6432_v29 = vor.u32 %v7586_v24, %v6429_v26  ;;  %v7582_v61 = vld [vmem:[%s11121_s29 + $0x864] sm:$0xf] }
 0x13e   : > { %3127 = vmatpush.bf16.msra.mxu0 %v6464_v63  ;;  %v6360_v63 = vor.u32 %v7568_v15, %v6357_v55 }
 0x13f   : > { %3116 = vmatpush.bf16.msrb.mxu1 %v6376_v57  ;;  %v6413_v57 = vld [vmem:[%s11121_s29 + $0x868] sm:$0xf0]  ;;  %v2176_v8 = vpop.f32.mrf.mxu1 }
 0x140   : > { %3141 = vmatpush.bf16.msra.mxu2 %v6528_v47  ;;  %v6544_v47 = vor.u32 %v7614_v43, %v6541_v44  ;;  %v6416_v2 = vor.u32 %v7582_v61, %v6413_v57 }
 0x141   : > { %3105 = vmatpush.bf16.msra.mxu3 %v6288_v50  ;;  %v1539_v50 = vadd.f32 %v9628_v22, %v1525_v10 }
 0x142   : > { %3128 = vmatpush.bf16.msra.mxu0 %v6456_v35  ;;  %v6496_v35 = vor.u32 %v7602_v40, %v6493_v42  ;;  %v10062_v6 = vpop.f32.mrf.mxu2 }
 0x143   : > { %3117 = vmatpush.bf16.msrb.mxu1 %v6368_v12  ;;  %v1553_v15 = vadd.f32 %v9645_v37, %v1539_v50 }
 0x144   : > { %3142 = vmatpush.bf16.msra.mxu2 %v6520_v5  ;;  %3106 = vmatmul.bf16.vlgmr.msra.gmra.mxu3 %v9626_v33  ;;  %v10037_v33 = vpop.f32.mrf.mxu0  ;;  %v6477_v5 = vld [vmem:[%s11121_s29 + $0x8e8] sm:$0xf0] }
 0x145   : > { %3159 = vmatpush.bf16.msrb.mxu3 %v6560_v3 }
 0x146   : > { %3129 = vmatpush.bf16.msra.mxu0 %v6448_v34  ;;  %v6480_v34 = vor.u32 %v7598_v4, %v6477_v5 }
 0x147   : > { %3118 = vmatpush.bf16.msrb.mxu1 %v6360_v63  ;;  %v2178_v55 = vpop.f32.mrf.mxu1 }
 0x148   : > { %3143 = vmatpush.bf16.msra.mxu2 %v6512_v17 }
 0x149   : > { %3160 = vmatpush.bf16.msrb.mxu3 %v6552_v32 }
 0x14a   : > { %3130 = vmatpush.bf16.msra.mxu0 %v6440_v18 }
 0x14b   : > { %3119 = vmatpush.bf16.msrb.mxu1 %v6352_v30 }
 0x14c   : > { %3144 = vmatpush.bf16.msra.mxu2 %v6504_v38  ;;  %v10060_v23 = vpop.f32.mrf.mxu0 }
 0x14d   : > { %3161 = vmatpush.bf16.msrb.mxu3 %v6544_v47 }
 0x14e   : > { %3131 = vmatpush.bf16.msra.mxu0 %v6432_v29  ;;  %3120 = vmatmul.bf16.vlgmr.msrb.gmra.mxu1 %v9690_v14  ;;  %v2136_v14 = vpop.f32.mrf.mxu3 }
 0x14f   : > { %v2137_v4 = vadd.f32 %v2136_v14, %v9931_v60  ;;  %v10093_v60 = vld [vmem:[%s11123_s21] sm:$0x3]  ;;  %s5065_s21 = scalar_lea.hbm %s11096_s19, %s8007_s1 }
 0x150   : > { %3145 = vmatpush.bf16.msra.mxu2 %v6496_v35  ;;  %v2121_v35 = vadd.f32 %v9867_v1, %v9436_v27 }
 0x151   : > { %v2151_v27 = vadd.f32 %v9992_v7, %v2137_v4  ;;  %v3174_v7 = vperm.slane %v10093_v60, 0 }
 0x152   : > { %3132 = vmatpush.bf16.msra.mxu0 %v6424_v49  ;;  %v2218_v36 = vpop.f32.mrf.mxu2  ;;  %v2135_v49 = vadd.f32 %v2134_v58, %v2121_v35 }
 0x154   : > { %3146 = vmatpush.bf16.msra.mxu2 %v6488_v0  ;;  %6562 = vmatmul.msk.bf16.vlgmr.msrb.gmra.mxu3 %vm1399_vm0, %v9768_v59  ;;  %v1567_v59 = vadd.f32 %v9687_v62, %v1553_v15  ;;  %v2149_v0 = vadd.f32 %v9926_v41, %v2135_v49  ;;  %vm4508_vm0 = vcmask 130048  }
 0x156   : > { %3133 = vmatpush.bf16.msra.mxu0 %v6416_v2  ;;  %v2232_v11 = vpop.f32.mrf.mxu0  ;;  %v2190_v12 = vpop.f32.mrf.mxu3  ;;  %v2163_v2 = vadd.f32 %v10042_v53, %v2149_v0 }
 0x158   : > { %3147 = vmatpush.bf16.msra.mxu2 %v6480_v34  ;;  %v2177_v5 = vadd.f32 %v2176_v8, %v2163_v2 }
 0x159   : > { %3134 = vmatmul.bf16.vlgmr.msra.gmra.mxu0 %v9798_v51 }
 0x15a   : > { %v2220_v51 = vpop.f32.mrf.mxu2  ;;  %v2191_v50 = vadd.f32 %v2190_v12, %v2177_v5 }
 0x15b   : > { %3148 = vmatmul.bf16.vlgmr.msra.gmra.mxu2 %v9859_v28  ;;  %v2221_v3 = vadd.f32 %v2220_v51, %v9838_v46  ;;  %v1581_v28 = vadd.f32 %v9753_v48, %v1567_v59 }
 0x15c   : > { %v2205_v41 = vadd.f32 %v10037_v33, %v2191_v50  ;;  %v3175_v50 = vperm.slane %v10093_v60, 1 }
 0x15d   : > { %v1595_v9 = vadd.f32 %v9764_v56, %v1581_v28 }
 0x15e   : > { %v2234_v17 = vpop.f32.mrf.mxu0  ;;  %v2192_v19 = vpop.f32.mrf.mxu3 }
 0x15f   : > { %v2235_v18 = vadd.f32 %v2234_v17, %v2221_v3  ;;  %v2246_v20 = vpop.f32.mrf.mxu1  ;;  %v2219_v16 = vadd.f32 %v2218_v36, %v1595_v9  ;;  %v2165_v17 = vadd.f32 %v10062_v6, %v2151_v27 }
 0x161   : > { %v2233_v24 = vadd.f32 %v2232_v11, %v2219_v16  ;;  %v2179_v14 = vadd.f32 %v2178_v55, %v2165_v17 }
 0x163   : > { %v2247_v37 = vadd.f32 %v2246_v20, %v2233_v24 }
 0x167   : > { %v2260_v21 = vpop.f32.mrf.mxu3  ;;  %v2248_v22 = vpop.f32.mrf.mxu1 }
 0x168   : > { %v2249_v25 = vadd.f32 %v2248_v22, %v2235_v18  ;;  %v2261_v26 = vadd.f32 %v2260_v21, %v2247_v37  ;;  %v2193_v18 = vadd.f32 %v2192_v19, %v2179_v14 }
 0x16a   : > { %v2207_v6 = vadd.f32 %v10060_v23, %v2193_v18 }
 0x16f   : > { %v2262_v63 = vpop.f32.mrf.mxu3  ;;  %v10076_v62 = vpop.f32.mrf.mxu1 }
 0x170   : > { %v2263_v46 = vadd.f32 %v2262_v63, %v2249_v25 }
 0x172   : > { %v2274_v13 = vpop.f32.mrf.mxu2 }
 0x173   : > { %v2275_v31 = vadd.f32 %v2274_v13, %v2261_v26 }
 0x176   : > { %v2288_v32 = vpop.f32.mrf.mxu0 }
 0x177   : > { %v10078_v38 = vadd.f32 %v2288_v32, %v2275_v31  ;;  %v2304_v56 = vpop.f32.mrf.mxu1 }
 0x17a   : > { %v2276_v48 = vpop.f32.mrf.mxu2 }
 0x17b   : > { %v2277_v29 = vadd.f32 %v2276_v48, %v2263_v46 }
 0x17e   : > { %v2290_v40 = vpop.f32.mrf.mxu0 }
 0x17f   : > { %v2291_v43 = vadd.f32 %v2290_v40, %v2277_v29 }
 0x181   : > { %v10080_v44 = vadd.f32 %v2304_v56, %v2291_v43 }
 0x187   : > { %v2981_v42 = vpop.f32.mrf.mxu3 }
 0x18b   : > { %v2995_v45 = vpop.f32.mrf.mxu1 }
 0x18c   : > { %v2996_v54 = vadd.f32 %v2995_v45, %v2981_v42 }
 0x18f   : > { %v2983_v52 = vpop.f32.mrf.mxu3 }
 0x192   : > { %v3009_v30 = vpop.f32.mrf.mxu2 }
 0x193   : > { %v3010_v47 = vadd.f32 %v3009_v30, %v2996_v54  ;;  %v2997_v57 = vpop.f32.mrf.mxu1 }
 0x194   : > { %v2998_v10 = vadd.f32 %v2997_v57, %v2983_v52 }
 0x196   : > { %v3023_v61 = vpop.f32.mrf.mxu0 }
 0x197   : > { %v3024_v34 = vadd.f32 %v3023_v61, %v3010_v47 }
 0x19a   : > { %v3011_v39 = vpop.f32.mrf.mxu2 }
 0x19b   : > { %v3012_v1 = vadd.f32 %v3011_v39, %v2998_v10  ;;  %v2303_v10 = vadd.f32 %v10076_v62, %v10078_v38 }
 0x19e   : > { %v3025_v3 = vpop.f32.mrf.mxu0 }
 0x19f   : > { %v3026_v8 = vadd.f32 %v3025_v3, %v3012_v1 }
 0x1a2   : > { %v3065_v11 = vpop.f32.mrf.mxu2 }
 0x1a7   : > { %v3037_v36 = vpop.f32.mrf.mxu3 }
 0x1a8   : > { %v3038_v15 = vadd.f32 %v3037_v36, %v3024_v34 }
 0x1aa   : > { %v3067_v9 = vpop.f32.mrf.mxu2 }
 0x1ab   : > { %v3051_v51 = vpop.f32.mrf.mxu1 }
 0x1ac   : > { %v3052_v58 = vadd.f32 %v3051_v51, %v3038_v15 }
 0x1ae   : > { %v3066_v53 = vadd.f32 %v3065_v11, %v3052_v58 }
 0x1af   : > { %v3039_v59 = vpop.f32.mrf.mxu3 }
 0x1b0   : > { %v3168_v12 = vadd.f32 %v3066_v53, %v2205_v41  ;;  %v3040_v28 = vadd.f32 %v3039_v59, %v3026_v8 }
 0x1b2   : > { %v3178_v33 = vadd.f32 %v3174_v7, %v3168_v12 }
 0x1b3   : > { %v3053_v20 = vpop.f32.mrf.mxu1 }
 0x1b4   : > { %v3054_v16 = vadd.f32 %v3053_v20, %v3040_v28  ;;  %v3182_v25 = vmax.f32 %v3178_v33, 0.0 }
 0x1b6   : > { %v3068_v21 = vadd.f32 %v3067_v9, %v3054_v16  ;;  %v3191_v55 = vrot.slane %v3182_v25, 1  ;;  %v3206_v26 = vrot.slane %v3182_v25, 2  ;;  %v3079_v19 = vpop.f32.mrf.mxu0  ;;  %v3329_v9 = vld [vmem:[%s11124_s4 + $0x78] sm:$0xff]  ;;  %v3328_v16 = vld [vmem:[%s11124_s4 + $0x70] sm:$0xff] }
 0x1b7   : > { %3344 = vmatpush.msrb.mxu0 %v3329_v9 }
 0x1b8   : > { %v3170_v22 = vadd.f32 %v3068_v21, %v2207_v6  ;;  %v3327_v6 = vld [vmem:[%s11124_s4 + $0x68] sm:$0xff]  ;;  %v3326_v21 = vld [vmem:[%s11124_s4 + $0x60] sm:$0xff] }
 0x1b9   : > { %3345 = vmatpush.msrb.mxu0 %v3328_v16 }
 0x1ba   : > { %v3180_v24 = vadd.f32 %v3174_v7, %v3170_v22  ;;  %v3325_v22 = vld [vmem:[%s11124_s4 + $0x58] sm:$0xff] }
 0x1bb   : > { %3346 = vmatpush.msrb.mxu0 %v3327_v6  ;;  %v6682_v6 = vld [vmem:[%s11082_s5 + $0x50] sm:$0xf] }
 0x1bc   : > { %v3184_v37 = vmax.f32 %v3180_v24, 0.0  ;;  %v3323_v24 = vld [vmem:[%s11124_s4 + $0x48] sm:$0xff] }
 0x1bd   : > { %3347 = vmatpush.msrb.mxu0 %v3326_v21  ;;  %v6616_v21 = vld [vmem:[%s11082_s5 + $0xb0] sm:$0xf] }
 0x1be   : > { %v3192_v63 = vrot.slane %v3184_v37, 1  ;;  %v3207_v13 = vrot.slane %v3184_v37, 2  ;;  %v3093_v40 = vpop.f32.mrf.mxu2  ;;  %v3081_v43 = vpop.f32.mrf.mxu0 }
 0x1bf   : > { %v3094_v42 = vadd.f32 %v3093_v40, %v3079_v19  ;;  %3348 = vmatpush.msrb.mxu0 %v3325_v22 }
 0x1c0   : > { %v3203_v46 = vmax.f32 %v3184_v37, %v3192_v63  ;;  %v3193_v31 = vsel %vm2431_vm1, %v3191_v55, %v3192_v63  ;;  %v3208_v32 = vsel %vm3205_vm2, %v3206_v26, %v3207_v13 }
 0x1c1   : > { %v3201_v48 = vmax.f32 %v3182_v25, %v3193_v31  ;;  %v3324_v25 = vld [vmem:[%s11124_s4 + $0x50] sm:$0xff] }
 0x1c2   : > { %v10099_v29 = vmax.f32 %v3203_v46, %v3207_v13  ;;  %3349 = vmatpush.msrb.mxu0 %v3324_v25  ;;  %v3322_v13 = vld [vmem:[%s11124_s4 + $0x40] sm:$0xff]  ;;  %v7643_v25 = vld [vmem:[%s11082_s5 + $0xb4] sm:$0xf0] }
 0x1c3   : > { %v10101_v23 = vmax.f32 %v3201_v48, %v3208_v32  ;;  %v3321_v48 = vld [vmem:[%s11124_s4 + $0x38] sm:$0xff] }
 0x1c4   : > { %3228 = vrot.lane.b32.xlu2 %v10099_v29, %s7881_s23  ;;  %3350 = vmatpush.msrb.mxu0 %v3323_v24  ;;  %v7642_v24 = vld [vmem:[%s11082_s5 + $0xb4] sm:$0xf] }
 0x1c6   : > { %v3095_v54 = vpop.f32.mrf.mxu2  ;;  %3351 = vmatpush.msrb.mxu0 %v3322_v13  ;;  %v6617_v13 = vor.u32 %v7643_v25, %v6616_v21  ;;  %v6716_v21 = vld [vmem:[%s11082_s5 + $0xe8] sm:$0xf0] }
 0x1c7   : > { %v3107_v56 = vpop.f32.mrf.mxu3  ;;  %v3096_v52 = vadd.f32 %v3095_v54, %v3081_v43  ;;  %v3318_v54 = vld [vmem:[%s11124_s4 + $0x20] sm:$0xff] }
 0x1c8   : > { %v3108_v47 = vadd.f32 %v3107_v56, %v3094_v42  ;;  %v3320_v56 = vld [vmem:[%s11124_s4 + $0x30] sm:$0xff]  ;;  %3352 = vmatpush.msrb.mxu0 %v3321_v48 }
 0x1ca   : > { %3353 = vmatpush.msrb.mxu0 %v3320_v56  ;;  %v7640_v56 = vld [vmem:[%s11082_s5 + $0xa4] sm:$0xf] }
 0x1cb   : > { %v3121_v30 = vpop.f32.mrf.mxu1 }
 0x1cc   : > { %3247 = vrot.lane.b32.xlu2 %v10099_v29, %s7882_s27  ;;  %v3122_v49 = vadd.f32 %v3121_v30, %v3108_v47  ;;  %v3317_v47 = vld [vmem:[%s11124_s4 + $0x18] sm:$0xff] }
 0x1cf   : > { %v3109_v45 = vpop.f32.mrf.mxu3 }
 0x1d0   : > { %v3110_v0 = vadd.f32 %v3109_v45, %v3096_v52 }
 0x1d3   : > { %v3123_v4 = vpop.f32.mrf.mxu1 }
 0x1d4   : > { %v3124_v36 = vadd.f32 %v3123_v4, %v3110_v0 }
 0x1d6   : > { %v3135_v35 = vpop.f32.mrf.mxu0 }
 0x1d7   : > { %v3136_v39 = vadd.f32 %v3135_v35, %v3122_v49  ;;  %v3163_v61 = vpop.f32.mrf.mxu3 }
 0x1de   : > { %v3149_v57 = vpop.f32.mrf.mxu2  ;;  %v3137_v34 = vpop.f32.mrf.mxu0 }
 0x1df   : > { %v3150_v2 = vadd.f32 %v3149_v57, %v3136_v39  ;;  %v3138_v15 = vadd.f32 %v3137_v34, %v3124_v36  ;;  %v3165_v1 = vpop.f32.mrf.mxu3  ;;  %v3262_v39 = vld [vmem:[%s11125_s0] sm:$0x7f]  ;;  %v3315_v57 = vld [vmem:[%s11124_s4 + $0x8] sm:$0xff]  ;;  %v3336_v36 = vld [vmem:[%s11124_s4 + $0xb0] sm:$0xff]  ;;  %s5069_s0 = sshll.u32 %s5065_s21, 4  ;;  %s5070_s0 = int_to_ptr.hbm [resolvable:$true] %s5069_s0 }
 0x1e0   : > { %v3339_v34 = vld [vmem:[%s11124_s4 + $0xc8] sm:$0xff]  ;;  %s7831_s25 = sshra.s32 %s5070_s0, 4  ;;  %s7832_s25 = int_to_ptr.hbm [resolvable:$true] %s7831_s25 }
 0x1e1   : > { %v3164_v5 = vadd.f32 %v3163_v61, %v3150_v2  ;;  %v3316_v61 = vld [vmem:[%s11124_s4 + $0x10] sm:$0xff]  ;;  %s7833_s20 = scalar_lea.hbm %s7832_s25, 1  ;;  %p7838_p0 = scmp.lt.s32.totalorder %s7832_s25, %s11096_s19 }
 0x1e2   : > { %p7834_p11 = scmp.ne.s32.totalorder %s7832_s25, %s7833_s20 }
 0x1e3   : > { %v3169_v11 = vadd.f32 %v3164_v5, %v2303_v10  ;;  %v3338_v10 = vld [vmem:[%s11124_s4 + $0xc0] sm:$0xff] }
 0x1e4   : > { %p7835_p12 = pnand %p7834_p11, %p8024_p5 }
 0x1e5   : > { %v3179_v58 = vadd.f32 %v3175_v50, %v3169_v11  ;;  %v3335_v11 = vld [vmem:[%s11124_s4 + $0xa8] sm:$0xff] }
 0x1e6   : > { %v3151_v51 = vpop.f32.mrf.mxu2  ;;  %p7836_p13 = pneg %p7835_p12 }
 0x1e7   : > { %v3152_v27 = vadd.f32 %v3151_v51, %v3138_v15  ;;  %v3183_v41 = vmax.f32 %v3179_v58, 0.0  ;;  %v3333_v15 = vld [vmem:[%s11124_s4 + $0x98] sm:$0xff]  ;;  %v3332_v51 = vld [vmem:[%s11124_s4 + $0x90] sm:$0xff]  ;;  %v3330_v58 = vld [vmem:[%s11124_s4 + $0x80] sm:$0xff] }
 0x1e9   : > { %v3166_v3 = vadd.f32 %v3165_v1, %v3152_v27  ;;  %v3194_v59 = vrot.slane %v3183_v41, 1  ;;  %v3209_v18 = vrot.slane %v3183_v41, 2  ;;  %v3331_v27 = vld [vmem:[%s11124_s4 + $0x88] sm:$0xff]  ;;  %v3314_v1 = vld [vmem:[%s11124_s4] sm:$0xff] }
 0x1eb   : > { %v3171_v17 = vadd.f32 %v3166_v3, %v10080_v44  ;;  %v6632_v3 = vld [vmem:[%s11082_s5 + $0xd0] sm:$0xf] }
 0x1ed   : > { %v3181_v53 = vadd.f32 %v3175_v50, %v3171_v17  ;;  %v3334_v50 = vld [vmem:[%s11124_s4 + $0xa0] sm:$0xff]  ;;  %v7647_v17 = vld [vmem:[%s11082_s5 + $0xd4] sm:$0xf0] }
 0x1ef   : > { %v3185_v14 = vmax.f32 %v3181_v53, 0.0  ;;  %v6633_v53 = vor.u32 %v7647_v17, %v6632_v3  ;;  %v7623_v3 = vld [vmem:[%s11082_s5 + $0x14] sm:$0xf0] }
 0x1f1   : > { %v3195_v8 = vrot.slane %v3185_v14, 1  ;;  %v3210_v12 = vrot.slane %v3185_v14, 2  ;;  %3502 = vmatpush.bf16.msrb.mxu2 %v6633_v53  ;;  %v6584_v53 = vld [vmem:[%s11082_s5 + $0x70] sm:$0xf] }
 0x1f3   : > { %v3204_v62 = vmax.f32 %v3185_v14, %v3195_v8  ;;  %v3196_v38 = vsel %vm2431_vm1, %v3194_v59, %v3195_v8  ;;  %v3211_v60 = vsel %vm3205_vm2, %v3209_v18, %v3210_v12  ;;  %v6634_v14 = vld [vmem:[%s11082_s5 + $0xd8] sm:$0xf0]  ;;  %v6690_v8 = vld [vmem:[%s11082_s5 + $0x60] sm:$0xf]  ;;  %vm4949_vm1 = vcmask 780288  }
 0x1f4   : > { %v3202_v7 = vmax.f32 %v3183_v41, %v3196_v38  ;;  %v7646_v41 = vld [vmem:[%s11082_s5 + $0xd4] sm:$0xf]  ;;  %v7645_v38 = vld [vmem:[%s11082_s5 + $0xc4] sm:$0xf0]  ;;  %vm4984_vm2 = vcmask 261120  }
 0x1f5   : > { %v3219_v28 = vmax.f32 %v3204_v62, %v3210_v12  ;;  %v7633_v12 = vld [vmem:[%s11082_s5 + $0x64] sm:$0xf0]  ;;  %v6637_v59 = vor.u32 %v7646_v41, %v6634_v14  ;;  %v6624_v62 = vld [vmem:[%s11082_s5 + $0xc0] sm:$0xf]  ;;  %v7650_v14 = vld [vmem:[%s11082_s5 + $0xf4] sm:$0xf] }
 0x1f6   : > { %v3217_v20 = vmax.f32 %v3202_v7, %v3211_v60  ;;  %v6691_v18 = vor.u32 %v7633_v12, %v6690_v8  ;;  %v7644_v60 = vld [vmem:[%s11082_s5 + $0xc4] sm:$0xf]  ;;  %v6625_v7 = vor.u32 %v7645_v38, %v6624_v62  ;;  %v6724_v8 = vld [vmem:[%s11082_s5 + $0xf8] sm:$0xf0]  ;;  %v7634_v62 = vld [vmem:[%s11082_s5 + $0x74] sm:$0xf] }
 0x1f7   : > { %3249 = vrot.lane.b32.xlu1 %v3219_v28, %s7882_s27  ;;  %3230 = vrot.lane.b32.xlu0 %v3219_v28, %s7881_s23  ;;  %v6586_v38 = vld [vmem:[%s11082_s5 + $0x78] sm:$0xf0] }
 0x1f8   : > { %v7810_v44 = vpack.i.bf16 %v10101_v23, %v3217_v20  ;;  %3503 = vmatpush.bf16.msrb.mxu2 %v6625_v7  ;;  %v6692_v7 = vld [vmem:[%s11082_s5 + $0x68] sm:$0xf0] }
 0x1fc   : > { %3504 = vmatpush.bf16.msrb.mxu2 %v6617_v13  ;;  %v7675_v13 = vld [vmem:[%s11082_s5 + $0x1b4] sm:$0xf0] }
 0x1ff   : > { %3245 = vrot.lane.b32.xlu1 %v3217_v20, %s7882_s27  ;;  %7811 = vrot.lane.b32.xlu0 %v7810_v44, %s7881_s23  ;;  %v6764_v44 = vld [vmem:[%s11082_s5 + $0x148] sm:$0xf0]  ;;  %s7837_s23 = scalar_lea.hbm %s11096_s19, 2 }
 0x200   : > { %p7839_p1 = scmp.lt.s32.totalorder %s7837_s23, %s7833_s20 }
 0x202   : > { %p7840_p2 = por %p7839_p1, %p7838_p0 }
 0x204   : > { %p7841_p3 = pnand %p7840_p2, %p7836_p13 }
 0x207   : > { %3243 = vrot.lane.b32.xlu0 %v10101_v23, %s7882_s27 }
 0x21e   : > { %v3229_v33 = vpop.permute.xlu2 %3228 }
 0x226   : > { %v3248_v19 = vpop.permute.xlu2 %3247 }
 0x269   : > { %v3250_v37 = vpop.permute.xlu1 %3249  ;;  %v3231_v55 = vpop.permute.xlu0 %3230 }
 0x26a   : > { %v3234_v26 = vsel %vm3232_vm3, %v3229_v33, %v3231_v55  ;;  %v3242_v63 = vmax.f32 %v3219_v28, %v3231_v55  ;;  %v3253_v31 = vsel %vm3251_vm4, %v3248_v19, %v3250_v37  ;;  %v6626_v28 = vld [vmem:[%s11082_s5 + $0xc8] sm:$0xf0]  ;;  %v7631_v33 = vld [vmem:[%s11082_s5 + $0x54] sm:$0xf0]  ;;  %v7658_v55 = vld [vmem:[%s11082_s5 + $0x134] sm:$0xf] }
 0x26b   : > { %v3241_v46 = vmax.f32 %v10099_v29, %v3234_v26  ;;  %v3319_v29 = vld [vmem:[%s11124_s4 + $0x28] sm:$0xff]  ;;  %v6629_v9 = vor.u32 %v7644_v60, %v6626_v28  ;;  %v6683_v22 = vor.u32 %v7631_v33, %v6682_v6  ;;  %v6756_v26 = vld [vmem:[%s11082_s5 + $0x138] sm:$0xf0]  ;;  %v7632_v60 = vld [vmem:[%s11082_s5 + $0x64] sm:$0xf] }
 0x26c   : > { %v3261_v32 = vmax.f32 %v3242_v63, %v3250_v37  ;;  %3354 = vmatpush.msrb.mxu0 %v3319_v29  ;;  %v6618_v37 = vld [vmem:[%s11082_s5 + $0xb8] sm:$0xf0]  ;;  %v6674_v63 = vld [vmem:[%s11082_s5 + $0x40] sm:$0xf]  ;;  %v6759_v19 = vor.u32 %v7658_v55, %v6756_v26  ;;  %v6610_v29 = vld [vmem:[%s11082_s5 + $0xa8] sm:$0xf0]  ;;  %v6695_v25 = vor.u32 %v7632_v60, %v6692_v7 }
 0x26d   : > { %v3260_v40 = vmax.f32 %v3241_v46, %v3253_v31  ;;  %v7629_v46 = vld [vmem:[%s11082_s5 + $0x44] sm:$0xf0]  ;;  %v6608_v31 = vld [vmem:[%s11082_s5 + $0xa0] sm:$0xf]  ;;  %v6621_v48 = vor.u32 %v7642_v24, %v6618_v37  ;;  %v7648_v33 = vld [vmem:[%s11082_s5 + $0xe4] sm:$0xf] }
 0x26e   : > { %6565 = vmatpush.msk.msra.mxu3 %vm3267_vm5, %v3261_v32  ;;  %3355 = vmatpush.msrb.mxu0 %v3318_v54  ;;  %v7641_v32 = vld [vmem:[%s11082_s5 + $0xa4] sm:$0xf0]  ;;  %v7627_v54 = vld [vmem:[%s11082_s5 + $0x34] sm:$0xf0]  ;;  %v6762_v28 = vld [vmem:[%s11082_s5 + $0x140] sm:$0xf] }
 0x26f   : > { %6563 = vmatpush.msk.msra.mxu1 %vm3267_vm5, %v3260_v40  ;;  %v6675_v40 = vor.u32 %v7629_v46, %v6674_v63  ;;  %v6834_v55 = vld [vmem:[%s11082_s5 + $0x1b0] sm:$0xf]  ;;  %v7630_v26 = vld [vmem:[%s11082_s5 + $0x54] sm:$0xf]  ;;  %v6684_v63 = vld [vmem:[%s11082_s5 + $0x58] sm:$0xf0] }
 0x270   : > { %3356 = vmatpush.msrb.mxu0 %v3317_v47  ;;  %v6609_v47 = vor.u32 %v7641_v32, %v6608_v31  ;;  %v7659_v46 = vld [vmem:[%s11082_s5 + $0x134] sm:$0xf0]  ;;  %v6719_v31 = vor.u32 %v7648_v33, %v6716_v21  ;;  %v7688_v32 = vld [vmem:[%s11082_s5 + $0x224] sm:$0xf]  ;;  %v6802_v7 = vld [vmem:[%s11082_s5 + $0x170] sm:$0xf] }
 0x271   : > { %v7812_v43 = vpop.permute.xlu0 %7811  ;;  %v3246_v35 = vpop.permute.xlu1 %3245  ;;  %v7651_v33 = vld [vmem:[%s11082_s5 + $0xf4] sm:$0xf0]  ;;  %v7680_v21 = vld [vmem:[%s11082_s5 + $0x1e4] sm:$0xf] }
 0x272   : > { %v7814_v42 = vunpack.i.h.bf16 %v7812_v43  ;;  %v7813_v45 = vunpack.i.l.bf16 %v7812_v43  ;;  %3357 = vmatpush.msrb.mxu0 %v3316_v61  ;;  %v7656_v43 = vld [vmem:[%s11082_s5 + $0x124] sm:$0xf]  ;;  %v6600_v61 = vld [vmem:[%s11082_s5 + $0x90] sm:$0xf]  ;;  %3505 = vmatpush.bf16.msrb.mxu2 %v6609_v47 }
 0x274   : > { %v3240_v30 = vmax.f32 %v3217_v20, %v7813_v45  ;;  %v3233_v52 = vsel %vm3232_vm3, %v7814_v42, %v7813_v45  ;;  %3358 = vmatpush.msrb.mxu0 %v3315_v57  ;;  %v7660_v20 = vld [vmem:[%s11082_s5 + $0x144] sm:$0xf]  ;;  %v6748_v42 = vld [vmem:[%s11082_s5 + $0x128] sm:$0xf0]  ;;  %v6666_v45 = vld [vmem:[%s11082_s5 + $0x30] sm:$0xf] }
 0x275   : > { %v3239_v2 = vmax.f32 %v10101_v23, %v3233_v52  ;;  %v3337_v23 = vld [vmem:[%s11124_s4 + $0xb8] sm:$0xff]  ;;  %v6767_v16 = vor.u32 %v7660_v20, %v6764_v44  ;;  %v6613_v52 = vor.u32 %v7640_v56, %v6610_v29  ;;  %v7661_v20 = vld [vmem:[%s11082_s5 + $0x144] sm:$0xf0]  ;;  %v6727_v44 = vor.u32 %v7650_v14, %v6724_v8  ;;  %v6660_v14 = vld [vmem:[%s11082_s5 + $0x28] sm:$0xf0] }
 0x276   : > { %v3259_v49 = vmax.f32 %v3240_v30, %v3246_v35  ;;  %3359 = vmatpush.msrb.mxu0 %v3314_v1  ;;  %v6751_v30 = vor.u32 %v7656_v43, %v6748_v42  ;;  %v7639_v57 = vld [vmem:[%s11082_s5 + $0x94] sm:$0xf0]  ;;  %v6594_v1 = vld [vmem:[%s11082_s5 + $0x88] sm:$0xf0]  ;;  %v6763_v24 = vor.u32 %v7661_v20, %v6762_v28  ;;  %v6835_v56 = vor.u32 %v7675_v13, %v6834_v55  ;;  %v6730_v8 = vld [vmem:[%s11082_s5 + $0x100] sm:$0xf] }
 0x277   : > { %v7667_v28 = vld [vmem:[%s11082_s5 + $0x174] sm:$0xf0]  ;;  %v7665_v55 = vld [vmem:[%s11082_s5 + $0x164] sm:$0xf0]  ;;  %v6644_v13 = vld [vmem:[%s11082_s5 + $0x8] sm:$0xf0] }
 0x278   : > { %3309 = vmatpush.msra.mxu3 %v3259_v49  ;;  %3730 = vmatpush.bf16.msra.mxu0 %v6767_v16  ;;  %v6740_v49 = vld [vmem:[%s11082_s5 + $0x118] sm:$0xf0]  ;;  %v7621_v16 = vld [vmem:[%s11082_s5 + $0x4] sm:$0xf0]  ;;  %v6803_v20 = vor.u32 %v7667_v28, %v6802_v7  ;;  %v7668_v28 = vld [vmem:[%s11082_s5 + $0x184] sm:$0xf] }
 0x279   : > { %v3244_v0 = vpop.permute.xlu0 %3243  ;;  %6566 = vmatmul.msk.f32.vlgmr.msra.gmra.mxu3 %vm3263_vm6, %v3262_v39 }
 0x27a   : > { %v3252_v4 = vsel %vm3251_vm4, %v3244_v0, %v3246_v35  ;;  %3515 = vmatpush.bf16.msrb.mxu3 %v6637_v59  ;;  %v7654_v35 = vld [vmem:[%s11082_s5 + $0x114] sm:$0xf] }
 0x27b   : > { %v3258_v5 = vmax.f32 %v3239_v2, %v3252_v4  ;;  %v7638_v0 = vld [vmem:[%s11082_s5 + $0x94] sm:$0xf]  ;;  %v6602_v2 = vld [vmem:[%s11082_s5 + $0x98] sm:$0xf0]  ;;  %v6658_v4 = vld [vmem:[%s11082_s5 + $0x20] sm:$0xf] }
 0x27c   : > { %3731 = vmatpush.bf16.msra.mxu0 %v6759_v19  ;;  %v6754_v19 = vld [vmem:[%s11082_s5 + $0x130] sm:$0xf] }
 0x27d   : > { %3289 = vmatpush.msra.mxu1 %v3258_v5  ;;  %v7625_v5 = vld [vmem:[%s11082_s5 + $0x24] sm:$0xf0]  ;;  %v6755_v29 = vor.u32 %v7659_v46, %v6754_v19  ;;  %v6714_v19 = vld [vmem:[%s11082_s5 + $0xe0] sm:$0xf] }
 0x27e   : > { %6564 = vmatmul.msk.f32.vlgmr.msra.gmra.mxu1 %vm3263_vm6, %v3262_v39  ;;  %3516 = vmatpush.bf16.msrb.mxu3 %v6629_v9  ;;  %v6667_v39 = vor.u32 %v7627_v54, %v6666_v45  ;;  %v6642_v9 = vld [vmem:[%s11082_s5] sm:$0xf]  ;;  %v7649_v46 = vld [vmem:[%s11082_s5 + $0xe4] sm:$0xf0] }
 0x27f   : > { %3370 = vmatpush.msrb.mxu1 %v3339_v34  ;;  %v6743_v34 = vor.u32 %v7654_v35, %v6740_v49  ;;  %v6643_v37 = vor.u32 %v7621_v16, %v6642_v9  ;;  %v6826_v54 = vld [vmem:[%s11082_s5 + $0x1a0] sm:$0xf]  ;;  %v7628_v35 = vld [vmem:[%s11082_s5 + $0x44] sm:$0xf]  ;;  %v6676_v49 = vld [vmem:[%s11082_s5 + $0x48] sm:$0xf0] }
 0x280   : > { %3732 = vmatpush.bf16.msra.mxu0 %v6751_v30  ;;  %v7673_v30 = vld [vmem:[%s11082_s5 + $0x1a4] sm:$0xf0]  ;;  %v6652_v9 = vld [vmem:[%s11082_s5 + $0x18] sm:$0xf0]  ;;  %v6722_v16 = vld [vmem:[%s11082_s5 + $0xf0] sm:$0xf] }
 0x281   : > { %3371 = vmatpush.msrb.mxu1 %v3338_v10  ;;  %v6601_v10 = vor.u32 %v7639_v57, %v6600_v61  ;;  %v6827_v47 = vor.u32 %v7673_v30, %v6826_v54  ;;  %v7657_v61 = vld [vmem:[%s11082_s5 + $0x124] sm:$0xf0]  ;;  %v7686_v57 = vld [vmem:[%s11082_s5 + $0x214] sm:$0xf]  ;;  %v6860_v54 = vld [vmem:[%s11082_s5 + $0x1c8] sm:$0xf0] }
 0x282   : > { %3517 = vmatpush.bf16.msrb.mxu3 %v6621_v48  ;;  %v6908_v48 = vld [vmem:[%s11082_s5 + $0x228] sm:$0xf0] }
 0x283   : > { %3372 = vmatpush.msrb.mxu1 %v3337_v23  ;;  %v7652_v23 = vld [vmem:[%s11082_s5 + $0x104] sm:$0xf]  ;;  %3506 = vmatpush.bf16.msrb.mxu2 %v6601_v10  ;;  %v6911_v42 = vor.u32 %v7688_v32, %v6908_v48  ;;  %v6715_v32 = vor.u32 %v7649_v46, %v6714_v19  ;;  %v7678_v48 = vld [vmem:[%s11082_s5 + $0x1d4] sm:$0xf]  ;;  %v6866_v19 = vld [vmem:[%s11082_s5 + $0x1d0] sm:$0xf] }
 0x284   : > { %3733 = vmatpush.bf16.msra.mxu0 %v6743_v34  ;;  %v7671_v34 = vld [vmem:[%s11082_s5 + $0x194] sm:$0xf0] }
 0x285   : > { %3373 = vmatpush.msrb.mxu1 %v3336_v36  ;;  %v6732_v36 = vld [vmem:[%s11082_s5 + $0x108] sm:$0xf0]  ;;  %v7679_v46 = vld [vmem:[%s11082_s5 + $0x1d4] sm:$0xf0] }
 0x286   : > { %3518 = vmatpush.bf16.msrb.mxu3 %v6613_v52  ;;  %v6735_v17 = vor.u32 %v7652_v23, %v6732_v36  ;;  %v6746_v52 = vld [vmem:[%s11082_s5 + $0x120] sm:$0xf]  ;;  %v7626_v23 = vld [vmem:[%s11082_s5 + $0x34] sm:$0xf]  ;;  %v6668_v36 = vld [vmem:[%s11082_s5 + $0x38] sm:$0xf0] }
 0x287   : > { %3374 = vmatpush.msrb.mxu1 %v3335_v11  ;;  %v6605_v11 = vor.u32 %v7638_v0, %v6602_v2  ;;  %v6900_v0 = vld [vmem:[%s11082_s5 + $0x218] sm:$0xf0]  ;;  %v6747_v2 = vor.u32 %v7657_v61, %v6746_v52 }
 0x288   : > { %3734 = vmatpush.bf16.msra.mxu0 %v6735_v17  ;;  %v7669_v17 = vld [vmem:[%s11082_s5 + $0x184] sm:$0xf0] }
 0x289   : > { %3375 = vmatpush.msrb.mxu1 %v3334_v50  ;;  %v6659_v50 = vor.u32 %v7625_v5, %v6658_v4  ;;  %v6903_v4 = vor.u32 %v7686_v57, %v6900_v0  ;;  %v6818_v5 = vld [vmem:[%s11082_s5 + $0x190] sm:$0xf] }
 0x28a   : > { %3519 = vmatpush.bf16.msrb.mxu3 %v6605_v11  ;;  %v6819_v10 = vor.u32 %v7671_v34, %v6818_v5  ;;  %v6671_v11 = vor.u32 %v7626_v23, %v6668_v36  ;;  %v7689_v23 = vld [vmem:[%s11082_s5 + $0x224] sm:$0xf0] }
 0x28b   : > { %3376 = vmatpush.msrb.mxu1 %v3333_v15  ;;  %v6592_v15 = vld [vmem:[%s11082_s5 + $0x80] sm:$0xf] }
 0x28c   : > { %3735 = vmatpush.bf16.msra.mxu0 %v6727_v44  ;;  %v7622_v44 = vld [vmem:[%s11082_s5 + $0x14] sm:$0xf] }
 0x28d   : > { %3377 = vmatpush.msrb.mxu1 %v3332_v51  ;;  %v7637_v51 = vld [vmem:[%s11082_s5 + $0x84] sm:$0xf0] }
 0x28e   : > { %v6593_v41 = vor.u32 %v7637_v51, %v6592_v15  ;;  %v7655_v15 = vld [vmem:[%s11082_s5 + $0x114] sm:$0xf0]  ;;  %v7684_v51 = vld [vmem:[%s11082_s5 + $0x204] sm:$0xf] }
 0x28f   : > { %3378 = vmatpush.msrb.mxu1 %v3331_v27  ;;  %v7636_v27 = vld [vmem:[%s11082_s5 + $0x84] sm:$0xf] }
 0x290   : > { %v6597_v12 = vor.u32 %v7636_v27, %v6594_v1  ;;  %3507 = vmatpush.bf16.msrb.mxu2 %v6593_v41  ;;  %3736 = vmatpush.bf16.msra.mxu0 %v6719_v31  ;;  %v6892_v1 = vld [vmem:[%s11082_s5 + $0x208] sm:$0xf0] }
 0x291   : > { %3379 = vmatpush.msrb.mxu1 %v3330_v58  ;;  %v6650_v58 = vld [vmem:[%s11082_s5 + $0x10] sm:$0xf] }
 0x292   : > { %v6651_v59 = vor.u32 %v7623_v3, %v6650_v58  ;;  %3520 = vmatpush.bf16.msrb.mxu3 %v6597_v12  ;;  %v6895_v58 = vor.u32 %v7684_v51, %v6892_v1  ;;  %v6810_v3 = vld [vmem:[%s11082_s5 + $0x180] sm:$0xf]  ;;  %v7672_v51 = vld [vmem:[%s11082_s5 + $0x1a4] sm:$0xf]  ;;  %v6828_v1 = vld [vmem:[%s11082_s5 + $0x1a8] sm:$0xf0] }
 0x293   : > { %3600 = vmatpush.bf16.msra.mxu1 %v6691_v18  ;;  %v7635_v18 = vld [vmem:[%s11082_s5 + $0x74] sm:$0xf0]  ;;  %v6811_v41 = vor.u32 %v7669_v17, %v6810_v3 }
 0x294   : > { %v6585_v6 = vor.u32 %v7635_v18, %v6584_v53  ;;  %v7624_v53 = vld [vmem:[%s11082_s5 + $0x24] sm:$0xf]  ;;  %v7682_v18 = vld [vmem:[%s11082_s5 + $0x1f4] sm:$0xf]  ;;  %v7687_v3 = vld [vmem:[%s11082_s5 + $0x214] sm:$0xf0] }
 0x295   : > { %v6663_v12 = vor.u32 %v7624_v53, %v6660_v14  ;;  %v6831_v53 = vor.u32 %v7672_v51, %v6828_v1 }
 0x296   : > { %3508 = vmatpush.bf16.msrb.mxu2 %v6585_v6  ;;  %v6655_v6 = vor.u32 %v7622_v44, %v6652_v9  ;;  %v6882_v44 = vld [vmem:[%s11082_s5 + $0x1f0] sm:$0xf]  ;;  %v7683_v9 = vld [vmem:[%s11082_s5 + $0x1f4] sm:$0xf0] }
 0x297   : > { %3601 = vmatpush.bf16.msra.mxu1 %v6683_v22  ;;  %v6589_v22 = vor.u32 %v7634_v62, %v6586_v38  ;;  %v6884_v62 = vld [vmem:[%s11082_s5 + $0x1f8] sm:$0xf0] }
 0x298   : > { %v6887_v60 = vor.u32 %v7682_v18, %v6884_v62  ;;  %v7685_v18 = vld [vmem:[%s11082_s5 + $0x204] sm:$0xf0] }
 0x299   : > { %3521 = vmatpush.bf16.msrb.mxu3 %v6589_v22  ;;  %v6876_v22 = vld [vmem:[%s11082_s5 + $0x1e8] sm:$0xf0] }
 0x29a   : > { %3613 = vmatpush.bf16.msra.mxu2 %v6695_v25  ;;  %v6723_v25 = vor.u32 %v7651_v33, %v6722_v16  ;;  %v6883_v33 = vor.u32 %v7683_v9, %v6882_v44 }
 0x29b   : > { %3602 = vmatpush.bf16.msra.mxu1 %v6675_v40  ;;  %v6687_v40 = vor.u32 %v7630_v26, %v6684_v63  ;;  %v7620_v26 = vld [vmem:[%s11082_s5 + $0x4] sm:$0xf] }
 0x29c   : > { %v6647_v31 = vor.u32 %v7620_v26, %v6644_v13  ;;  %v6796_v13 = vld [vmem:[%s11082_s5 + $0x168] sm:$0xf0] }
 0x29d   : > { %3717 = vmatpush.bf16.msra.mxu3 %v6763_v24  ;;  %v6879_v24 = vor.u32 %v7680_v21, %v6876_v22  ;;  %v7666_v21 = vld [vmem:[%s11082_s5 + $0x174] sm:$0xf]  ;;  %v6804_v22 = vld [vmem:[%s11082_s5 + $0x178] sm:$0xf0] }
 0x29e   : > { %3614 = vmatpush.bf16.msra.mxu2 %v6687_v40  ;;  %v6868_v40 = vld [vmem:[%s11082_s5 + $0x1d8] sm:$0xf0] }
 0x29f   : > { %3603 = vmatpush.bf16.msra.mxu1 %v6667_v39  ;;  %v6679_v39 = vor.u32 %v7628_v35, %v6676_v49 }
 0x2a1   : > { %3718 = vmatpush.bf16.msra.mxu3 %v6755_v29  ;;  %v6786_v29 = vld [vmem:[%s11082_s5 + $0x150] sm:$0xf] }
 0x2a2   : > { %3615 = vmatpush.bf16.msra.mxu2 %v6679_v39 }
 0x2a3   : > { %3604 = vmatpush.bf16.msra.mxu1 %v6659_v50  ;;  %v6738_v50 = vld [vmem:[%s11082_s5 + $0x110] sm:$0xf] }
 0x2a4   : > { %v6739_v27 = vor.u32 %v7655_v15, %v6738_v50 }
 0x2a5   : > { %3719 = vmatpush.bf16.msra.mxu3 %v6747_v2  ;;  %v7674_v2 = vld [vmem:[%s11082_s5 + $0x1b4] sm:$0xf] }
 0x2a6   : > { %3616 = vmatpush.bf16.msra.mxu2 %v6671_v11 }
 0x2a7   : > { %3605 = vmatpush.bf16.msra.mxu1 %v6651_v59  ;;  %v7653_v59 = vld [vmem:[%s11082_s5 + $0x104] sm:$0xf0] }
 0x2a8   : > { %v6731_v38 = vor.u32 %v7653_v59, %v6730_v8  ;;  %v7670_v8 = vld [vmem:[%s11082_s5 + $0x194] sm:$0xf]  ;;  %v6890_v59 = vld [vmem:[%s11082_s5 + $0x200] sm:$0xf] }
 0x2a9   : > { %3720 = vmatpush.bf16.msra.mxu3 %v6739_v27  ;;  %v6891_v7 = vor.u32 %v7685_v18, %v6890_v59 }
 0x2aa   : > { %3617 = vmatpush.bf16.msra.mxu2 %v6663_v12  ;;  %v6820_v12 = vld [vmem:[%s11082_s5 + $0x198] sm:$0xf0] }
 0x2ab   : > { %3606 = vmatpush.bf16.msra.mxu1 %v6643_v37  ;;  %v6794_v37 = vld [vmem:[%s11082_s5 + $0x160] sm:$0xf] }
 0x2ac   : > { %v6795_v63 = vor.u32 %v7665_v55, %v6794_v37  ;;  %v7681_v37 = vld [vmem:[%s11082_s5 + $0x1e4] sm:$0xf0]  ;;  %v6807_v55 = vor.u32 %v7666_v21, %v6804_v22  ;;  %v4066_v21 = vld [vmem:[%s11085_s8 + $0x60] sm:$0xff]  ;;  %v4065_v22 = vld [vmem:[%s11085_s8 + $0x58] sm:$0xff] }
 0x2ad   : > { %3721 = vmatpush.bf16.msra.mxu3 %v6731_v38 }
 0x2ae   : > { %3618 = vmatpush.bf16.msra.mxu2 %v6655_v6 }
 0x2b1   : > { %3722 = vmatpush.bf16.msra.mxu3 %v6723_v25 }
 0x2b2   : > { %3619 = vmatpush.bf16.msra.mxu2 %v6647_v31 }
 0x2b5   : > { %3723 = vmatpush.bf16.msra.mxu3 %v6715_v32  ;;  %v6867_v32 = vor.u32 %v7679_v46, %v6866_v19  ;;  %v4057_v46 = vld [vmem:[%s11085_s8 + $0x18] sm:$0xff] }
 0x2fb   : > { %v3291_v43 = vpop.f32.mrf.mxu1 }
 0x2fc   : > { %v3311_v45 = vpop.f32.mrf.mxu3  ;;  %3360 = vmatmul.f32.vlgmr.msrb.gmra.mxu0 %v3291_v43  ;;  %v7663_v43 = vld [vmem:[%s11082_s5 + $0x154] sm:$0xf0] }
 0x2fd   : > { %6567 = vmatmul.msk.f32.vlgmr.msrb.gmra.mxu1 %vm3340_vm7, %v3311_v45  ;;  %3971 = vmatpush.bf16.msrb.mxu0 %v6911_v42  ;;  %v6787_v42 = vor.u32 %v7663_v43, %v6786_v29  ;;  %v7676_v45 = vld [vmem:[%s11082_s5 + $0x1c4] sm:$0xf]  ;;  %v7677_v29 = vld [vmem:[%s11082_s5 + $0x1c4] sm:$0xf0] }
 0x2fe   : > { %3841 = vmatpush.bf16.msrb.mxu1 %v6835_v56  ;;  %v6871_v56 = vor.u32 %v7678_v48, %v6868_v40  ;;  %v6863_v30 = vor.u32 %v7676_v45, %v6860_v54  ;;  %v7662_v48 = vld [vmem:[%s11082_s5 + $0x154] sm:$0xf]  ;;  %v6788_v40 = vld [vmem:[%s11082_s5 + $0x158] sm:$0xf0] }
 0x2ff   : > { %v6791_v43 = vor.u32 %v7662_v48, %v6788_v40  ;;  %v4055_v40 = vld [vmem:[%s11085_s8 + $0x8] sm:$0xff] }
 0x301   : > { %3972 = vmatpush.bf16.msrb.mxu0 %v6903_v4  ;;  %v6836_v4 = vld [vmem:[%s11082_s5 + $0x1b8] sm:$0xf0] }
 0x302   : > { %3842 = vmatpush.bf16.msrb.mxu1 %v6827_v47  ;;  %v6839_v50 = vor.u32 %v7674_v2, %v6836_v4 }
 0x305   : > { %3973 = vmatpush.bf16.msrb.mxu0 %v6895_v58  ;;  %v6898_v58 = vld [vmem:[%s11082_s5 + $0x210] sm:$0xf] }
 0x306   : > { %3843 = vmatpush.bf16.msrb.mxu1 %v6819_v10  ;;  %v6906_v10 = vld [vmem:[%s11082_s5 + $0x220] sm:$0xf]  ;;  %v6899_v14 = vor.u32 %v7687_v3, %v6898_v58 }
 0x307   : > { %v6907_v15 = vor.u32 %v7689_v23, %v6906_v10 }
 0x309   : > { %3974 = vmatpush.bf16.msrb.mxu0 %v6887_v60  ;;  %v6823_v60 = vor.u32 %v7670_v8, %v6820_v12 }
 0x30a   : > { %3844 = vmatpush.bf16.msrb.mxu1 %v6811_v41 }
 0x30d   : > { %3975 = vmatpush.bf16.msrb.mxu0 %v6879_v24  ;;  %v6874_v24 = vld [vmem:[%s11082_s5 + $0x1e0] sm:$0xf] }
 0x30e   : > { %3845 = vmatpush.bf16.msrb.mxu1 %v6803_v20  ;;  %v6812_v20 = vld [vmem:[%s11082_s5 + $0x188] sm:$0xf0]  ;;  %v6875_v26 = vor.u32 %v7681_v37, %v6874_v24  ;;  %v4062_v37 = vld [vmem:[%s11085_s8 + $0x40] sm:$0xff] }
 0x30f   : > { %v6815_v6 = vor.u32 %v7668_v28, %v6812_v20  ;;  %v4063_v24 = vld [vmem:[%s11085_s8 + $0x48] sm:$0xff] }
 0x311   : > { %3976 = vmatpush.bf16.msrb.mxu0 %v6871_v56  ;;  %v6858_v56 = vld [vmem:[%s11082_s5 + $0x1c0] sm:$0xf] }
 0x312   : > { %3846 = vmatpush.bf16.msrb.mxu1 %v6795_v63  ;;  %v7664_v63 = vld [vmem:[%s11082_s5 + $0x164] sm:$0xf] }
 0x313   : > { %v6799_v31 = vor.u32 %v7664_v63, %v6796_v13  ;;  %v4059_v63 = vld [vmem:[%s11085_s8 + $0x28] sm:$0xff]  ;;  %v4058_v13 = vld [vmem:[%s11085_s8 + $0x20] sm:$0xff] }
 0x315   : > { %3977 = vmatpush.bf16.msrb.mxu0 %v6863_v30 }
 0x316   : > { %3847 = vmatpush.bf16.msrb.mxu1 %v6787_v42  ;;  %v6859_v42 = vor.u32 %v7677_v29, %v6858_v56 }
 0x379   : > { %v3361_v47 = vpop.f32.mrf.mxu0 }
 0x37a   : > { %v3381_v35 = vpop.f32.mrf.mxu1 }
 0x37b   : > { %v3382_v49 = vadd.f32 %v3381_v35, %v3361_v47 }
 0x37d   : > { %v3385_v52 = vrot.slane %v3382_v49, 6 }
 0x37f   : > { %v3388_v39 = vsel %vm3387_vm8, 0.0, %v3385_v52  ;;  %v3390_v61 = vsel %vm3389_vm9, %v3385_v52, 0.0 }
 0x380   : > { %v3391_v57 = vpack.c.bf16 %v3388_v39, %v3388_v39  ;;  %v10547_v0 = vpack.c.bf16 %v3390_v61, %v3388_v39 }
 0x382   : > { %v3424_v5 = vshll.u32 %v3391_v57, 16  ;;  %v3642_v34 = vrot.slane %v10547_v0, 1  ;;  %6696 = vmatmul.msk.bf16.vlgmr.msra.gmra.mxu1 %vm3232_vm3, %v3391_v57  ;;  %v3422_v36 = vshrl.u32 %v3391_v57, 16  ;;  %v3760_v17 = vshrl.u32 %v10547_v0, 16 }
 0x383   : > { %v3763_v41 = vshll.u32 %v10547_v0, 16  ;;  %v3883_v25 = vrot.slane %v10547_v0, 2 }
 0x384   : > { %v3426_v11 = vrot.slane %v3424_v5, 1  ;;  %6769 = vmatmul.msk.bf16.vlgmr.msra.gmra.mxu0 %vm3232_vm3, %v3642_v34  ;;  %v3762_v62 = vrot.slane %v3760_v17, 1 }
 0x385   : > { %v3765_v38 = vrot.slane %v3763_v41, 2 }
 0x386   : > { %v3427_v27 = vor.u32 %v3426_v11, %v3422_v36 }
 0x387   : > { %v3766_v16 = vor.u32 %v3765_v38, %v3762_v62 }
 0x388   : > { %6638 = vmatmul.msk.bf16.vlgmr.msrb.gmra.mxu2 %vm3232_vm3, %v3427_v27  ;;  %6639 = vmatmul.msk.bf16.vlgmr.msrb.gmra.mxu3 %vm3232_vm3, %v3427_v27 }
 0x389   : > { %3854 = vmatpush.bf16.msrb.mxu2 %v6839_v50  ;;  %3958 = vmatpush.bf16.msrb.mxu3 %v6907_v15  ;;  %v3985_v50 = vld [vmem:[%s11083_s6] sm:$0x3] }
 0x38a   : > { %v3987_v27 = vperm.slane %v3985_v50, 0  ;;  %v3988_v17 = vperm.slane %v3985_v50, 1 }
 0x38d   : > { %3855 = vmatpush.bf16.msrb.mxu2 %v6831_v53  ;;  %3959 = vmatpush.bf16.msrb.mxu3 %v6899_v14 }
 0x391   : > { %3856 = vmatpush.bf16.msrb.mxu2 %v6823_v60  ;;  %3960 = vmatpush.bf16.msrb.mxu3 %v6891_v7 }
 0x392   : > { %6840 = vmatmul.msk.bf16.vlgmr.msrb.gmra.mxu1 %vm3232_vm3, %v3766_v16 }
 0x394   : > { %6913 = vmatmul.msk.bf16.vlgmr.msrb.gmra.mxu0 %vm3232_vm3, %v3883_v25 }
 0x395   : > { %3857 = vmatpush.bf16.msrb.mxu2 %v6815_v6  ;;  %3961 = vmatpush.bf16.msrb.mxu3 %v6883_v33  ;;  %v4068_v6 = vld [vmem:[%s11085_s8 + $0x70] sm:$0xff]  ;;  %v4067_v33 = vld [vmem:[%s11085_s8 + $0x68] sm:$0xff] }
 0x398   : > { %6697 = vmatmul.msk.bf16.vlgmr.msra.gmra.mxu2 %vm3232_vm3, %v3391_v57  ;;  %6768 = vmatmul.msk.bf16.vlgmr.msra.gmra.mxu3 %vm3232_vm3, %v3642_v34 }
 0x399   : > { %3858 = vmatpush.bf16.msrb.mxu2 %v6807_v55  ;;  %3962 = vmatpush.bf16.msrb.mxu3 %v6875_v26  ;;  %v4061_v55 = vld [vmem:[%s11085_s8 + $0x38] sm:$0xff]  ;;  %v4060_v26 = vld [vmem:[%s11085_s8 + $0x30] sm:$0xff] }
 0x39d   : > { %3859 = vmatpush.bf16.msrb.mxu2 %v6799_v31  ;;  %3963 = vmatpush.bf16.msrb.mxu3 %v6867_v32  ;;  %v4056_v31 = vld [vmem:[%s11085_s8 + $0x10] sm:$0xff] }
 0x3a1   : > { %3860 = vmatpush.bf16.msrb.mxu2 %v6791_v43  ;;  %3964 = vmatpush.bf16.msrb.mxu3 %v6859_v42 }
 0x3a5   : > { %4074 = vmatpush.msra.mxu2 %v4068_v6  ;;  %v7701_v6 = vld [vmem:[%s11086_s9 + $0x5c] sm:$0xf0] }
 0x3a7   : > { %4075 = vmatpush.msra.mxu2 %v4067_v33  ;;  %v7700_v33 = vld [vmem:[%s11086_s9 + $0x5c] sm:$0xf] }
 0x3a8   : > { %6841 = vmatmul.msk.bf16.vlgmr.msrb.gmra.mxu2 %vm3232_vm3, %v3766_v16  ;;  %6912 = vmatmul.msk.bf16.vlgmr.msrb.gmra.mxu3 %vm3232_vm3, %v3883_v25  ;;  %v4064_v25 = vld [vmem:[%s11085_s8 + $0x50] sm:$0xff]  ;;  %vm5036_vm3 = vcmask 523264  }
 0x3a9   : > { %4076 = vmatpush.msra.mxu2 %v4066_v21 }
 0x3ab   : > { %4077 = vmatpush.msra.mxu2 %v4065_v22  ;;  %v6938_v22 = vld [vmem:[%s11086_s9 + $0x60] sm:$0xf0] }
 0x3ad   : > { %4078 = vmatpush.msra.mxu2 %v4064_v25 }
 0x3af   : > { %4079 = vmatpush.msra.mxu2 %v4063_v24  ;;  %v6941_v24 = vor.u32 %v7700_v33, %v6938_v22  ;;  %v7720_v33 = vld [vmem:[%s11088_s11 + $0x30] sm:$0xff]  ;;  %v7719_v22 = vld [vmem:[%s11088_s11 + $0x28] sm:$0xff] }
 0x3b1   : > { %4080 = vmatpush.msra.mxu2 %v4062_v37  ;;  %v7712_v37 = vld [vmem:[%s11086_s9 + $0xc4] sm:$0xf] }
 0x3b3   : > { %4081 = vmatpush.msra.mxu2 %v4061_v55  ;;  %v7031_v55 = vld [vmem:[%s11086_s9 + $0xc8] sm:$0xf0] }
 0x3b5   : > { %4082 = vmatpush.msra.mxu2 %v4060_v26 }
 0x3b7   : > { %4083 = vmatpush.msra.mxu2 %v4059_v63 }
 0x3b9   : > { %4084 = vmatpush.msra.mxu2 %v4058_v13  ;;  %v7034_v13 = vor.u32 %v7712_v37, %v7031_v55  ;;  %v7728_v37 = vld [vmem:[%s11088_s11 + $0x70] sm:$0xff]  ;;  %v7717_v55 = vld [vmem:[%s11088_s11 + $0x18] sm:$0xff] }
 0x3bb   : > { %4085 = vmatpush.msra.mxu2 %v4057_v46  ;;  %v7699_v46 = vld [vmem:[%s11086_s9 + $0x4c] sm:$0xf0] }
 0x3bd   : > { %4086 = vmatpush.msra.mxu2 %v4056_v31 }
 0x3bf   : > { %4087 = vmatpush.msra.mxu2 %v4055_v40 }
 0x3ff   : > { %v3608_v45 = vpop.f32.mrf.mxu1 }
 0x401   : > { %v3738_v54 = vpop.f32.mrf.mxu0 }
 0x407   : > { %v3610_v30 = vpop.f32.mrf.mxu1 }
 0x408   : > { %v4054_v30 = vld [vmem:[%s11085_s8] sm:$0xff] }
 0x409   : > { %v3740_v47 = vpop.f32.mrf.mxu0  ;;  %4088 = vmatpush.msra.mxu2 %v4054_v30 }
 0x40a   : > { %v10703_v47 = vld [vmem:[%s11086_s9 + $0x40] sm:$0xff] }
 0x40b   : > { %v3510_v35 = vpop.f32.mrf.mxu2  ;;  %v3523_v49 = vpop.f32.mrf.mxu3  ;;  %v4233_v26 = vunpack.c.h.b16 %v10703_v47 }
 0x40c   : > { %v3609_v23 = vadd.f32 %v3608_v45, %v3510_v35  ;;  %v4232_v35 = vunpack.c.l.b16 %v10703_v47  ;;  %v7696_v47 = vld [vmem:[%s11086_s9 + $0x34] sm:$0xf] }
 0x40d   : > { %v4243_v40 = vpack.c.b16 %v4233_v26, %v4233_v26  ;;  %v7727_v26 = vld [vmem:[%s11088_s11 + $0x68] sm:$0xff] }
 0x40f   : > { %v3849_v52 = vpop.f32.mrf.mxu1 }
 0x411   : > { %v3979_v39 = vpop.f32.mrf.mxu0 }
 0x413   : > { %v3512_v61 = vpop.f32.mrf.mxu2  ;;  %v3525_v57 = vpop.f32.mrf.mxu3 }
 0x414   : > { %v4242_v61 = vpack.c.b16 %v4232_v35, %v4232_v35  ;;  %v6986_v57 = vld [vmem:[%s11086_s9 + $0x30] sm:$0xf]  ;;  %v6988_v35 = vld [vmem:[%s11086_s9 + $0x38] sm:$0xf0] }
 0x417   : > { %v3851_v0 = vpop.f32.mrf.mxu1 }
 0x418   : > { %v7697_v0 = vld [vmem:[%s11086_s9 + $0x34] sm:$0xf0] }
 0x419   : > { %v3981_v2 = vpop.f32.mrf.mxu0 }
 0x41a   : > { %v6952_v2 = vld [vmem:[%s11086_s9 + $0x78] sm:$0xf] }
 0x41b   : > { %v3621_v4 = vpop.f32.mrf.mxu2  ;;  %v3725_v5 = vpop.f32.mrf.mxu3 }
 0x41c   : > { %v3622_v36 = vadd.f32 %v3621_v4, %v3523_v49  ;;  %v3742_v11 = vadd.f32 %v3725_v5, %v3609_v23  ;;  %v6925_v49 = vld [vmem:[%s11086_s9 + $0x88] sm:$0xff]  ;;  %v6954_v23 = vld [vmem:[%s11086_s9 + $0x80] sm:$0xf0] }
 0x41e   : > { %v3743_v15 = vadd.f32 %v3738_v54, %v3622_v36  ;;  %v3866_v51 = vadd.f32 %v3849_v52, %v3742_v11  ;;  %v4026_v54 = vld [vmem:[%s11084_s7] sm:$0x7]  ;;  %v4151_v52 = vunpack.c.l.b16 %v6925_v49  ;;  %v4255_v36 = vsel %vm4097_vm12, %v4242_v61, 0  ;;  %v7708_v61 = vld [vmem:[%s11086_s9 + $0xa4] sm:$0xf] }
 0x41f   : > { %v6987_v11 = vor.u32 %v7697_v0, %v6986_v57  ;;  %v7015_v57 = vld [vmem:[%s11086_s9 + $0xa8] sm:$0xf0] }
 0x420   : > { %v4161_v4 = vpack.c.b16 %v4151_v52, %v4151_v52  ;;  %v6991_v52 = vor.u32 %v7696_v47, %v6988_v35  ;;  %v7736_v35 = vld [vmem:[%s11088_s11 + $0xb0] sm:$0xff] }
 0x422   : > { %v4176_v50 = vsel %vm4097_vm12, %v4161_v4, 0  ;;  %v7694_v4 = vld [vmem:[%s11086_s9 + $0x24] sm:$0xf] }
 0x423   : > { %v3623_v34 = vpop.f32.mrf.mxu2  ;;  %v3727_v10 = vpop.f32.mrf.mxu3  ;;  %4184 = vmatpush.bf16.msra.mxu3 %v4176_v50 }
 0x424   : > { %v7705_v34 = vld [vmem:[%s11086_s9 + $0x7c] sm:$0xf0]  ;;  %v7704_v10 = vld [vmem:[%s11086_s9 + $0x7c] sm:$0xf] }
 0x42b   : > { %v3862_v1 = vpop.f32.mrf.mxu2  ;;  %v3966_v58 = vpop.f32.mrf.mxu3 }
 0x42c   : > { %v3867_v3 = vadd.f32 %v3862_v1, %v3743_v15  ;;  %v3983_v41 = vadd.f32 %v3966_v58, %v3866_v51  ;;  %v6978_v51 = vld [vmem:[%s11086_s9 + $0x20] sm:$0xf]  ;;  %v6953_v1 = vor.u32 %v7705_v34, %v6952_v2  ;;  %v6957_v58 = vor.u32 %v7704_v10, %v6954_v23  ;;  %v7021_v34 = vld [vmem:[%s11086_s9 + $0xb0] sm:$0xf]  ;;  %v7711_v23 = vld [vmem:[%s11086_s9 + $0xb4] sm:$0xf0] }
 0x42d   : > { %v7018_v2 = vor.u32 %v7708_v61, %v7015_v57  ;;  %v7022_v50 = vor.u32 %v7711_v23, %v7021_v34  ;;  %v7740_v61 = vld [vmem:[%s11088_s11 + $0xd0] sm:$0xff]  ;;  %v4380_v57 = vld [vmem:[%s11087_s10] sm:$0x3] }
 0x42e   : > { %v3984_v53 = vadd.f32 %v3979_v39, %v3867_v3  ;;  %v3991_v14 = vadd.f32 %v3987_v27, %v3983_v41  ;;  %v4152_v39 = vunpack.c.h.b16 %v6925_v49  ;;  %v7695_v27 = vld [vmem:[%s11086_s9 + $0x24] sm:$0xf0]  ;;  %4185 = vmatpush.bf16.msra.mxu3 %v6953_v1  ;;  %v7693_v41 = vld [vmem:[%s11086_s9 + $0x14] sm:$0xf0]  ;;  %v7029_v49 = vld [vmem:[%s11086_s9 + $0xc0] sm:$0xf] }
 0x42f   : > { %v6979_v3 = vor.u32 %v7695_v27, %v6978_v51  ;;  %v6972_v51 = vld [vmem:[%s11086_s9 + $0x18] sm:$0xf0]  ;;  %v7013_v27 = vld [vmem:[%s11086_s9 + $0xa0] sm:$0xf]  ;;  %v7709_v1 = vld [vmem:[%s11086_s9 + $0xa4] sm:$0xf0] }
 0x430   : > { %v3992_v8 = vadd.f32 %v3988_v17, %v3984_v53  ;;  %v3993_v12 = vmax.f32 %v3991_v14, 0.0  ;;  %v4162_v5 = vpack.c.b16 %v4152_v39, %v4152_v39  ;;  %v6970_v17 = vld [vmem:[%s11086_s9 + $0x10] sm:$0xf]  ;;  %v7713_v39 = vld [vmem:[%s11086_s9 + $0xc4] sm:$0xf0] }
 0x431   : > { %v6971_v53 = vor.u32 %v7693_v41, %v6970_v17  ;;  %v7030_v0 = vor.u32 %v7713_v39, %v7029_v49  ;;  %v7014_v17 = vor.u32 %v7709_v1, %v7013_v27  ;;  %v7690_v41 = vld [vmem:[%s11086_s9 + $0x4] sm:$0xf]  ;;  %v7735_v39 = vld [vmem:[%s11088_s11 + $0xa8] sm:$0xff] }
 0x432   : > { %v3994_v59 = vmax.f32 %v3992_v8, 0.0  ;;  %v3997_v18 = vrot.slane %v3993_v12, 1  ;;  %v4003_v7 = vrot.slane %v3993_v12, 2  ;;  %v4179_v15 = vsel %vm4097_vm12, %v4162_v5, 0  ;;  %v6944_v8 = vld [vmem:[%s11086_s9 + $0x68] sm:$0xf] }
 0x433   : > { %v3864_v62 = vpop.f32.mrf.mxu2  ;;  %v3968_v38 = vpop.f32.mrf.mxu3  ;;  %4197 = vmatpush.bf16.msra.mxu0 %v4179_v15  ;;  %v6980_v5 = vld [vmem:[%s11086_s9 + $0x28] sm:$0xf0]  ;;  %v7692_v15 = vld [vmem:[%s11086_s9 + $0x14] sm:$0xf] }
 0x434   : > { %v4001_v60 = vmax.f32 %v3993_v12, %v3997_v18  ;;  %v3998_v28 = vrot.slane %v3994_v59, 1  ;;  %v4004_v9 = vrot.slane %v3994_v59, 2  ;;  %v7703_v12 = vld [vmem:[%s11086_s9 + $0x6c] sm:$0xf0]  ;;  %v6946_v62 = vld [vmem:[%s11086_s9 + $0x70] sm:$0xf0]  ;;  %v6983_v10 = vor.u32 %v7694_v4, %v6980_v5 }
 0x435   : > { %v6945_v18 = vor.u32 %v7703_v12, %v6944_v8  ;;  %v7002_v38 = vld [vmem:[%s11086_s9 + $0xd0] sm:$0xff]  ;;  %v7707_v12 = vld [vmem:[%s11086_s9 + $0x94] sm:$0xf0]  ;;  %v4382_v5 = vperm.slane %v4380_v57, 0 }
 0x436   : > { %v4007_v20 = vmax.f32 %v4001_v60, %v4003_v7  ;;  %v4002_v44 = vmax.f32 %v3994_v59, %v3998_v28  ;;  %v7702_v59 = vld [vmem:[%s11086_s9 + $0x6c] sm:$0xf]  ;;  %v6962_v7 = vld [vmem:[%s11086_s9] sm:$0xf]  ;;  %v7691_v28 = vld [vmem:[%s11086_s9 + $0x4] sm:$0xf0]  ;;  %v4323_v63 = vunpack.c.l.b16 %v7002_v38 }
 0x437   : > { %4198 = vmatpush.bf16.msra.mxu0 %v6957_v58  ;;  %v6949_v60 = vor.u32 %v7702_v59, %v6946_v62  ;;  %4186 = vmatpush.bf16.msra.mxu3 %v6945_v18 }
 0x438   : > { %4019 = vrot.lane.b32.xlu0 %v4007_v20, %s7883_s3  ;;  %4011 = vrot.lane.b32.xlu1 %v4007_v20, %s7884_s24  ;;  %v4008_v16 = vmax.f32 %v4002_v44, %v4004_v9  ;;  %v6963_v44 = vor.u32 %v7691_v28, %v6962_v7 }
 0x43a   : > { %4013 = vrot.lane.b32.xlu2 %v4008_v16, %s7884_s24  ;;  %s594_s24 = scalar_lea.vmem [#allocation2], %s593_s22 }
 0x43b   : > { %4199 = vmatpush.bf16.msra.mxu0 %v6949_v60  ;;  %s5067_s2 = sshll.u32 %s594_s24, 4  ;;  %s5068_s2 = int_to_ptr.vmem [resolvable:$true] %s5067_s2 }
 0x43f   : > { %4200 = vmatpush.bf16.msra.mxu0 %v6941_v24  ;;  %v7718_v24 = vld [vmem:[%s11088_s11 + $0x20] sm:$0xff] }
 0x440   : > { %4021 = vrot.lane.b32.xlu1 %v4008_v16, %s7883_s3  ;;  %v6936_v16 = vld [vmem:[%s11086_s9 + $0x58] sm:$0xf]  ;;  %s11126_s3 = sld [smem:[#allocation17_spill]] }
 0x441   : > { %v6937_v21 = vor.u32 %v7701_v6, %v6936_v16  ;;  %v7721_v6 = vld [vmem:[%s11088_s11 + $0x38] sm:$0xff] }
 0x443   : > { %4187 = vmatpush.bf16.msra.mxu3 %v6937_v21  ;;  %v7730_v21 = vld [vmem:[%s11088_s11 + $0x80] sm:$0xff] }
 0x444   : > { %4512 = vmatpush.bf16.msrb.mxu2 %v7730_v21 }
 0x494   : > { %v4014_v32 = vpop.permute.xlu2 %4013 }
 0x4aa   : > { %v4012_v19 = vpop.permute.xlu1 %4011  ;;  %v4020_v56 = vpop.permute.xlu0 %4019 }
 0x4ab   : > { %v4016_v48 = vsel %vm4015_vm10, %v4012_v19, %v4014_v32  ;;  %v6928_v19 = vld [vmem:[%s11086_s9 + $0x48] sm:$0xf]  ;;  %v7698_v32 = vld [vmem:[%s11086_s9 + $0x4c] sm:$0xf] }
 0x4ac   : > { %v4018_v29 = vmax.f32 %v4007_v20, %v4016_v48  ;;  %v4324_v20 = vunpack.c.h.b16 %v7002_v38  ;;  %v6929_v31 = vor.u32 %v7699_v46, %v6928_v19  ;;  %v6930_v48 = vld [vmem:[%s11086_s9 + $0x50] sm:$0xf0]  ;;  %v7715_v19 = vld [vmem:[%s11088_s11 + $0x8] sm:$0xff]  ;;  %v7725_v46 = vld [vmem:[%s11088_s11 + $0x58] sm:$0xff] }
 0x4ae   : > { %v4334_v9 = vpack.c.b16 %v4324_v20, %v4324_v20  ;;  %4188 = vmatpush.bf16.msra.mxu3 %v6929_v31  ;;  %v7714_v31 = vld [vmem:[%s11088_s11] sm:$0xff] }
 0x4b0   : > { %v4350_v25 = vsel %vm4097_vm12, %v4334_v9, 0 }
 0x4b2   : > { %v4022_v43 = vpop.permute.xlu1 %4021 }
 0x4b3   : > { %v4023_v42 = vsel %vm3340_vm7, %v4020_v56, %v4022_v43  ;;  %v4333_v56 = vpack.c.b16 %v4323_v63, %v4323_v63  ;;  %v7710_v43 = vld [vmem:[%s11086_s9 + $0xb4] sm:$0xf] }
 0x4b4   : > { %v4025_v45 = vmax.f32 %v4018_v29, %v4023_v42  ;;  %v6933_v29 = vor.u32 %v7698_v32, %v6930_v48  ;;  %v7023_v42 = vld [vmem:[%s11086_s9 + $0xb8] sm:$0xf0]  ;;  %v7716_v63 = vld [vmem:[%s11088_s11 + $0x10] sm:$0xff]  ;;  %v7731_v48 = vld [vmem:[%s11088_s11 + $0x88] sm:$0xff] }
 0x4b5   : > { %v7026_v30 = vor.u32 %v7710_v43, %v7023_v42  ;;  %v7738_v43 = vld [vmem:[%s11088_s11 + $0xc0] sm:$0xff] }
 0x4b6   : > { %6914 = vmatpush.msk.msra.mxu1 %vm3267_vm5, %v4025_v45  ;;  %v4258_v45 = vsel %vm4097_vm12, %v4243_v40, 0  ;;  %4201 = vmatpush.bf16.msra.mxu0 %v6933_v29  ;;  %v7724_v40 = vld [vmem:[%s11088_s11 + $0x50] sm:$0xff]  ;;  %v7723_v29 = vld [vmem:[%s11088_s11 + $0x48] sm:$0xff] }
 0x4b7   : > { %6915 = vmatmul.msk.f32.vlgmr.msra.gmra.mxu1 %vm4027_vm11, %v4026_v54  ;;  %v4347_v54 = vsel %vm4097_vm12, %v4333_v56, 0  ;;  %4276 = vmatpush.bf16.msrb.mxu3 %v4258_v45  ;;  %v7739_v56 = vld [vmem:[%s11088_s11 + $0xc8] sm:$0xff]  ;;  %v7722_v45 = vld [vmem:[%s11088_s11 + $0x40] sm:$0xff] }
 0x4b8   : > { %4263 = vmatpush.bf16.msrb.mxu1 %v4255_v36  ;;  %v7706_v36 = vld [vmem:[%s11086_s9 + $0x94] sm:$0xf] }
 0x4ba   : > { %4355 = vmatpush.bf16.msrb.mxu0 %v4347_v54 }
 0x4bb   : > { %4277 = vmatpush.bf16.msrb.mxu3 %v6991_v52 }
 0x4bc   : > { %4264 = vmatpush.bf16.msrb.mxu1 %v6987_v11  ;;  %v7007_v11 = vld [vmem:[%s11086_s9 + $0x98] sm:$0xf0] }
 0x4bd   : > { %v7010_v58 = vor.u32 %v7706_v36, %v7007_v11  ;;  %v7733_v11 = vld [vmem:[%s11088_s11 + $0x98] sm:$0xff] }
 0x4be   : > { %4356 = vmatpush.bf16.msrb.mxu0 %v7030_v0  ;;  %v7734_v0 = vld [vmem:[%s11088_s11 + $0xa0] sm:$0xff] }
 0x4bf   : > { %4278 = vmatpush.bf16.msrb.mxu3 %v6983_v10 }
 0x4c0   : > { %4265 = vmatpush.bf16.msrb.mxu1 %v6979_v3  ;;  %v6975_v3 = vor.u32 %v7692_v15, %v6972_v51  ;;  %v7732_v15 = vld [vmem:[%s11088_s11 + $0x90] sm:$0xff] }
 0x4c2   : > { %4357 = vmatpush.bf16.msrb.mxu0 %v7022_v50 }
 0x4c3   : > { %4279 = vmatpush.bf16.msrb.mxu3 %v6975_v3 }
 0x4c4   : > { %4266 = vmatpush.bf16.msrb.mxu1 %v6971_v53  ;;  %v6964_v53 = vld [vmem:[%s11086_s9 + $0x8] sm:$0xf0] }
 0x4c5   : > { %v6967_v8 = vor.u32 %v7690_v41, %v6964_v53 }
 0x4c6   : > { %4358 = vmatpush.bf16.msrb.mxu0 %v7014_v17 }
 0x4c7   : > { %4280 = vmatpush.bf16.msrb.mxu3 %v6967_v8 }
 0x4c8   : > { %4267 = vmatpush.bf16.msrb.mxu1 %v6963_v44 }
 0x4cc   : > { %4368 = vmatpush.bf16.msra.mxu1 %v4350_v25  ;;  %v7729_v25 = vld [vmem:[%s11088_s11 + $0x78] sm:$0xff] }
 0x4cd   : > { %4513 = vmatpush.bf16.msrb.mxu2 %v7729_v25 }
 0x4d0   : > { %4369 = vmatpush.bf16.msra.mxu1 %v7034_v13  ;;  %v7726_v13 = vld [vmem:[%s11088_s11 + $0x60] sm:$0xff] }
 0x4d1   : > { %4514 = vmatpush.bf16.msrb.mxu2 %v7728_v37  ;;  %v7758_v37 = vld [vmem:[%s11090_s13 + $0x88] sm:$0xff] }
 0x4d4   : > { %4370 = vmatpush.bf16.msra.mxu1 %v7026_v30  ;;  %v7737_v30 = vld [vmem:[%s11088_s11 + $0xb8] sm:$0xff] }
 0x4d5   : > { %4515 = vmatpush.bf16.msrb.mxu2 %v7727_v26  ;;  %v7745_v26 = vld [vmem:[%s11090_s13 + $0x20] sm:$0xff] }
 0x4d8   : > { %4371 = vmatpush.bf16.msra.mxu1 %v7018_v2 }
 0x4d9   : > { %4516 = vmatpush.bf16.msrb.mxu2 %v7726_v13 }
 0x4dc   : > { %4372 = vmatpush.bf16.msra.mxu1 %v7010_v58  ;;  %v4383_v58 = vperm.slane %v4380_v57, 1 }
 0x4dd   : > { %4517 = vmatpush.bf16.msrb.mxu2 %v7725_v46  ;;  %v7751_v46 = vld [vmem:[%s11090_s13 + $0x50] sm:$0xff] }
 0x4e1   : > { %4518 = vmatpush.bf16.msrb.mxu2 %v7724_v40 }
 0x4e5   : > { %4519 = vmatpush.bf16.msrb.mxu2 %v7723_v29  ;;  %v7755_v29 = vld [vmem:[%s11090_s13 + $0x70] sm:$0xff] }
 0x534   : > { %v4051_v14 = vpop.f32.mrf.mxu1 }
 0x535   : > { %6916 = vmatmul.msk.f32.vlgmr.msra.gmra.mxu2 %vm4069_vm13, %v4051_v14  ;;  %v7005_v14 = vld [vmem:[%s11086_s9 + $0x90] sm:$0xf] }
 0x536   : > { %v7006_v59 = vor.u32 %v7707_v12, %v7005_v14  ;;  %4721 = vmatpush.bf16.msra.mxu2 %v7740_v61  ;;  %v7747_v61 = vld [vmem:[%s11090_s13 + $0x30] sm:$0xff] }
 0x538   : > { %4359 = vmatpush.bf16.msrb.mxu0 %v7006_v59 }
 0x5b8   : > { %v4090_v18 = vpop.f32.mrf.mxu2 }
 0x5b9   : > { %v4094_v62 = vrot.slane %v4090_v18, 7 }
 0x5bb   : > { %v4096_v38 = vsel %vm3389_vm9, 0.0, %v4094_v62 }
 0x5bc   : > { %v4098_v60 = vsel %vm4097_vm12, %v4096_v38, 0.0 }
 0x5bd   : > { %v4099_v7 = vpack.c.bf16 %v4098_v60, %v4098_v60 }
 0x5bf   : > { %v4122_v28 = vshll.u32 %v4099_v7, 16  ;;  %6992 = vmatmul.msk.bf16.vlgmr.msrb.gmra.mxu1 %vm4171_vm14, %v4099_v7  ;;  %v4120_v20 = vshrl.u32 %v4099_v7, 16  ;;  %v4297_v16 = vrot.slane %v4099_v7, 1 }
 0x5c0   : > { %4614 = vmatpush.bf16.msrb.mxu1 %v7722_v45  ;;  %v7749_v45 = vld [vmem:[%s11090_s13 + $0x40] sm:$0xff] }
 0x5c1   : > { %v4124_v44 = vrot.slane %v4122_v28, 1 }
 0x5c3   : > { %v4125_v9 = vor.u32 %v4124_v44, %v4120_v20 }
 0x5c5   : > { %6958 = vmatmul.msk.bf16.vlgmr.msra.gmra.mxu3 %vm4171_vm14, %v4125_v9  ;;  %6959 = vmatmul.msk.bf16.vlgmr.msra.gmra.mxu0 %vm4171_vm14, %v4125_v9 }
 0x5c6   : > { %4594 = vmatpush.bf16.msra.mxu0 %v7721_v6  ;;  %4532 = vmatpush.bf16.msra.mxu3 %v7731_v48  ;;  %v7743_v48 = vld [vmem:[%s11090_s13 + $0x10] sm:$0xff] }
 0x5ca   : > { %4595 = vmatpush.bf16.msra.mxu0 %v7720_v33 }
 0x5ce   : > { %4596 = vmatpush.bf16.msra.mxu0 %v7719_v22 }
 0x5cf   : > { %7036 = vmatmul.msk.bf16.vlgmr.msra.gmra.mxu1 %vm4171_vm14, %v4297_v16 }
 0x5d2   : > { %4597 = vmatpush.bf16.msra.mxu0 %v7718_v24  ;;  %v7746_v24 = vld [vmem:[%s11090_s13 + $0x28] sm:$0xff] }
 0x5d5   : > { %6993 = vmatmul.msk.bf16.vlgmr.msrb.gmra.mxu3 %vm4171_vm14, %v4099_v7  ;;  %7035 = vmatmul.msk.bf16.vlgmr.msrb.gmra.mxu0 %vm4171_vm14, %v4297_v16 }
 0x5d6   : > { %4598 = vmatpush.bf16.msra.mxu0 %v7717_v55  ;;  %4701 = vmatpush.bf16.msrb.mxu3 %v7739_v56  ;;  %v7752_v55 = vld [vmem:[%s11090_s13 + $0x58] sm:$0xff]  ;;  %v7750_v56 = vld [vmem:[%s11090_s13 + $0x48] sm:$0xff] }
 0x5d7   : > { %4813 = vmatpush.bf16.msra.mxu1 %v7752_v55  ;;  %v7759_v55 = vld [vmem:[%s11092_s15] sm:$0xff] }
 0x5da   : > { %4599 = vmatpush.bf16.msra.mxu0 %v7716_v63  ;;  %4702 = vmatpush.bf16.msrb.mxu3 %v7738_v43  ;;  %v7757_v63 = vld [vmem:[%s11090_s13 + $0x80] sm:$0xff]  ;;  %v7742_v43 = vld [vmem:[%s11090_s13 + $0x8] sm:$0xff] }
 0x5db   : > { %4814 = vmatpush.bf16.msra.mxu1 %v7751_v46 }
 0x5de   : > { %4600 = vmatpush.bf16.msra.mxu0 %v7715_v19  ;;  %4703 = vmatpush.bf16.msrb.mxu3 %v7737_v30  ;;  %v7744_v19 = vld [vmem:[%s11090_s13 + $0x18] sm:$0xff]  ;;  %v7741_v30 = vld [vmem:[%s11090_s13] sm:$0xff] }
 0x5df   : > { %4815 = vmatpush.bf16.msra.mxu1 %v7750_v56  ;;  %v4971_v56 = vld [vmem:[%s11093_s16] sm:$0x1] }
 0x5e2   : > { %4601 = vmatpush.bf16.msra.mxu0 %v7714_v31  ;;  %4704 = vmatpush.bf16.msrb.mxu3 %v7736_v35  ;;  %v7756_v31 = vld [vmem:[%s11090_s13 + $0x78] sm:$0xff] }
 0x5e3   : > { %4816 = vmatpush.bf16.msra.mxu1 %v7749_v45  ;;  %v7748_v35 = vld [vmem:[%s11090_s13 + $0x38] sm:$0xff] }
 0x5e6   : > { %4705 = vmatpush.bf16.msrb.mxu3 %v7735_v39  ;;  %4864 = vmatpush.bf16.msrb.mxu0 %v7746_v24 }
 0x5e7   : > { %4817 = vmatpush.bf16.msra.mxu1 %v7748_v35 }
 0x5ea   : > { %4706 = vmatpush.bf16.msrb.mxu3 %v7734_v0  ;;  %4865 = vmatpush.bf16.msrb.mxu0 %v7745_v26  ;;  %v7764_v26 = vld [vmem:[%s11094_s17 + $0x18] sm:$0xff] }
 0x5eb   : > { %4818 = vmatpush.bf16.msra.mxu1 %v7747_v61 }
 0x5ee   : > { %4707 = vmatpush.bf16.msrb.mxu3 %v7733_v11  ;;  %4866 = vmatpush.bf16.msrb.mxu0 %v7744_v19 }
 0x5f2   : > { %4708 = vmatpush.bf16.msrb.mxu3 %v7732_v15  ;;  %4867 = vmatpush.bf16.msrb.mxu0 %v7743_v48  ;;  %v7762_v48 = vld [vmem:[%s11094_s17 + $0x8] sm:$0xff] }
 0x5f6   : > { %4868 = vmatpush.bf16.msrb.mxu0 %v7742_v43 }
 0x5fa   : > { %4869 = vmatpush.bf16.msrb.mxu0 %v7741_v30  ;;  %v5011_v30 = vld [vmem:[%s11126_s3] sm:$0x1] }
 0x63c   : > { %v4269_v32 = vpop.f32.mrf.mxu1 }
 0x642   : > { %v4203_v42 = vpop.f32.mrf.mxu0 }
 0x644   : > { %v4271_v54 = vpop.f32.mrf.mxu1 }
 0x645   : > { %v7754_v54 = vld [vmem:[%s11090_s13 + $0x68] sm:$0xff] }
 0x648   : > { %v4190_v47 = vpop.f32.mrf.mxu3 }
 0x649   : > { %v4270_v4 = vadd.f32 %v4269_v32, %v4190_v47 }
 0x64a   : > { %v4205_v49 = vpop.f32.mrf.mxu0 }
 0x64b   : > { %v7753_v49 = vld [vmem:[%s11090_s13 + $0x60] sm:$0xff] }
 0x64c   : > { %v4374_v52 = vpop.f32.mrf.mxu1 }
 0x650   : > { %v4192_v2 = vpop.f32.mrf.mxu3 }
 0x652   : > { %v4361_v34 = vpop.f32.mrf.mxu0 }
 0x653   : > { %v4378_v10 = vadd.f32 %v4361_v34, %v4270_v4 }
 0x654   : > { %v4376_v23 = vpop.f32.mrf.mxu1 }
 0x655   : > { %v4386_v36 = vadd.f32 %v4382_v5, %v4378_v10 }
 0x657   : > { %v4388_v50 = vmax.f32 %v4386_v36, 0.0  ;;  %v7815_v36 = vld [vmem:[%s11089_s12] ss:$0 sm:$0xff] }
 0x658   : > { %v4282_v51 = vpop.f32.mrf.mxu3 }
 0x659   : > { %v4392_v27 = vrot.slane %v4388_v50, 7  ;;  %v4283_v1 = vadd.f32 %v4282_v51, %v4203_v42 }
 0x65a   : > { %v4363_v3 = vpop.f32.mrf.mxu0 }
 0x65b   : > { %v4396_v17 = vsel %vm3389_vm9, 0.0, %v4392_v27  ;;  %v4379_v41 = vadd.f32 %v4374_v52, %v4283_v1 }
 0x65c   : > { %v4398_v53 = vsel %vm4097_vm12, %v4396_v17, 0.0  ;;  %v7129_v14 = vpack.c.bf16 %v4396_v17, %v4396_v17 }
 0x65d   : > { %v4400_v8 = vpack.c.bf16 %v4398_v53, %v4398_v53  ;;  %v4387_v12 = vadd.f32 %v4383_v58, %v4379_v41 }
 0x65e   : > { %7130 = vmatmul.msk.bf16.vlgmr.msra.gmra.mxu0 %vm7128_vm15, %v7129_v14 }
 0x65f   : > { %v4442_v59 = vshll.u32 %v4400_v8, 16  ;;  %v4389_v18 = vmax.f32 %v4387_v12, 0.0  ;;  %v4440_v38 = vshrl.u32 %v4400_v8, 16  ;;  %v4641_v25 = vrot.slane %v4400_v8, 1 }
 0x660   : > { %v4284_v62 = vpop.f32.mrf.mxu3 }
 0x661   : > { %v4444_v60 = vrot.slane %v4442_v59, 1  ;;  %v4393_v7 = vrot.slane %v4389_v18, 7  ;;  %v7816_v62 = vld [vmem:[%s11091_s14] ss:$0 sm:$0xff] }
 0x663   : > { %v4397_v28 = vsel %vm3389_vm9, 0.0, %v4393_v7  ;;  %v4445_v20 = vor.u32 %v4444_v60, %v4440_v38 }
 0x664   : > { %v4399_v44 = vsel %vm4097_vm12, %v4397_v28, 0.0 }
 0x665   : > { %v4401_v9 = vpack.c.bf16 %v4399_v44, %v4399_v44  ;;  %4520 = vmatmul.bf16.vlgmr.msrb.gmra.mxu2 %v4445_v20 }
 0x666   : > { %4931 = vmatpush.bf16.msrb.mxu2 %v7758_v37  ;;  %v7760_v37 = vld [vmem:[%s11092_s15 + $0x8] sm:$0xff] }
 0x667   : > { %v4449_v16 = vshll.u32 %v4401_v9, 16  ;;  %7131 = vmatmul.msk.bf16.vlgmr.msrb.gmra.mxu1 %vm4508_vm0, %v4401_v9  ;;  %v4447_v6 = vshrl.u32 %v4401_v9, 16  ;;  %v4642_v22 = vrot.slane %v4401_v9, 1 }
 0x668   : > { %4994 = vmatpush.bf16.msrb.mxu1 %v7760_v37 }
 0x669   : > { %v4451_v33 = vrot.slane %v4449_v16, 1 }
 0x66a   : > { %4932 = vmatpush.bf16.msrb.mxu2 %v7757_v63  ;;  %v7763_v63 = vld [vmem:[%s11094_s17 + $0x10] sm:$0xff] }
 0x66b   : > { %v4452_v21 = vor.u32 %v4451_v33, %v4447_v6 }
 0x66c   : > { %4995 = vmatpush.bf16.msrb.mxu1 %v7759_v55 }
 0x66d   : > { %7091 = vmatmul.msk.bf16.vlgmr.msra.gmra.mxu3 %vm4508_vm0, %v4452_v21 }
 0x66e   : > { %4933 = vmatpush.bf16.msrb.mxu2 %v7756_v31  ;;  %5044 = vmatpush.bf16.msra.mxu3 %v7764_v26 }
 0x672   : > { %4934 = vmatpush.bf16.msrb.mxu2 %v7755_v29  ;;  %5045 = vmatpush.bf16.msra.mxu3 %v7763_v63 }
 0x675   : > { %7186 = vmatmul.msk.bf16.vlgmr.msra.gmra.mxu2 %vm4508_vm0, %v4642_v22 }
 0x676   : > { %4935 = vmatpush.bf16.msrb.mxu2 %v7754_v54  ;;  %5046 = vmatpush.bf16.msra.mxu3 %v7762_v48 }
 0x67a   : > { %4936 = vmatpush.bf16.msrb.mxu2 %v7753_v49 }
 0x67d   : > { %4709 = vmatmul.bf16.vlgmr.msrb.gmra.mxu3 %v4641_v25 }
 0x6db   : > { %v4603_v13 = vpop.f32.mrf.mxu0 }
 0x6e3   : > { %v4605_v32 = vpop.f32.mrf.mxu0 }
 0x6e4   : > { %v4616_v40 = vpop.f32.mrf.mxu1 }
 0x6e8   : > { %v4521_v42 = vpop.f32.mrf.mxu2 }
 0x6ec   : > { %v4618_v47 = vpop.f32.mrf.mxu1 }
 0x6f0   : > { %v4523_v52 = vpop.f32.mrf.mxu2  ;;  %v4534_v39 = vpop.f32.mrf.mxu3 }
 0x6f1   : > { %v4535_v2 = vadd.f32 %v4534_v39, %v4521_v42 }
 0x6f3   : > { %v4604_v4 = vadd.f32 %v4603_v13, %v4535_v2 }
 0x6f5   : > { %v4617_v10 = vadd.f32 %v4616_v40, %v4604_v4  ;;  %v7761_v40 = vld [vmem:[%s11094_s17] sm:$0xff] }
 0x6f6   : > { %5047 = vmatpush.bf16.msra.mxu3 %v7761_v40 }
 0x6f8   : > { %v4536_v57 = vpop.f32.mrf.mxu3  ;;  %v4723_v0 = vpop.f32.mrf.mxu2 }
 0x700   : > { %v4710_v5 = vpop.f32.mrf.mxu3  ;;  %v4725_v34 = vpop.f32.mrf.mxu2 }
 0x701   : > { %v4724_v23 = vadd.f32 %v4723_v0, %v4710_v5 }
 0x703   : > { %v4727_v11 = vadd.f32 %v4724_v23, %v4617_v10 }
 0x705   : > { %v4732_v50 = vadd.f32 %v7815_v36, %v4727_v11 }
 0x707   : > { %v4733_v15 = vmax.f32 %v4732_v50, 0.0 }
 0x708   : > { %v4712_v51 = vpop.f32.mrf.mxu3 }
 0x709   : > { %v4735_v27 = vrot.slane %v4733_v15, 7 }
 0x70b   : > { %v4737_v1 = vsel %vm3389_vm9, 0.0, %v4735_v27 }
 0x70c   : > { %v4738_v58 = vsel %vm4097_vm12, %v4737_v1, 0.0 }
 0x70d   : > { %v4739_v3 = vpack.c.bf16 %v4738_v58, %v4738_v58 }
 0x70f   : > { %v4768_v17 = vshll.u32 %v4739_v3, 16  ;;  %v4889_v41 = vrot.slane %v4739_v3, 1  ;;  %7248 = vmatmul.msk.bf16.vlgmr.msrb.gmra.mxu0 %vm3251_vm4, %v4739_v3  ;;  %v4766_v53 = vshrl.u32 %v4739_v3, 16 }
 0x711   : > { %v4770_v14 = vrot.slane %v4768_v17, 1  ;;  %7285 = vmatmul.msk.bf16.vlgmr.msrb.gmra.mxu2 %vm3251_vm4, %v4889_v41 }
 0x713   : > { %v4771_v8 = vor.u32 %v4770_v14, %v4766_v53 }
 0x715   : > { %7223 = vmatmul.msk.bf16.vlgmr.msra.gmra.mxu1 %vm3251_vm4, %v4771_v8  ;;  %vm5054_vm4 = vcmask 516096  }
 0x78c   : > { %v4871_v12 = vpop.f32.mrf.mxu0 }
 0x792   : > { %v4820_v59 = vpop.f32.mrf.mxu1 }
 0x793   : > { %v4872_v18 = vadd.f32 %v4871_v12, %v4820_v59 }
 0x794   : > { %v4873_v38 = vpop.f32.mrf.mxu0  ;;  %v4938_v60 = vpop.f32.mrf.mxu2 }
 0x795   : > { %v4942_v7 = vadd.f32 %v4938_v60, %v4872_v18 }
 0x797   : > { %v4947_v28 = vadd.f32 %v7816_v62, %v4942_v7 }
 0x799   : > { %v4948_v20 = vmax.f32 %v4947_v28, 0.0 }
 0x79a   : > { %v4822_v44 = vpop.f32.mrf.mxu1 }
 0x79b   : > { %v4950_v9 = vsel %vm4949_vm1, %v4948_v20, -inf }
 0x79c   : > { %v4951_v16 = vrot.slane %v4950_v9, 4  ;;  %v4940_v6 = vpop.f32.mrf.mxu2 }
 0x79e   : > { %v4952_v33 = vmax.f32 %v4950_v9, %v4951_v16 }
 0x7a0   : > { %v4953_v21 = vrot.slane %v4952_v33, 2 }
 0x7a2   : > { %v4954_v22 = vmax.f32 %v4952_v33, %v4953_v21 }
 0x7a4   : > { %v4955_v25 = vrot.slane %v4954_v22, 1 }
 0x7a6   : > { %v4956_v24 = vmax.f32 %v4954_v22, %v4955_v25 }
 0x7a8   : > { %4962 = vrot.lane.b32.xlu0 %v4956_v24, %s7885_s28  ;;  %4958 = vrot.lane.b32.xlu2 %v4956_v24, %s7882_s27  ;;  %s5057_s28 = scalar_lea.sflag [#allocation3], %s593_s22 }
 0x802   : > { %v4959_v13 = vpop.permute.xlu2 %4958 }
 0x803   : > { %v4961_v19 = vmax.f32 %v4956_v24, %v4959_v13 }
 0x81a   : > { %v4963_v46 = vpop.permute.xlu0 %4962 }
 0x81b   : > { %v4965_v31 = vmax.f32 %v4961_v19, %v4963_v46 }
 0x81d   : > { %v4966_v32 = vpack.c.bf16 %v4965_v31, %v4965_v31 }
 0x81f   : > { %7294 = vmatmul.msk.bf16.vlgmr.msrb.gmra.mxu1 %vm4984_vm2, %v4966_v32 }
 0x89c   : > { %v4997_v29 = vpop.f32.mrf.mxu1 }
 0x89d   : > { %v4998_v43 = vadd.f32 %v4997_v29, %v4971_v56 }
 0x89f   : > { %v5001_v42 = vmax.f32 %v4998_v43, 0.0 }
 0x8a1   : > { %v5002_v45 = vpack.c.bf16 %v5001_v42, %v5001_v42 }
 0x8a3   : > { %7311 = vmatmul.msk.bf16.vlgmr.msra.gmra.mxu3 %vm5036_vm3, %v5002_v45 }
 0x8a4   : > { %v4999_v54 = vpop.f32.mrf.mxu1 }
 0x926   : > { %v5049_v47 = vpop.f32.mrf.mxu3 }
 0x927   : > { %v5050_v35 = vadd.f32 %v5049_v47, %v5011_v30 }
 0x929   : > { %v5053_v49 = vmax.f32 %v5050_v35, 0.0 }
 0x92b   : > { %5055 = vst.msk [vmem:[%s594_s24] sm:$0x1] %vm5054_vm4, %v5053_v49 }
 0x92c   : > { %7844 = shalt.err (!%p7841_p3)
}
 0x92d   : > { %7766 = dma.vmem_to_hbm [thread:$0]  (%p8024_p5), %s5068_s2, 16, %s5070_s0, %s5057_s28  }
 0x92e   : > { %v5051_v52 = vpop.f32.mrf.mxu3 }
 0x92f PF: > { %s11128_s22 = sld [smem:[#allocation7_spill]] }
 0x930   : > { %s11129_s3 = sld [smem:[#allocation5_spill]] }
 0x935   : > { %p7772_p4 = scmp.ge.s32.totalorder %s11128_s22, 2 }
 0x936   : > { %s5081_s4 = sand.u32 1, %s11129_s3  }
 0x937   : > { %p7769_p7 = pnand %p7772_p4, %p8028_p6  ;;  %s5082_s1 = scalar_lea.sflag [#allocation3], %s5081_s4 }
 0x939   : > { %p7770_p8 = pneg %p7769_p7 }
 0x93b   : > { %7862 = dma.done.wait (%p7770_p8), %s5082_s1, 16  }
 0x93c   : > { %7864 = vsyncadd (%p7770_p8), %s5082_s1, 4294967280  ;;  %s11131_s21 = sld [smem:[#allocation8_spill]]  ;;  %s11134_s0 = smov %s7871_s30 }
 0x93d   : > { %s11132_s25 = sld [smem:[#allocation6_spill]] }
 0x93e   : > { %s11133_s20 = sld [smem:[#allocation9_spill]] }
 0x942   : > { %p29_p9 = scmp.ge.s32.totalorder %s11131_s21, 4  }
 0x943   : > { %s11135_s30 = smov %s11132_s25 }
 0x944   :  { %31 = sbr.rel (!%p29_p9) target bundleno = 10 (0xa), region = 143 }
 0x949   :  { %5087 = vsyncpa [#allocation3], 1 }
 0x94a   :  { %5089 = vsyncpa [#allocation3 + $0x1], 1 }

</bundles_post_ra>
